<compile_context>
chip_gen: v7x
topology: tpu7x:2x2x1
jax: 0.10.0
libtpu: 0.0.40
codegen_flags: <defaults>
</compile_context>

<pallas_src>
import jax
import jax.numpy as jnp
from jax import lax
from jax.experimental import pallas as pl
from jax.experimental.pallas import tpu as pltpu


# ------------------------------- helpers ----------------------------------- #

def _round_up(x, m):
    return ((x + m - 1) // m) * m


def _pad_to(a, axis, target):
    pad = target - a.shape[axis]
    if pad <= 0:
        return a
    widths = [(0, 0)] * a.ndim
    widths[axis] = (0, pad)
    return jnp.pad(a, widths)


def _choose_tm(m):
    """>=2 parallel M tiles when M > 16; 256-multiples once M is large."""
    if m <= 16:
        return 16
    if m <= 512:
        return _round_up(-(-m // 2), 16)
    return 256


def _choose_tk(k):
    """>=2 K steps so the fc1 weight DMA double-buffers behind the MXU."""
    for t in (640, 512, 384, 256, 128):
        if k % t == 0 and k // t >= 2:
            return t
    return k


# --------------------- Kernel A: fused conv1/conv2/conv3 ------------------- #
#
# Per image:
#   s1 (408, 32)  conv1 output, rows ordered (r, s, hb, wb) with
#                 spatial (h, w) = (2*hb + r, 2*wb + s); rows 400..407 are 0.
#   s2 (96, 64)   conv2 output on the full 9x10 grid (row = oh*10 + ow,
#                 ow = 9 column is finite garbage); rows 90..95 are 0.
#   conv2 term (p,q,r,s):  rows [ (2r+s)*100 + 10p + q , +90 )  of s1
#   conv3 term (i,j):      rows [ 10i + j , +70 )               of s2
# Valid conv3 rows (ow <= 6) are compacted to 49 rows; row 49 is zero padding
# so the (B, 50, 64) output reshapes to the lane-padded fc1 input (B, 3200).

def _conv_stack_kernel(pat_ref, w1_ref, b1_ref, w2_ref, b2_ref,
                       w3_ref, b3_ref, out_ref, s1, s2):
    # conv1: single (400, 256) @ (256, 32) matmul on the pre-built patches.
    y1 = jnp.dot(pat_ref[0], w1_ref[...], preferred_element_type=jnp.float32)
    y1 = y1 + b1_ref[...]
    s1[pl.ds(0, 400), :] = y1.astype(s1.dtype)
    s1[pl.ds(400, 8), :] = jnp.zeros((8, 32), s1.dtype)

    # conv2 (4x4, stride 2): 16 shifted-row matmuls, K = 32 per term.
    acc2 = None
    for p in range(2):
        for q in range(2):
            for r in range(2):
                for s in range(2):
                    idx = ((p * 2 + q) * 2 + r) * 2 + s
                    base = (r * 2 + s) * 100 + p * 10 + q
                    term = jnp.dot(s1[pl.ds(base, 90), :], w2_ref[idx],
                                   preferred_element_type=jnp.float32)
                    acc2 = term if acc2 is None else acc2 + term
    y2 = acc2 + b2_ref[...]
    s2[pl.ds(0, 90), :] = y2.astype(s2.dtype)
    s2[pl.ds(90, 6), :] = jnp.zeros((6, 64), s2.dtype)

    # conv3 (3x3, stride 1): 9 shifted-row matmuls, K = 64 per term.
    acc3 = None
    for i in range(3):
        for j in range(3):
            term = jnp.dot(s2[pl.ds(i * 10 + j, 70), :], w3_ref[i * 3 + j],
                           preferred_element_type=jnp.float32)
            acc3 = term if acc3 is None else acc3 + term
    y3 = (acc3 + b3_ref[...]).astype(out_ref.dtype)

    # Compact the valid 7x7 spatial grid (drop the garbage ow>=7 columns).
    for oh in range(7):
        out_ref[0, pl.ds(oh * 7, 7), :] = y3[oh * 10: oh * 10 + 7, :]
    out_ref[0, pl.ds(49, 1), :] = jnp.zeros((1, 64), out_ref.dtype)


def conv_stack(pat1, w1, b1, w2, b2, w3, b3):
    """pat1: (B, 400, 256) bf16 conv1 patches -> (B, 50, 64) bf16 conv3 out."""
    B = pat1.shape[0]
    return pl.pallas_call(
        _conv_stack_kernel,
        out_shape=jax.ShapeDtypeStruct((B, 50, 64), jnp.bfloat16),
        grid=(B,),
        in_specs=[
            pl.BlockSpec((1, 400, 256), lambda b: (b, 0, 0)),
            pl.BlockSpec((256, 32), lambda b: (0, 0)),
            pl.BlockSpec((1, 32), lambda b: (0, 0)),
            pl.BlockSpec((16, 32, 64), lambda b: (0, 0, 0)),
            pl.BlockSpec((1, 64), lambda b: (0, 0)),
            pl.BlockSpec((9, 64, 64), lambda b: (0, 0, 0)),
            pl.BlockSpec((1, 64), lambda b: (0, 0)),
        ],
        out_specs=pl.BlockSpec((1, 50, 64), lambda b: (b, 0, 0)),
        scratch_shapes=[pltpu.VMEM((408, 32), jnp.bfloat16),
                        pltpu.VMEM((96, 64), jnp.bfloat16)],
        compiler_params=pltpu.CompilerParams(
            dimension_semantics=("parallel",)),
    )(pat1, w1, b1, w2, b2, w3, b3)


# ----------------------- Kernel B: fused fc1 + ReLU + fc2 ------------------ #

def _fc_kernel(x_ref, w1_ref, b1_ref, w2_ref, b2_ref, o_ref, acc_ref):
    k = pl.program_id(1)
    part = jnp.dot(x_ref[...], w1_ref[...], preferred_element_type=jnp.float32)

    @pl.when(k == 0)
    def _():
        acc_ref[...] = part          # direct write, no zero-fill + add

    @pl.when(k > 0)
    def _():
        acc_ref[...] += part

    @pl.when(k == pl.num_programs(1) - 1)
    def _():
        h = jnp.maximum(acc_ref[...] + b1_ref[...], 0.0)      # relu4
        h = h.astype(w2_ref.dtype)
        o_ref[...] = (jnp.dot(h, w2_ref[...], preferred_element_type=jnp.float32)
                      + b2_ref[...]).astype(o_ref.dtype)


def fused_fc(flat, w1, b1, w2, b2):
    """relu(flat @ w1 + b1) @ w2 + b2; hidden never leaves VMEM.
    flat: (M, K) bf16; w1: (K, H) bf16; b1: (1, H); w2: (H, Np) bf16; b2: (1, Np)."""
    M, K = flat.shape
    H = w1.shape[1]
    Np = w2.shape[1]
    TM = _choose_tm(M)
    Mp = _round_up(M, TM)
    if Mp != M:
        flat = jnp.pad(flat, ((0, Mp - M), (0, 0)))
    TK = _choose_tk(K)

    out = pl.pallas_call(
        _fc_kernel,
        out_shape=jax.ShapeDtypeStruct((Mp, Np), jnp.float32),
        grid=(Mp // TM, K // TK),
        in_specs=[
            pl.BlockSpec((TM, TK), lambda i, k: (i, k)),
            pl.BlockSpec((TK, H), lambda i, k: (k, 0)),
            pl.BlockSpec((1, H), lambda i, k: (0, 0)),
            pl.BlockSpec((H, Np), lambda i, k: (0, 0)),
            pl.BlockSpec((1, Np), lambda i, k: (0, 0)),
        ],
        out_specs=pl.BlockSpec((TM, Np), lambda i, k: (i, 0)),
        scratch_shapes=[pltpu.VMEM((TM, H), jnp.float32)],
        compiler_params=pltpu.CompilerParams(
            dimension_semantics=("parallel", "arbitrary")),
    )(flat, w1, b1, w2, b2)
    return out[:M] if Mp != M else out


# -------------------- conv1 patches (cheap XLA relayout) ------------------- #

def _conv1_patches(x):
    """x: (B, 4, 84, 84) -> (B, 400, 256) bf16 conv1 im2col patches.
    Row order per image: (r, s, hb, wb) with output (oh, ow) = (2*hb+r, 2*wb+s).
    K order: (p*2+q)*64 + c*16 + r1*4 + s1 with kernel (ki, kj) = (4p+r1, 4q+s1)."""
    B, C, H, W = x.shape
    assert (C, H, W) == (4, 84, 84), "fc1(3136) requires 4x84x84 inputs"
    xb = x.reshape(B, C, 21, 4, 21, 4).transpose(0, 2, 4, 1, 3, 5)
    xb = xb.reshape(B, 21, 21, 64)                       # depth = (c, r1, s1)
    cols = [xb[:, p:p + 20, q:q + 20, :] for p in (0, 1) for q in (0, 1)]
    pat = jnp.concatenate(cols, axis=-1)                 # (B, 20, 20, 256)
    pat = pat.reshape(B, 10, 2, 10, 2, 256).transpose(0, 2, 4, 1, 3, 5)
    return pat.reshape(B, 400, 256).astype(jnp.bfloat16)


# ------------------------- one-time parameter packing ---------------------- #

def _pack_conv1_weight(w):
    """(32, 4, 8, 8) OIHW -> (256, 32) bf16 matching _conv1_patches K order."""
    O, C, _, _ = w.shape
    wr = w.reshape(O, C, 2, 4, 2, 4)            # (O, c, p, r1, q, s1)
    wr = wr.transpose(0, 2, 4, 1, 3, 5)         # (O, p, q, c, r1, s1)
    return wr.reshape(O, 4 * C * 16).T.astype(jnp.bfloat16)


def _pack_conv2_weight(w):
    """(64, 32, 4, 4) OIHW -> (16, 32, 64) bf16, block idx = ((p*2+q)*2+r)*2+s,
    block[cin, cout] = w[cout, cin, 2p+r, 2q+s]."""
    w = jnp.transpose(w, (2, 3, 1, 0))          # (i, j, cin, cout)
    w = w.reshape(2, 2, 2, 2, 32, 64)           # (p, r, q, s, cin, cout)
    w = jnp.transpose(w, (0, 2, 1, 3, 4, 5))    # (p, q, r, s, cin, cout)
    return w.reshape(16, 32, 64).astype(jnp.bfloat16)


def _pack_conv3_weight(w):
    """(64, 64, 3, 3) OIHW -> (9, 64, 64) bf16, block idx = i*3 + j."""
    w = jnp.transpose(w, (2, 3, 1, 0))          # (i, j, cin, cout)
    return w.reshape(9, 64, 64).astype(jnp.bfloat16)


def _pack_fc1_weight(w, c=64, h=7, ww=7, k_pad=3200):
    """(512, 3136) torch C-major flatten -> (3200, 512) bf16 for the
    spatial-major / channel-fastest flatten produced by kernel A."""
    O = w.shape[0]
    wr = w.reshape(O, c, h, ww).transpose(0, 2, 3, 1)   # (O, h, w, c)
    wr = wr.reshape(O, h * ww * c).T                    # (3136, 512)
    return _pad_to(wr, 0, k_pad).astype(jnp.bfloat16)


def prepare_params(raw):
    """One-time packing: pre-transposed bf16 weights, f32 biases."""
    return {
        "w1": _pack_conv1_weight(raw["w1"]),
        "b1": raw["b1"].reshape(1, -1).astype(jnp.float32),
        "w2": _pack_conv2_weight(raw["w2"]),
        "b2": raw["b2"].reshape(1, -1).astype(jnp.float32),
        "w3": _pack_conv3_weight(raw["w3"]),
        "b3": raw["b3"].reshape(1, -1).astype(jnp.float32),
        "wfc1": _pack_fc1_weight(raw["wfc1"]),                          # (3200, 512)
        "bfc1": raw["bfc1"].reshape(1, -1).astype(jnp.float32),         # (1, 512)
        "wfc2": _pad_to(raw["wfc2"].T, 1, 128).astype(jnp.bfloat16),    # (512, 128)
        "bfc2": _pad_to(raw["bfc2"].reshape(1, -1).astype(jnp.float32), 1, 128),
    }


# ------------------------------ DQN forward -------------------------------- #

def init_params(key, actions=2):
    ks = jax.random.split(key, 5)
    std = 0.01
    return {
        "w1": std * jax.random.normal(ks[0], (32, 4, 8, 8), jnp.float32),
        "b1": jnp.full((32,), 0.01, jnp.float32),
        "w2": std * jax.random.normal(ks[1], (64, 32, 4, 4), jnp.float32),
        "b2": jnp.full((64,), 0.01, jnp.float32),
        "w3": std * jax.random.normal(ks[2], (64, 64, 3, 3), jnp.float32),
        "b3": jnp.full((64,), 0.01, jnp.float32),
        "wfc1": std * jax.random.normal(ks[3], (512, 3136), jnp.float32),
        "bfc1": jnp.full((512,), 0.01, jnp.float32),
        "wfc2": std * jax.random.normal(ks[4], (actions, 512), jnp.float32),
        "bfc2": jnp.full((actions,), 0.01, jnp.float32),
    }


def dqn_forward(p, x, actions=2):
    """x: (B, 4, 84, 84) NCHW f32 -> (B, actions) f32."""
    B = x.shape[0]
    pat1 = _conv1_patches(x.astype(jnp.bfloat16))
    y3 = conv_stack(pat1, p["w1"], p["b1"], p["w2"], p["b2"], p["w3"], p["b3"])
    flat = y3.reshape(B, 50 * 64)          # (B, 3200); last 64 lanes are zero pad
    out = fused_fc(flat, p["wfc1"], p["bfc1"], p["wfc2"], p["bfc2"])
    return out[:, :actions]


# ------------------------------ pure-JAX reference ------------------------- #

def reference_forward(raw, x):
    dn = ("NCHW", "OIHW", "NCHW")
    y = lax.conv_general_dilated(x, raw["w1"], (4, 4), "VALID",
                                 dimension_numbers=dn)
    y = y + raw["b1"].reshape(1, -1, 1, 1)
    y = lax.conv_general_dilated(y, raw["w2"], (2, 2), "VALID",
                                 dimension_numbers=dn)
    y = y + raw["b2"].reshape(1, -1, 1, 1)
    y = lax.conv_general_dilated(y, raw["w3"], (1, 1), "VALID",
                                 dimension_numbers=dn)
    y = y + raw["b3"].reshape(1, -1, 1, 1)
    flat = y.reshape(y.shape[0], -1)
    h = jnp.maximum(flat @ raw["wfc1"].T + raw["bfc1"], 0.0)
    return h @ raw["wfc2"].T + raw["bfc2"]


if __name__ == "__main__":
    ACTIONS = 2
    key = jax.random.PRNGKey(0)
    pkey, xkey = jax.random.split(key)

    raw = init_params(pkey, actions=ACTIONS)
    params = prepare_params(raw)      # one-time packing, not per-forward

    # Batch=2; spatial must be 84x84 so fc1's 3136 (= 64*7*7) is consistent.
    x = jax.random.normal(xkey, (2, 4, 84, 84), jnp.float32)

    fwd = jax.jit(lambda p, xx: dqn_forward(p, xx, ACTIONS))
    out = jax.block_until_ready(fwd(params, x))

    assert out.shape == (2, ACTIONS), out.shape
    assert bool(jnp.all(jnp.isfinite(out)))

    # Check against a pure-JAX f32 reference (bf16 weights/activations,
    # f32 accumulation -> loose tolerance).
    ref = jax.block_until_ready(reference_forward(raw, x))
    assert bool(jnp.allclose(out, ref, rtol=1e-1, atol=5e-3)), (out, ref)

    print("KERNEL_OK")
</pallas_src>

<mosaic_0001>
module attributes {stable_mosaic.version = 11 : i64} {
  func.func @_conv_stack_kernel(%arg0: i32, %arg1: memref<1x400x256xbf16, #tpu.memory_space<vmem>>, %arg2: memref<256x32xbf16, #tpu.memory_space<vmem>>, %arg3: memref<1x32xf32, #tpu.memory_space<vmem>>, %arg4: memref<16x32x64xbf16, #tpu.memory_space<vmem>>, %arg5: memref<1x64xf32, #tpu.memory_space<vmem>>, %arg6: memref<9x64x64xbf16, #tpu.memory_space<vmem>>, %arg7: memref<1x64xf32, #tpu.memory_space<vmem>>, %arg8: memref<1x50x64xbf16, #tpu.memory_space<vmem>>, %arg9: memref<408x32xbf16, #tpu.memory_space<vmem>>, %arg10: memref<96x64xbf16, #tpu.memory_space<vmem>>) attributes {dimension_semantics = [#tpu.dimension_semantics<parallel>], iteration_bounds = array<i64: 2>, scalar_prefetch = 0 : i64, scratch_operands = 2 : i64, tpu.core_type = #tpu.core_type<tc>, window_params = [{transform_indices = @transform_0, window_bounds = array<i64: 1, 400, 256>}, {pipeline_mode = #tpu.pipeline_mode<synchronous>, transform_indices = @transform_1, window_bounds = array<i64: 256, 32>}, {pipeline_mode = #tpu.pipeline_mode<synchronous>, transform_indices = @transform_2, window_bounds = array<i64: 1, 32>}, {pipeline_mode = #tpu.pipeline_mode<synchronous>, transform_indices = @transform_3, window_bounds = array<i64: 16, 32, 64>}, {pipeline_mode = #tpu.pipeline_mode<synchronous>, transform_indices = @transform_4, window_bounds = array<i64: 1, 64>}, {pipeline_mode = #tpu.pipeline_mode<synchronous>, transform_indices = @transform_5, window_bounds = array<i64: 9, 64, 64>}, {pipeline_mode = #tpu.pipeline_mode<synchronous>, transform_indices = @transform_6, window_bounds = array<i64: 1, 64>}, {transform_indices = @transform_7, window_bounds = array<i64: 1, 50, 64>}]} {
    %c0 = arith.constant 0 : index
    %c0_0 = arith.constant 0 : index
    %c0_1 = arith.constant 0 : index
    %0 = vector.load %arg1[%c0, %c0_0, %c0_1] : memref<1x400x256xbf16, #tpu.memory_space<vmem>>, vector<1x400x256xbf16>
    %1 = vector.shape_cast %0 : vector<1x400x256xbf16> to vector<400x256xbf16>
    %c0_2 = arith.constant 0 : index
    %c0_3 = arith.constant 0 : index
    %2 = vector.load %arg2[%c0_2, %c0_3] : memref<256x32xbf16, #tpu.memory_space<vmem>>, vector<256x32xbf16>
    %cst = arith.constant dense<0.000000e+00> : vector<400x32xf32>
    %3 = tpu.matmul %1, %2, %cst {dimension_numbers = #tpu.dot_dimension_numbers<[1], [0], [0], [1], [0, 0, 1, 1], [], []>} : vector<400x256xbf16>, vector<256x32xbf16>, vector<400x32xf32> -> vector<400x32xf32>
    %c0_4 = arith.constant 0 : index
    %c0_5 = arith.constant 0 : index
    %4 = vector.load %arg3[%c0_4, %c0_5] : memref<1x32xf32, #tpu.memory_space<vmem>>, vector<1x32xf32>
    %5 = vector.broadcast %4 : vector<1x32xf32> to vector<400x32xf32>
    %6 = arith.addf %3, %5 : vector<400x32xf32>
    %7 = arith.truncf %6 : vector<400x32xf32> to vector<400x32xbf16>
    %c0_6 = arith.constant 0 : index
    %c0_7 = arith.constant 0 : index
    %8 = vector.load %arg9[%c0_6, %c0_7] : memref<408x32xbf16, #tpu.memory_space<vmem>>, vector<400x32xbf16>
    tpu.vector_store %arg9[%c0_6, %c0_7], %7 {strides = array<i32>} : memref<408x32xbf16, #tpu.memory_space<vmem>>, vector<400x32xbf16>,
    %cst_8 = arith.constant 0.000000e+00 : bf16
    %9 = vector.broadcast %cst_8 : bf16 to vector<8x32xbf16>
    %c400 = arith.constant 400 : index
    %c0_9 = arith.constant 0 : index
    %10 = vector.load %arg9[%c400, %c0_9] : memref<408x32xbf16, #tpu.memory_space<vmem>>, vector<8x32xbf16>
    tpu.vector_store %arg9[%c400, %c0_9], %9 {strides = array<i32>} : memref<408x32xbf16, #tpu.memory_space<vmem>>, vector<8x32xbf16>,
    %c0_10 = arith.constant 0 : index
    %c0_11 = arith.constant 0 : index
    %11 = vector.load %arg9[%c0_10, %c0_11] : memref<408x32xbf16, #tpu.memory_space<vmem>>, vector<90x32xbf16>
    %c0_12 = arith.constant 0 : index
    %c0_13 = arith.constant 0 : index
    %c0_14 = arith.constant 0 : index
    %12 = vector.load %arg4[%c0_12, %c0_13, %c0_14] : memref<16x32x64xbf16, #tpu.memory_space<vmem>>, vector<1x32x64xbf16>
    %13 = vector.shape_cast %12 : vector<1x32x64xbf16> to vector<32x64xbf16>
    %cst_15 = arith.constant dense<0.000000e+00> : vector<90x64xf32>
    %14 = tpu.matmul %11, %13, %cst_15 {dimension_numbers = #tpu.dot_dimension_numbers<[1], [0], [0], [1], [0, 0, 1, 1], [], []>} : vector<90x32xbf16>, vector<32x64xbf16>, vector<90x64xf32> -> vector<90x64xf32>
    %c100 = arith.constant 100 : index
    %c0_16 = arith.constant 0 : index
    %15 = vector.load %arg9[%c100, %c0_16] : memref<408x32xbf16, #tpu.memory_space<vmem>>, vector<90x32xbf16>
    %c1 = arith.constant 1 : index
    %c0_17 = arith.constant 0 : index
    %c0_18 = arith.constant 0 : index
    %16 = vector.load %arg4[%c1, %c0_17, %c0_18] : memref<16x32x64xbf16, #tpu.memory_space<vmem>>, vector<1x32x64xbf16>
    %17 = vector.shape_cast %16 : vector<1x32x64xbf16> to vector<32x64xbf16>
    %cst_19 = arith.constant dense<0.000000e+00> : vector<90x64xf32>
    %18 = tpu.matmul %15, %17, %cst_19 {dimension_numbers = #tpu.dot_dimension_numbers<[1], [0], [0], [1], [0, 0, 1, 1], [], []>} : vector<90x32xbf16>, vector<32x64xbf16>, vector<90x64xf32> -> vector<90x64xf32>
    %19 = arith.addf %14, %18 : vector<90x64xf32>
    %c200 = arith.constant 200 : index
    %c0_20 = arith.constant 0 : index
    %20 = vector.load %arg9[%c200, %c0_20] : memref<408x32xbf16, #tpu.memory_space<vmem>>, vector<90x32xbf16>
    %c2 = arith.constant 2 : index
    %c0_21 = arith.constant 0 : index
    %c0_22 = arith.constant 0 : index
    %21 = vector.load %arg4[%c2, %c0_21, %c0_22] : memref<16x32x64xbf16, #tpu.memory_space<vmem>>, vector<1x32x64xbf16>
    %22 = vector.shape_cast %21 : vector<1x32x64xbf16> to vector<32x64xbf16>
    %cst_23 = arith.constant dense<0.000000e+00> : vector<90x64xf32>
    %23 = tpu.matmul %20, %22, %cst_23 {dimension_numbers = #tpu.dot_dimension_numbers<[1], [0], [0], [1], [0, 0, 1, 1], [], []>} : vector<90x32xbf16>, vector<32x64xbf16>, vector<90x64xf32> -> vector<90x64xf32>
    %24 = arith.addf %19, %23 : vector<90x64xf32>
    %c300 = arith.constant 300 : index
    %c0_24 = arith.constant 0 : index
    %25 = vector.load %arg9[%c300, %c0_24] : memref<408x32xbf16, #tpu.memory_space<vmem>>, vector<90x32xbf16>
    %c3 = arith.constant 3 : index
    %c0_25 = arith.constant 0 : index
    %c0_26 = arith.constant 0 : index
    %26 = vector.load %arg4[%c3, %c0_25, %c0_26] : memref<16x32x64xbf16, #tpu.memory_space<vmem>>, vector<1x32x64xbf16>
    %27 = vector.shape_cast %26 : vector<1x32x64xbf16> to vector<32x64xbf16>
    %cst_27 = arith.constant dense<0.000000e+00> : vector<90x64xf32>
    %28 = tpu.matmul %25, %27, %cst_27 {dimension_numbers = #tpu.dot_dimension_numbers<[1], [0], [0], [1], [0, 0, 1, 1], [], []>} : vector<90x32xbf16>, vector<32x64xbf16>, vector<90x64xf32> -> vector<90x64xf32>
    %29 = arith.addf %24, %28 : vector<90x64xf32>
    %c1_28 = arith.constant 1 : index
    %c0_29 = arith.constant 0 : index
    %30 = vector.load %arg9[%c1_28, %c0_29] : memref<408x32xbf16, #tpu.memory_space<vmem>>, vector<90x32xbf16>
    %c4 = arith.constant 4 : index
    %c0_30 = arith.constant 0 : index
    %c0_31 = arith.constant 0 : index
    %31 = vector.load %arg4[%c4, %c0_30, %c0_31] : memref<16x32x64xbf16, #tpu.memory_space<vmem>>, vector<1x32x64xbf16>
    %32 = vector.shape_cast %31 : vector<1x32x64xbf16> to vector<32x64xbf16>
    %cst_32 = arith.constant dense<0.000000e+00> : vector<90x64xf32>
    %33 = tpu.matmul %30, %32, %cst_32 {dimension_numbers = #tpu.dot_dimension_numbers<[1], [0], [0], [1], [0, 0, 1, 1], [], []>} : vector<90x32xbf16>, vector<32x64xbf16>, vector<90x64xf32> -> vector<90x64xf32>
    %34 = arith.addf %29, %33 : vector<90x64xf32>
    %c101 = arith.constant 101 : index
    %c0_33 = arith.constant 0 : index
    %35 = vector.load %arg9[%c101, %c0_33] : memref<408x32xbf16, #tpu.memory_space<vmem>>, vector<90x32xbf16>
    %c5 = arith.constant 5 : index
    %c0_34 = arith.constant 0 : index
    %c0_35 = arith.constant 0 : index
    %36 = vector.load %arg4[%c5, %c0_34, %c0_35] : memref<16x32x64xbf16, #tpu.memory_space<vmem>>, vector<1x32x64xbf16>
    %37 = vector.shape_cast %36 : vector<1x32x64xbf16> to vector<32x64xbf16>
    %cst_36 = arith.constant dense<0.000000e+00> : vector<90x64xf32>
    %38 = tpu.matmul %35, %37, %cst_36 {dimension_numbers = #tpu.dot_dimension_numbers<[1], [0], [0], [1], [0, 0, 1, 1], [], []>} : vector<90x32xbf16>, vector<32x64xbf16>, vector<90x64xf32> -> vector<90x64xf32>
    %39 = arith.addf %34, %38 : vector<90x64xf32>
    %c201 = arith.constant 201 : index
    %c0_37 = arith.constant 0 : index
    %40 = vector.load %arg9[%c201, %c0_37] : memref<408x32xbf16, #tpu.memory_space<vmem>>, vector<90x32xbf16>
    %c6 = arith.constant 6 : index
    %c0_38 = arith.constant 0 : index
    %c0_39 = arith.constant 0 : index
    %41 = vector.load %arg4[%c6, %c0_38, %c0_39] : memref<16x32x64xbf16, #tpu.memory_space<vmem>>, vector<1x32x64xbf16>
    %42 = vector.shape_cast %41 : vector<1x32x64xbf16> to vector<32x64xbf16>
    %cst_40 = arith.constant dense<0.000000e+00> : vector<90x64xf32>
    %43 = tpu.matmul %40, %42, %cst_40 {dimension_numbers = #tpu.dot_dimension_numbers<[1], [0], [0], [1], [0, 0, 1, 1], [], []>} : vector<90x32xbf16>, vector<32x64xbf16>, vector<90x64xf32> -> vector<90x64xf32>
    %44 = arith.addf %39, %43 : vector<90x64xf32>
    %c301 = arith.constant 301 : index
    %c0_41 = arith.constant 0 : index
    %45 = vector.load %arg9[%c301, %c0_41] : memref<408x32xbf16, #tpu.memory_space<vmem>>, vector<90x32xbf16>
    %c7 = arith.constant 7 : index
    %c0_42 = arith.constant 0 : index
    %c0_43 = arith.constant 0 : index
    %46 = vector.load %arg4[%c7, %c0_42, %c0_43] : memref<16x32x64xbf16, #tpu.memory_space<vmem>>, vector<1x32x64xbf16>
    %47 = vector.shape_cast %46 : vector<1x32x64xbf16> to vector<32x64xbf16>
    %cst_44 = arith.constant dense<0.000000e+00> : vector<90x64xf32>
    %48 = tpu.matmul %45, %47, %cst_44 {dimension_numbers = #tpu.dot_dimension_numbers<[1], [0], [0], [1], [0, 0, 1, 1], [], []>} : vector<90x32xbf16>, vector<32x64xbf16>, vector<90x64xf32> -> vector<90x64xf32>
    %49 = arith.addf %44, %48 : vector<90x64xf32>
    %c10 = arith.constant 10 : index
    %c0_45 = arith.constant 0 : index
    %50 = vector.load %arg9[%c10, %c0_45] : memref<408x32xbf16, #tpu.memory_space<vmem>>, vector<90x32xbf16>
    %c8 = arith.constant 8 : index
    %c0_46 = arith.constant 0 : index
    %c0_47 = arith.constant 0 : index
    %51 = vector.load %arg4[%c8, %c0_46, %c0_47] : memref<16x32x64xbf16, #tpu.memory_space<vmem>>, vector<1x32x64xbf16>
    %52 = vector.shape_cast %51 : vector<1x32x64xbf16> to vector<32x64xbf16>
    %cst_48 = arith.constant dense<0.000000e+00> : vector<90x64xf32>
    %53 = tpu.matmul %50, %52, %cst_48 {dimension_numbers = #tpu.dot_dimension_numbers<[1], [0], [0], [1], [0, 0, 1, 1], [], []>} : vector<90x32xbf16>, vector<32x64xbf16>, vector<90x64xf32> -> vector<90x64xf32>
    %54 = arith.addf %49, %53 : vector<90x64xf32>
    %c110 = arith.constant 110 : index
    %c0_49 = arith.constant 0 : index
    %55 = vector.load %arg9[%c110, %c0_49] : memref<408x32xbf16, #tpu.memory_space<vmem>>, vector<90x32xbf16>
    %c9 = arith.constant 9 : index
    %c0_50 = arith.constant 0 : index
    %c0_51 = arith.constant 0 : index
    %56 = vector.load %arg4[%c9, %c0_50, %c0_51] : memref<16x32x64xbf16, #tpu.memory_space<vmem>>, vector<1x32x64xbf16>
    %57 = vector.shape_cast %56 : vector<1x32x64xbf16> to vector<32x64xbf16>
    %cst_52 = arith.constant dense<0.000000e+00> : vector<90x64xf32>
    %58 = tpu.matmul %55, %57, %cst_52 {dimension_numbers = #tpu.dot_dimension_numbers<[1], [0], [0], [1], [0, 0, 1, 1], [], []>} : vector<90x32xbf16>, vector<32x64xbf16>, vector<90x64xf32> -> vector<90x64xf32>
    %59 = arith.addf %54, %58 : vector<90x64xf32>
    %c210 = arith.constant 210 : index
    %c0_53 = arith.constant 0 : index
    %60 = vector.load %arg9[%c210, %c0_53] : memref<408x32xbf16, #tpu.memory_space<vmem>>, vector<90x32xbf16>
    %c10_54 = arith.constant 10 : index
    %c0_55 = arith.constant 0 : index
    %c0_56 = arith.constant 0 : index
    %61 = vector.load %arg4[%c10_54, %c0_55, %c0_56] : memref<16x32x64xbf16, #tpu.memory_space<vmem>>, vector<1x32x64xbf16>
    %62 = vector.shape_cast %61 : vector<1x32x64xbf16> to vector<32x64xbf16>
    %cst_57 = arith.constant dense<0.000000e+00> : vector<90x64xf32>
    %63 = tpu.matmul %60, %62, %cst_57 {dimension_numbers = #tpu.dot_dimension_numbers<[1], [0], [0], [1], [0, 0, 1, 1], [], []>} : vector<90x32xbf16>, vector<32x64xbf16>, vector<90x64xf32> -> vector<90x64xf32>
    %64 = arith.addf %59, %63 : vector<90x64xf32>
    %c310 = arith.constant 310 : index
    %c0_58 = arith.constant 0 : index
    %65 = vector.load %arg9[%c310, %c0_58] : memref<408x32xbf16, #tpu.memory_space<vmem>>, vector<90x32xbf16>
    %c11 = arith.constant 11 : index
    %c0_59 = arith.constant 0 : index
    %c0_60 = arith.constant 0 : index
    %66 = vector.load %arg4[%c11, %c0_59, %c0_60] : memref<16x32x64xbf16, #tpu.memory_space<vmem>>, vector<1x32x64xbf16>
    %67 = vector.shape_cast %66 : vector<1x32x64xbf16> to vector<32x64xbf16>
    %cst_61 = arith.constant dense<0.000000e+00> : vector<90x64xf32>
    %68 = tpu.matmul %65, %67, %cst_61 {dimension_numbers = #tpu.dot_dimension_numbers<[1], [0], [0], [1], [0, 0, 1, 1], [], []>} : vector<90x32xbf16>, vector<32x64xbf16>, vector<90x64xf32> -> vector<90x64xf32>
    %69 = arith.addf %64, %68 : vector<90x64xf32>
    %c11_62 = arith.constant 11 : index
    %c0_63 = arith.constant 0 : index
    %70 = vector.load %arg9[%c11_62, %c0_63] : memref<408x32xbf16, #tpu.memory_space<vmem>>, vector<90x32xbf16>
    %c12 = arith.constant 12 : index
    %c0_64 = arith.constant 0 : index
    %c0_65 = arith.constant 0 : index
    %71 = vector.load %arg4[%c12, %c0_64, %c0_65] : memref<16x32x64xbf16, #tpu.memory_space<vmem>>, vector<1x32x64xbf16>
    %72 = vector.shape_cast %71 : vector<1x32x64xbf16> to vector<32x64xbf16>
    %cst_66 = arith.constant dense<0.000000e+00> : vector<90x64xf32>
    %73 = tpu.matmul %70, %72, %cst_66 {dimension_numbers = #tpu.dot_dimension_numbers<[1], [0], [0], [1], [0, 0, 1, 1], [], []>} : vector<90x32xbf16>, vector<32x64xbf16>, vector<90x64xf32> -> vector<90x64xf32>
    %74 = arith.addf %69, %73 : vector<90x64xf32>
    %c111 = arith.constant 111 : index
    %c0_67 = arith.constant 0 : index
    %75 = vector.load %arg9[%c111, %c0_67] : memref<408x32xbf16, #tpu.memory_space<vmem>>, vector<90x32xbf16>
    %c13 = arith.constant 13 : index
    %c0_68 = arith.constant 0 : index
    %c0_69 = arith.constant 0 : index
    %76 = vector.load %arg4[%c13, %c0_68, %c0_69] : memref<16x32x64xbf16, #tpu.memory_space<vmem>>, vector<1x32x64xbf16>
    %77 = vector.shape_cast %76 : vector<1x32x64xbf16> to vector<32x64xbf16>
    %cst_70 = arith.constant dense<0.000000e+00> : vector<90x64xf32>
    %78 = tpu.matmul %75, %77, %cst_70 {dimension_numbers = #tpu.dot_dimension_numbers<[1], [0], [0], [1], [0, 0, 1, 1], [], []>} : vector<90x32xbf16>, vector<32x64xbf16>, vector<90x64xf32> -> vector<90x64xf32>
    %79 = arith.addf %74, %78 : vector<90x64xf32>
    %c211 = arith.constant 211 : index
    %c0_71 = arith.constant 0 : index
    %80 = vector.load %arg9[%c211, %c0_71] : memref<408x32xbf16, #tpu.memory_space<vmem>>, vector<90x32xbf16>
    %c14 = arith.constant 14 : index
    %c0_72 = arith.constant 0 : index
    %c0_73 = arith.constant 0 : index
    %81 = vector.load %arg4[%c14, %c0_72, %c0_73] : memref<16x32x64xbf16, #tpu.memory_space<vmem>>, vector<1x32x64xbf16>
    %82 = vector.shape_cast %81 : vector<1x32x64xbf16> to vector<32x64xbf16>
    %cst_74 = arith.constant dense<0.000000e+00> : vector<90x64xf32>
    %83 = tpu.matmul %80, %82, %cst_74 {dimension_numbers = #tpu.dot_dimension_numbers<[1], [0], [0], [1], [0, 0, 1, 1], [], []>} : vector<90x32xbf16>, vector<32x64xbf16>, vector<90x64xf32> -> vector<90x64xf32>
    %84 = arith.addf %79, %83 : vector<90x64xf32>
    %c311 = arith.constant 311 : index
    %c0_75 = arith.constant 0 : index
    %85 = vector.load %arg9[%c311, %c0_75] : memref<408x32xbf16, #tpu.memory_space<vmem>>, vector<90x32xbf16>
    %c15 = arith.constant 15 : index
    %c0_76 = arith.constant 0 : index
    %c0_77 = arith.constant 0 : index
    %86 = vector.load %arg4[%c15, %c0_76, %c0_77] : memref<16x32x64xbf16, #tpu.memory_space<vmem>>, vector<1x32x64xbf16>
    %87 = vector.shape_cast %86 : vector<1x32x64xbf16> to vector<32x64xbf16>
    %cst_78 = arith.constant dense<0.000000e+00> : vector<90x64xf32>
    %88 = tpu.matmul %85, %87, %cst_78 {dimension_numbers = #tpu.dot_dimension_numbers<[1], [0], [0], [1], [0, 0, 1, 1], [], []>} : vector<90x32xbf16>, vector<32x64xbf16>, vector<90x64xf32> -> vector<90x64xf32>
    %89 = arith.addf %84, %88 : vector<90x64xf32>
    %c0_79 = arith.constant 0 : index
    %c0_80 = arith.constant 0 : index
    %90 = vector.load %arg5[%c0_79, %c0_80] : memref<1x64xf32, #tpu.memory_space<vmem>>, vector<1x64xf32>
    %91 = vector.broadcast %90 : vector<1x64xf32> to vector<90x64xf32>
    %92 = arith.addf %89, %91 : vector<90x64xf32>
    %93 = arith.truncf %92 : vector<90x64xf32> to vector<90x64xbf16>
    %c0_81 = arith.constant 0 : index
    %c0_82 = arith.constant 0 : index
    %94 = vector.load %arg10[%c0_81, %c0_82] : memref<96x64xbf16, #tpu.memory_space<vmem>>, vector<90x64xbf16>
    tpu.vector_store %arg10[%c0_81, %c0_82], %93 {strides = array<i32>} : memref<96x64xbf16, #tpu.memory_space<vmem>>, vector<90x64xbf16>,
    %cst_83 = arith.constant 0.000000e+00 : bf16
    %95 = vector.broadcast %cst_83 : bf16 to vector<6x64xbf16>
    %c90 = arith.constant 90 : index
    %c0_84 = arith.constant 0 : index
    %96 = vector.load %arg10[%c90, %c0_84] : memref<96x64xbf16, #tpu.memory_space<vmem>>, vector<6x64xbf16>
    tpu.vector_store %arg10[%c90, %c0_84], %95 {strides = array<i32>} : memref<96x64xbf16, #tpu.memory_space<vmem>>, vector<6x64xbf16>,
    %c0_85 = arith.constant 0 : index
    %c0_86 = arith.constant 0 : index
    %97 = vector.load %arg10[%c0_85, %c0_86] : memref<96x64xbf16, #tpu.memory_space<vmem>>, vector<70x64xbf16>
    %c0_87 = arith.constant 0 : index
    %c0_88 = arith.constant 0 : index
    %c0_89 = arith.constant 0 : index
    %98 = vector.load %arg6[%c0_87, %c0_88, %c0_89] : memref<9x64x64xbf16, #tpu.memory_space<vmem>>, vector<1x64x64xbf16>
    %99 = vector.shape_cast %98 : vector<1x64x64xbf16> to vector<64x64xbf16>
    %cst_90 = arith.constant dense<0.000000e+00> : vector<70x64xf32>
    %100 = tpu.matmul %97, %99, %cst_90 {dimension_numbers = #tpu.dot_dimension_numbers<[1], [0], [0], [1], [0, 0, 1, 1], [], []>} : vector<70x64xbf16>, vector<64x64xbf16>, vector<70x64xf32> -> vector<70x64xf32>
    %c1_91 = arith.constant 1 : index
    %c0_92 = arith.constant 0 : index
    %101 = vector.load %arg10[%c1_91, %c0_92] : memref<96x64xbf16, #tpu.memory_space<vmem>>, vector<70x64xbf16>
    %c1_93 = arith.constant 1 : index
    %c0_94 = arith.constant 0 : index
    %c0_95 = arith.constant 0 : index
    %102 = vector.load %arg6[%c1_93, %c0_94, %c0_95] : memref<9x64x64xbf16, #tpu.memory_space<vmem>>, vector<1x64x64xbf16>
    %103 = vector.shape_cast %102 : vector<1x64x64xbf16> to vector<64x64xbf16>
    %cst_96 = arith.constant dense<0.000000e+00> : vector<70x64xf32>
    %104 = tpu.matmul %101, %103, %cst_96 {dimension_numbers = #tpu.dot_dimension_numbers<[1], [0], [0], [1], [0, 0, 1, 1], [], []>} : vector<70x64xbf16>, vector<64x64xbf16>, vector<70x64xf32> -> vector<70x64xf32>
    %105 = arith.addf %100, %104 : vector<70x64xf32>
    %c2_97 = arith.constant 2 : index
    %c0_98 = arith.constant 0 : index
    %106 = vector.load %arg10[%c2_97, %c0_98] : memref<96x64xbf16, #tpu.memory_space<vmem>>, vector<70x64xbf16>
    %c2_99 = arith.constant 2 : index
    %c0_100 = arith.constant 0 : index
    %c0_101 = arith.constant 0 : index
    %107 = vector.load %arg6[%c2_99, %c0_100, %c0_101] : memref<9x64x64xbf16, #tpu.memory_space<vmem>>, vector<1x64x64xbf16>
    %108 = vector.shape_cast %107 : vector<1x64x64xbf16> to vector<64x64xbf16>
    %cst_102 = arith.constant dense<0.000000e+00> : vector<70x64xf32>
    %109 = tpu.matmul %106, %108, %cst_102 {dimension_numbers = #tpu.dot_dimension_numbers<[1], [0], [0], [1], [0, 0, 1, 1], [], []>} : vector<70x64xbf16>, vector<64x64xbf16>, vector<70x64xf32> -> vector<70x64xf32>
    %110 = arith.addf %105, %109 : vector<70x64xf32>
    %c10_103 = arith.constant 10 : index
    %c0_104 = arith.constant 0 : index
    %111 = vector.load %arg10[%c10_103, %c0_104] : memref<96x64xbf16, #tpu.memory_space<vmem>>, vector<70x64xbf16>
    %c3_105 = arith.constant 3 : index
    %c0_106 = arith.constant 0 : index
    %c0_107 = arith.constant 0 : index
    %112 = vector.load %arg6[%c3_105, %c0_106, %c0_107] : memref<9x64x64xbf16, #tpu.memory_space<vmem>>, vector<1x64x64xbf16>
    %113 = vector.shape_cast %112 : vector<1x64x64xbf16> to vector<64x64xbf16>
    %cst_108 = arith.constant dense<0.000000e+00> : vector<70x64xf32>
    %114 = tpu.matmul %111, %113, %cst_108 {dimension_numbers = #tpu.dot_dimension_numbers<[1], [0], [0], [1], [0, 0, 1, 1], [], []>} : vector<70x64xbf16>, vector<64x64xbf16>, vector<70x64xf32> -> vector<70x64xf32>
    %115 = arith.addf %110, %114 : vector<70x64xf32>
    %c11_109 = arith.constant 11 : index
    %c0_110 = arith.constant 0 : index
    %116 = vector.load %arg10[%c11_109, %c0_110] : memref<96x64xbf16, #tpu.memory_space<vmem>>, vector<70x64xbf16>
    %c4_111 = arith.constant 4 : index
    %c0_112 = arith.constant 0 : index
    %c0_113 = arith.constant 0 : index
    %117 = vector.load %arg6[%c4_111, %c0_112, %c0_113] : memref<9x64x64xbf16, #tpu.memory_space<vmem>>, vector<1x64x64xbf16>
    %118 = vector.shape_cast %117 : vector<1x64x64xbf16> to vector<64x64xbf16>
    %cst_114 = arith.constant dense<0.000000e+00> : vector<70x64xf32>
    %119 = tpu.matmul %116, %118, %cst_114 {dimension_numbers = #tpu.dot_dimension_numbers<[1], [0], [0], [1], [0, 0, 1, 1], [], []>} : vector<70x64xbf16>, vector<64x64xbf16>, vector<70x64xf32> -> vector<70x64xf32>
    %120 = arith.addf %115, %119 : vector<70x64xf32>
    %c12_115 = arith.constant 12 : index
    %c0_116 = arith.constant 0 : index
    %121 = vector.load %arg10[%c12_115, %c0_116] : memref<96x64xbf16, #tpu.memory_space<vmem>>, vector<70x64xbf16>
    %c5_117 = arith.constant 5 : index
    %c0_118 = arith.constant 0 : index
    %c0_119 = arith.constant 0 : index
    %122 = vector.load %arg6[%c5_117, %c0_118, %c0_119] : memref<9x64x64xbf16, #tpu.memory_space<vmem>>, vector<1x64x64xbf16>
    %123 = vector.shape_cast %122 : vector<1x64x64xbf16> to vector<64x64xbf16>
    %cst_120 = arith.constant dense<0.000000e+00> : vector<70x64xf32>
    %124 = tpu.matmul %121, %123, %cst_120 {dimension_numbers = #tpu.dot_dimension_numbers<[1], [0], [0], [1], [0, 0, 1, 1], [], []>} : vector<70x64xbf16>, vector<64x64xbf16>, vector<70x64xf32> -> vector<70x64xf32>
    %125 = arith.addf %120, %124 : vector<70x64xf32>
    %c20 = arith.constant 20 : index
    %c0_121 = arith.constant 0 : index
    %126 = vector.load %arg10[%c20, %c0_121] : memref<96x64xbf16, #tpu.memory_space<vmem>>, vector<70x64xbf16>
    %c6_122 = arith.constant 6 : index
    %c0_123 = arith.constant 0 : index
    %c0_124 = arith.constant 0 : index
    %127 = vector.load %arg6[%c6_122, %c0_123, %c0_124] : memref<9x64x64xbf16, #tpu.memory_space<vmem>>, vector<1x64x64xbf16>
    %128 = vector.shape_cast %127 : vector<1x64x64xbf16> to vector<64x64xbf16>
    %cst_125 = arith.constant dense<0.000000e+00> : vector<70x64xf32>
    %129 = tpu.matmul %126, %128, %cst_125 {dimension_numbers = #tpu.dot_dimension_numbers<[1], [0], [0], [1], [0, 0, 1, 1], [], []>} : vector<70x64xbf16>, vector<64x64xbf16>, vector<70x64xf32> -> vector<70x64xf32>
    %130 = arith.addf %125, %129 : vector<70x64xf32>
    %c21 = arith.constant 21 : index
    %c0_126 = arith.constant 0 : index
    %131 = vector.load %arg10[%c21, %c0_126] : memref<96x64xbf16, #tpu.memory_space<vmem>>, vector<70x64xbf16>
    %c7_127 = arith.constant 7 : index
    %c0_128 = arith.constant 0 : index
    %c0_129 = arith.constant 0 : index
    %132 = vector.load %arg6[%c7_127, %c0_128, %c0_129] : memref<9x64x64xbf16, #tpu.memory_space<vmem>>, vector<1x64x64xbf16>
    %133 = vector.shape_cast %132 : vector<1x64x64xbf16> to vector<64x64xbf16>
    %cst_130 = arith.constant dense<0.000000e+00> : vector<70x64xf32>
    %134 = tpu.matmul %131, %133, %cst_130 {dimension_numbers = #tpu.dot_dimension_numbers<[1], [0], [0], [1], [0, 0, 1, 1], [], []>} : vector<70x64xbf16>, vector<64x64xbf16>, vector<70x64xf32> -> vector<70x64xf32>
    %135 = arith.addf %130, %134 : vector<70x64xf32>
    %c22 = arith.constant 22 : index
    %c0_131 = arith.constant 0 : index
    %136 = vector.load %arg10[%c22, %c0_131] : memref<96x64xbf16, #tpu.memory_space<vmem>>, vector<70x64xbf16>
    %c8_132 = arith.constant 8 : index
    %c0_133 = arith.constant 0 : index
    %c0_134 = arith.constant 0 : index
    %137 = vector.load %arg6[%c8_132, %c0_133, %c0_134] : memref<9x64x64xbf16, #tpu.memory_space<vmem>>, vector<1x64x64xbf16>
    %138 = vector.shape_cast %137 : vector<1x64x64xbf16> to vector<64x64xbf16>
    %cst_135 = arith.constant dense<0.000000e+00> : vector<70x64xf32>
    %139 = tpu.matmul %136, %138, %cst_135 {dimension_numbers = #tpu.dot_dimension_numbers<[1], [0], [0], [1], [0, 0, 1, 1], [], []>} : vector<70x64xbf16>, vector<64x64xbf16>, vector<70x64xf32> -> vector<70x64xf32>
    %140 = arith.addf %135, %139 : vector<70x64xf32>
    %c0_136 = arith.constant 0 : index
    %c0_137 = arith.constant 0 : index
    %141 = vector.load %arg7[%c0_136, %c0_137] : memref<1x64xf32, #tpu.memory_space<vmem>>, vector<1x64xf32>
    %142 = vector.broadcast %141 : vector<1x64xf32> to vector<70x64xf32>
    %143 = arith.addf %140, %142 : vector<70x64xf32>
    %144 = arith.truncf %143 : vector<70x64xf32> to vector<70x64xbf16>
    %145 = vector.extract_strided_slice %144 {offsets = [0, 0], sizes = [7, 64], strides = [1, 1]} : vector<70x64xbf16> to vector<7x64xbf16>
    %c0_138 = arith.constant 0 : index
    %c0_139 = arith.constant 0 : index
    %c0_140 = arith.constant 0 : index
    %146 = vector.load %arg8[%c0_138, %c0_139, %c0_140] : memref<1x50x64xbf16, #tpu.memory_space<vmem>>, vector<1x7x64xbf16>
    %147 = vector.shape_cast %146 : vector<1x7x64xbf16> to vector<7x64xbf16>
    %148 = vector.shape_cast %145 : vector<7x64xbf16> to vector<1x7x64xbf16>
    tpu.vector_store %arg8[%c0_138, %c0_139, %c0_140], %148 {strides = array<i32>} : memref<1x50x64xbf16, #tpu.memory_space<vmem>>, vector<1x7x64xbf16>,
    %149 = vector.extract_strided_slice %144 {offsets = [10, 0], sizes = [7, 64], strides = [1, 1]} : vector<70x64xbf16> to vector<7x64xbf16>
    %c0_141 = arith.constant 0 : index
    %c7_142 = arith.constant 7 : index
    %c0_143 = arith.constant 0 : index
    %150 = vector.load %arg8[%c0_141, %c7_142, %c0_143] : memref<1x50x64xbf16, #tpu.memory_space<vmem>>, vector<1x7x64xbf16>
    %151 = vector.shape_cast %150 : vector<1x7x64xbf16> to vector<7x64xbf16>
    %152 = vector.shape_cast %149 : vector<7x64xbf16> to vector<1x7x64xbf16>
    tpu.vector_store %arg8[%c0_141, %c7_142, %c0_143], %152 {strides = array<i32>} : memref<1x50x64xbf16, #tpu.memory_space<vmem>>, vector<1x7x64xbf16>,
    %153 = vector.extract_strided_slice %144 {offsets = [20, 0], sizes = [7, 64], strides = [1, 1]} : vector<70x64xbf16> to vector<7x64xbf16>
    %c0_144 = arith.constant 0 : index
    %c14_145 = arith.constant 14 : index
    %c0_146 = arith.constant 0 : index
    %154 = vector.load %arg8[%c0_144, %c14_145, %c0_146] : memref<1x50x64xbf16, #tpu.memory_space<vmem>>, vector<1x7x64xbf16>
    %155 = vector.shape_cast %154 : vector<1x7x64xbf16> to vector<7x64xbf16>
    %156 = vector.shape_cast %153 : vector<7x64xbf16> to vector<1x7x64xbf16>
    tpu.vector_store %arg8[%c0_144, %c14_145, %c0_146], %156 {strides = array<i32>} : memref<1x50x64xbf16, #tpu.memory_space<vmem>>, vector<1x7x64xbf16>,
    %157 = vector.extract_strided_slice %144 {offsets = [30, 0], sizes = [7, 64], strides = [1, 1]} : vector<70x64xbf16> to vector<7x64xbf16>
    %c0_147 = arith.constant 0 : index
    %c21_148 = arith.constant 21 : index
    %c0_149 = arith.constant 0 : index
    %158 = vector.load %arg8[%c0_147, %c21_148, %c0_149] : memref<1x50x64xbf16, #tpu.memory_space<vmem>>, vector<1x7x64xbf16>
    %159 = vector.shape_cast %158 : vector<1x7x64xbf16> to vector<7x64xbf16>
    %160 = vector.shape_cast %157 : vector<7x64xbf16> to vector<1x7x64xbf16>
    tpu.vector_store %arg8[%c0_147, %c21_148, %c0_149], %160 {strides = array<i32>} : memref<1x50x64xbf16, #tpu.memory_space<vmem>>, vector<1x7x64xbf16>,
    %161 = vector.extract_strided_slice %144 {offsets = [40, 0], sizes = [7, 64], strides = [1, 1]} : vector<70x64xbf16> to vector<7x64xbf16>
    %c0_150 = arith.constant 0 : index
    %c28 = arith.constant 28 : index
    %c0_151 = arith.constant 0 : index
    %162 = vector.load %arg8[%c0_150, %c28, %c0_151] : memref<1x50x64xbf16, #tpu.memory_space<vmem>>, vector<1x7x64xbf16>
    %163 = vector.shape_cast %162 : vector<1x7x64xbf16> to vector<7x64xbf16>
    %164 = vector.shape_cast %161 : vector<7x64xbf16> to vector<1x7x64xbf16>
    tpu.vector_store %arg8[%c0_150, %c28, %c0_151], %164 {strides = array<i32>} : memref<1x50x64xbf16, #tpu.memory_space<vmem>>, vector<1x7x64xbf16>,
    %165 = vector.extract_strided_slice %144 {offsets = [50, 0], sizes = [7, 64], strides = [1, 1]} : vector<70x64xbf16> to vector<7x64xbf16>
    %c0_152 = arith.constant 0 : index
    %c35 = arith.constant 35 : index
    %c0_153 = arith.constant 0 : index
    %166 = vector.load %arg8[%c0_152, %c35, %c0_153] : memref<1x50x64xbf16, #tpu.memory_space<vmem>>, vector<1x7x64xbf16>
    %167 = vector.shape_cast %166 : vector<1x7x64xbf16> to vector<7x64xbf16>
    %168 = vector.shape_cast %165 : vector<7x64xbf16> to vector<1x7x64xbf16>
    tpu.vector_store %arg8[%c0_152, %c35, %c0_153], %168 {strides = array<i32>} : memref<1x50x64xbf16, #tpu.memory_space<vmem>>, vector<1x7x64xbf16>,
    %169 = vector.extract_strided_slice %144 {offsets = [60, 0], sizes = [7, 64], strides = [1, 1]} : vector<70x64xbf16> to vector<7x64xbf16>
    %c0_154 = arith.constant 0 : index
    %c42 = arith.constant 42 : index
    %c0_155 = arith.constant 0 : index
    %170 = vector.load %arg8[%c0_154, %c42, %c0_155] : memref<1x50x64xbf16, #tpu.memory_space<vmem>>, vector<1x7x64xbf16>
    %171 = vector.shape_cast %170 : vector<1x7x64xbf16> to vector<7x64xbf16>
    %172 = vector.shape_cast %169 : vector<7x64xbf16> to vector<1x7x64xbf16>
    tpu.vector_store %arg8[%c0_154, %c42, %c0_155], %172 {strides = array<i32>} : memref<1x50x64xbf16, #tpu.memory_space<vmem>>, vector<1x7x64xbf16>,
    %cst_156 = arith.constant 0.000000e+00 : bf16
    %173 = vector.broadcast %cst_156 : bf16 to vector<1x64xbf16>
    %c0_157 = arith.constant 0 : index
    %c49 = arith.constant 49 : index
    %c0_158 = arith.constant 0 : index
    %174 = vector.load %arg8[%c0_157, %c49, %c0_158] : memref<1x50x64xbf16, #tpu.memory_space<vmem>>, vector<1x1x64xbf16>
    %175 = vector.shape_cast %174 : vector<1x1x64xbf16> to vector<1x64xbf16>
    %176 = vector.shape_cast %173 : vector<1x64xbf16> to vector<1x1x64xbf16>
    tpu.vector_store %arg8[%c0_157, %c49, %c0_158], %176 {strides = array<i32>} : memref<1x50x64xbf16, #tpu.memory_space<vmem>>, vector<1x1x64xbf16>,
    return
  }
  func.func @transform_0(%arg0: i32) -> (i32, i32, i32) {
    %c0_i32 = arith.constant 0 : i32
    %c0_i32_0 = arith.constant 0 : i32
    %c0_i32_1 = arith.constant 0 : i32
    return %arg0, %c0_i32, %c0_i32_0 : i32, i32, i32
  }
  func.func @transform_1(%arg0: i32) -> (i32, i32) {
    %c0_i32 = arith.constant 0 : i32
    %c0_i32_0 = arith.constant 0 : i32
    %c0_i32_1 = arith.constant 0 : i32
    return %c0_i32, %c0_i32_0 : i32, i32
  }
  func.func @transform_2(%arg0: i32) -> (i32, i32) {
    %c0_i32 = arith.constant 0 : i32
    %c0_i32_0 = arith.constant 0 : i32
    %c0_i32_1 = arith.constant 0 : i32
    return %c0_i32, %c0_i32_0 : i32, i32
  }
  func.func @transform_3(%arg0: i32) -> (i32, i32, i32) {
    %c0_i32 = arith.constant 0 : i32
    %c0_i32_0 = arith.constant 0 : i32
    %c0_i32_1 = arith.constant 0 : i32
    %c0_i32_2 = arith.constant 0 : i32
    return %c0_i32, %c0_i32_0, %c0_i32_1 : i32, i32, i32
  }
  func.func @transform_4(%arg0: i32) -> (i32, i32) {
    %c0_i32 = arith.constant 0 : i32
    %c0_i32_0 = arith.constant 0 : i32
    %c0_i32_1 = arith.constant 0 : i32
    return %c0_i32, %c0_i32_0 : i32, i32
  }
  func.func @transform_5(%arg0: i32) -> (i32, i32, i32) {
    %c0_i32 = arith.constant 0 : i32
    %c0_i32_0 = arith.constant 0 : i32
    %c0_i32_1 = arith.constant 0 : i32
    %c0_i32_2 = arith.constant 0 : i32
    return %c0_i32, %c0_i32_0, %c0_i32_1 : i32, i32, i32
  }
  func.func @transform_6(%arg0: i32) -> (i32, i32) {
    %c0_i32 = arith.constant 0 : i32
    %c0_i32_0 = arith.constant 0 : i32
    %c0_i32_1 = arith.constant 0 : i32
    return %c0_i32, %c0_i32_0 : i32, i32
  }
  func.func @transform_7(%arg0: i32) -> (i32, i32, i32) {
    %c0_i32 = arith.constant 0 : i32
    %c0_i32_0 = arith.constant 0 : i32
    %c0_i32_1 = arith.constant 0 : i32
    return %arg0, %c0_i32, %c0_i32_0 : i32, i32, i32
  }
}

module attributes {stable_mosaic.version = 11 : i64} {
  func.func @_fc_kernel(%arg0: i32, %arg1: i32, %arg2: memref<16x640xbf16, #tpu.memory_space<vmem>>, %arg3: memref<640x512xbf16, #tpu.memory_space<vmem>>, %arg4: memref<1x512xf32, #tpu.memory_space<vmem>>, %arg5: memref<512x128xbf16, #tpu.memory_space<vmem>>, %arg6: memref<1x128xf32, #tpu.memory_space<vmem>>, %arg7: memref<16x128xf32, #tpu.memory_space<vmem>>, %arg8: memref<16x512xf32, #tpu.memory_space<vmem>>) attributes {dimension_semantics = [#tpu.dimension_semantics<parallel>, #tpu.dimension_semantics<arbitrary>], iteration_bounds = array<i64: 1, 5>, scalar_prefetch = 0 : i64, scratch_operands = 1 : i64, tpu.core_type = #tpu.core_type<tc>, window_params = [{transform_indices = @transform_0, window_bounds = array<i64: 16, 640>}, {transform_indices = @transform_1, window_bounds = array<i64: 640, 512>}, {pipeline_mode = #tpu.pipeline_mode<synchronous>, transform_indices = @transform_2, window_bounds = array<i64: 1, 512>}, {pipeline_mode = #tpu.pipeline_mode<synchronous>, transform_indices = @transform_3, window_bounds = array<i64: 512, 128>}, {pipeline_mode = #tpu.pipeline_mode<synchronous>, transform_indices = @transform_4, window_bounds = array<i64: 1, 128>}, {transform_indices = @transform_5, window_bounds = array<i64: 16, 128>}]} {
    %c0 = arith.constant 0 : index
    %c0_0 = arith.constant 0 : index
    %0 = vector.load %arg2[%c0, %c0_0] : memref<16x640xbf16, #tpu.memory_space<vmem>>, vector<16x640xbf16>
    %c0_1 = arith.constant 0 : index
    %c0_2 = arith.constant 0 : index
    %1 = vector.load %arg3[%c0_1, %c0_2] : memref<640x512xbf16, #tpu.memory_space<vmem>>, vector<640x512xbf16>
    %cst = arith.constant dense<0.000000e+00> : vector<16x512xf32>
    %2 = tpu.matmul %0, %1, %cst {dimension_numbers = #tpu.dot_dimension_numbers<[1], [0], [0], [1], [0, 0, 1, 1], [], []>} : vector<16x640xbf16>, vector<640x512xbf16>, vector<16x512xf32> -> vector<16x512xf32>
    %c0_i32 = arith.constant 0 : i32
    %3 = arith.cmpi eq, %arg1, %c0_i32 : i32
    %4 = arith.extui %3 : i1 to i32
    %c0_i32_3 = arith.constant 0 : i32
    %5 = arith.cmpi ne, %4, %c0_i32_3 : i32
    scf.if %5 {
      %c0_7 = arith.constant 0 : index
      %c0_8 = arith.constant 0 : index
      %12 = vector.load %arg8[%c0_7, %c0_8] : memref<16x512xf32, #tpu.memory_space<vmem>>, vector<16x512xf32>
      tpu.vector_store %arg8[%c0_7, %c0_8], %2 {strides = array<i32>} : memref<16x512xf32, #tpu.memory_space<vmem>>, vector<16x512xf32>,
    } else {
    }
    %c0_i32_4 = arith.constant 0 : i32
    %6 = arith.cmpi sgt, %arg1, %c0_i32_4 : i32
    %7 = arith.extui %6 : i1 to i32
    %c0_i32_5 = arith.constant 0 : i32
    %8 = arith.cmpi ne, %7, %c0_i32_5 : i32
    scf.if %8 {
      %c0_7 = arith.constant 0 : index
      %c0_8 = arith.constant 0 : index
      %12 = vector.load %arg8[%c0_7, %c0_8] : memref<16x512xf32, #tpu.memory_space<vmem>>, vector<16x512xf32>
      %13 = arith.addf %12, %2 : vector<16x512xf32>
      %c0_9 = arith.constant 0 : index
      %c0_10 = arith.constant 0 : index
      %14 = vector.load %arg8[%c0_9, %c0_10] : memref<16x512xf32, #tpu.memory_space<vmem>>, vector<16x512xf32>
      tpu.vector_store %arg8[%c0_9, %c0_10], %13 {strides = array<i32>} : memref<16x512xf32, #tpu.memory_space<vmem>>, vector<16x512xf32>,
    } else {
    }
    %c4_i32 = arith.constant 4 : i32
    %9 = arith.cmpi eq, %arg1, %c4_i32 : i32
    %10 = arith.extui %9 : i1 to i32
    %c0_i32_6 = arith.constant 0 : i32
    %11 = arith.cmpi ne, %10, %c0_i32_6 : i32
    scf.if %11 {
      %c0_7 = arith.constant 0 : index
      %c0_8 = arith.constant 0 : index
      %12 = vector.load %arg8[%c0_7, %c0_8] : memref<16x512xf32, #tpu.memory_space<vmem>>, vector<16x512xf32>
      %c0_9 = arith.constant 0 : index
      %c0_10 = arith.constant 0 : index
      %13 = vector.load %arg4[%c0_9, %c0_10] : memref<1x512xf32, #tpu.memory_space<vmem>>, vector<1x512xf32>
      %14 = vector.broadcast %13 : vector<1x512xf32> to vector<16x512xf32>
      %15 = arith.addf %12, %14 : vector<16x512xf32>
      %cst_11 = arith.constant 0.000000e+00 : f32
      %16 = vector.broadcast %cst_11 : f32 to vector<16x512xf32>
      %17 = arith.maximumf %15, %16 : vector<16x512xf32>
      %18 = arith.truncf %17 : vector<16x512xf32> to vector<16x512xbf16>
      %c0_12 = arith.constant 0 : index
      %c0_13 = arith.constant 0 : index
      %19 = vector.load %arg5[%c0_12, %c0_13] : memref<512x128xbf16, #tpu.memory_space<vmem>>, vector<512x128xbf16>
      %cst_14 = arith.constant dense<0.000000e+00> : vector<16x128xf32>
      %20 = tpu.matmul %18, %19, %cst_14 {dimension_numbers = #tpu.dot_dimension_numbers<[1], [0], [0], [1], [0, 0, 1, 1], [], []>} : vector<16x512xbf16>, vector<512x128xbf16>, vector<16x128xf32> -> vector<16x128xf32>
      %c0_15 = arith.constant 0 : index
      %c0_16 = arith.constant 0 : index
      %21 = vector.load %arg6[%c0_15, %c0_16] : memref<1x128xf32, #tpu.memory_space<vmem>>, vector<1x128xf32>
      %22 = vector.broadcast %21 : vector<1x128xf32> to vector<16x128xf32>
      %23 = arith.addf %20, %22 : vector<16x128xf32>
      %c0_17 = arith.constant 0 : index
      %c0_18 = arith.constant 0 : index
      %24 = vector.load %arg7[%c0_17, %c0_18] : memref<16x128xf32, #tpu.memory_space<vmem>>, vector<16x128xf32>
      tpu.vector_store %arg7[%c0_17, %c0_18], %23 {strides = array<i32>} : memref<16x128xf32, #tpu.memory_space<vmem>>, vector<16x128xf32>,
    } else {
    }
    return
  }
  func.func @transform_0(%arg0: i32, %arg1: i32) -> (i32, i32) {
    %c0_i32 = arith.constant 0 : i32
    return %arg0, %arg1 : i32, i32
  }
  func.func @transform_1(%arg0: i32, %arg1: i32) -> (i32, i32) {
    %c0_i32 = arith.constant 0 : i32
    %c0_i32_0 = arith.constant 0 : i32
    return %arg1, %c0_i32 : i32, i32
  }
  func.func @transform_2(%arg0: i32, %arg1: i32) -> (i32, i32) {
    %c0_i32 = arith.constant 0 : i32
    %c0_i32_0 = arith.constant 0 : i32
    %c0_i32_1 = arith.constant 0 : i32
    return %c0_i32, %c0_i32_0 : i32, i32
  }
  func.func @transform_3(%arg0: i32, %arg1: i32) -> (i32, i32) {
    %c0_i32 = arith.constant 0 : i32
    %c0_i32_0 = arith.constant 0 : i32
    %c0_i32_1 = arith.constant 0 : i32
    return %c0_i32, %c0_i32_0 : i32, i32
  }
  func.func @transform_4(%arg0: i32, %arg1: i32) -> (i32, i32) {
    %c0_i32 = arith.constant 0 : i32
    %c0_i32_0 = arith.constant 0 : i32
    %c0_i32_1 = arith.constant 0 : i32
    return %c0_i32, %c0_i32_0 : i32, i32
  }
  func.func @transform_5(%arg0: i32, %arg1: i32) -> (i32, i32) {
    %c0_i32 = arith.constant 0 : i32
    %c0_i32_0 = arith.constant 0 : i32
    return %arg0, %c0_i32 : i32, i32
  }
}

</mosaic_0001>

<bundles_post_ra>
// kernel: _lambda_.3
= control target key start
LH: loop header
LB: loop body
LE: loop exit
PB: predicated region body
PF: predicated region fallthrough
CT: control target
= control target key end

     0   :  { %s2759_s18 = smov 0   ;;  %s2761_s19 = smov 0   ;;  %s3104_s0 = inlined_call_operand.vmem [shape: bf16[16,3200], index: 0, kind: input, shape index: {}]   ;;  %s3105_s1 = inlined_call_operand.vmem [shape: bf16[3200,512], index: 1, kind: input, shape index: {}]   ;;  %s3106_s2 = inlined_call_operand.vmem [shape: f32[1,512], index: 2, kind: input, shape index: {}]   ;;  %s3107_s3 = inlined_call_operand.vmem [shape: bf16[512,128], index: 3, kind: input, shape index: {}]   ;;  %s3108_s4 = inlined_call_operand.vmem [shape: f32[1,128], index: 4, kind: input, shape index: {}]   ;;  %s3109_s5 = inlined_call_operand.vmem [shape: f32[16,128], index: 5, kind: output, shape index: {}]  }
   0x1   :  { %s2763_s20 = smov 0   ;;  %s2765_s21 = smov 0  }
   0x2   :  { %s2767_s22 = smov 0  }
   0x3 LB: > { %s24_s23 = sadd.s32 1, %s2722_s21  ;;  %p43_p1 = scmp.ne.s32.totalorder %s2714_s19, %s2710_s18  ;;  %s2726_s22 = sphi %s2767_s22, %s15_s22   ;;  %s2722_s21 = sphi %s2765_s21, %s3113_s21   ;;  %s2718_s20 = sphi %s2763_s20, %s3112_s20   ;;  %s2714_s19 = sphi %s2761_s19, %s3111_s19   ;;  %s2710_s18 = sphi %s2759_s18, %s3110_s18  }
   0x4   : > { %p25_p0 = scmp.ge.s32.totalorder %s24_s23, 5  ;;  %p44_p2 = scmp.eq.s32.totalorder %s2726_s22, 0 }
   0x5   : > { %s36_s25 = sadd.s32 1, %s2714_s19  ;;  %p2090_p5 = scmp.ge.s32.totalorder %s2726_s22, 5 }
   0x6   : > { %s3115_s23 = smov (%p25_p0, %s24_s23), 0  ;;  %p45_p3 = por %p44_p2, %p43_p1 }
   0x7   : > { %s32_s24 = ssub.s32 %s2722_s21, %s3115_s23  ;;  %193 = sbr.rel (%p2090_p5) target bundleno = 22 (0x16), region = 28 }
   0x8   : > { %p34_p4 = scmp.eq.s32.totalorder %s32_s24, 0 }
   0xa   : > { %s2794_s26 = scalar_select %p34_p4, %s2714_s19, %s36_s25  }
   0xe   : > { %196 = sbr.rel (!%p45_p3) target bundleno = 22 (0x16), region = 32  ;;  %s198_s27 = sand.u32 (%p45_p3), 1, %s2714_s19  }
   0xf   : > { %s2304_s28 = smul.u32 (%p45_p3), 20, %s2722_s21 }
  0x10   : > { %s2366_s29 = smul.u32 (%p45_p3), 40, %s198_s27 }
  0x11   : > { %s206_s7 = scalar_lea.vmem (%p45_p3), %s3104_s0, %s2304_s28 }
  0x12   : > { %v221_v0 = vld [vmem:[%s206_s7] sm:$0xff] (%p45_p3)  ;;  %v223_v1 = vld [vmem:[%s206_s7 + $0x8] sm:$0xff] (%p45_p3)  ;;  %s200_s8 = scalar_lea.vmem (%p45_p3), [#allocation3], %s2366_s29  ;;  %v2092_v4 = vld [vmem:[%s206_s7 + $0x10] sm:$0xf] (%p45_p3) }
  0x13   : > { %v225_v2 = vld [vmem:[%s206_s7 + $0x64] sm:$0xff] (%p45_p3)  ;;  %222 = vst [vmem:[%s200_s8] sm:$0xff] (%p45_p3), %v221_v0  ;;  %224 = vst [vmem:[%s200_s8 + $0x8] sm:$0xff] (%p45_p3), %v223_v1  ;;  %v227_v3 = vld [vmem:[%s206_s7 + $0x6c] sm:$0xff] (%p45_p3) }
  0x14   : > { %226 = vst [vmem:[%s200_s8 + $0x14] sm:$0xff] (%p45_p3), %v225_v2  ;;  %v2094_v5 = vld [vmem:[%s206_s7 + $0x74] sm:$0xf] (%p45_p3)  ;;  %228 = vst [vmem:[%s200_s8 + $0x1c] sm:$0xff] (%p45_p3), %v227_v3 }
  0x15   : > { %2093 = vst [vmem:[%s200_s8 + $0x10] sm:$0xf] %v2092_v4  ;;  %2095 = vst [vmem:[%s200_s8 + $0x24] sm:$0xf] %v2094_v5 }
  0x16 PF: > { %p2096_p6 = scmp.ge.s32.totalorder %s2726_s22, 1  ;;  %p254_p7 = scmp.lt.s32.totalorder %s2726_s22, 6 }
  0x18   : > { %p255_p8 = pnand %p2096_p6, %p254_p7 }
  0x19   : > { %s296_s9 = smul.u32 (!%p255_p8), 80, %s2718_s20  ;;  %s261_s10 = sand.u32 (!%p255_p8), 1, %s2710_s18  }
  0x1a   : > { %258 = sbr.rel (%p255_p8) target bundleno = 681 (0x2a9), region = 62  ;;  %p2264_p10 = scmp.ne.s32.totalorder (!%p255_p8), %s2718_s20, 0 }
  0x1b   : > { %s2367_s11 = smul.u32 (!%p255_p8), 40, %s261_s10  ;;  %p297_p9 = scmp.lt.s32.totalorder (!%p255_p8), %s296_s9, 399 }
  0x1d   : > { %s2806_s12 = scalar_lea.vmem (!%p255_p8), [#allocation3], %s2367_s11 }
  0x1e   : > { %v2507_v6 = vld [vmem:[%s2806_s12 + $0x4] ss:$20 sps:$4 sm:$0xff] (!%p255_p8)  }
  0x1f   : > { %1334 = vmatprep.mubr.bf16.mxu0 (!%p255_p8), %v2507_v6  ;;  %1463 = vmatprep.mubr.bf16.mxu1 (!%p255_p8), %v2507_v6 }
  0x21   : > { %s3117_s9 = smov (!%p297_p9, %s296_s9), 399 }
  0x22   : > { %s2305_s13 = sshll.u32 %s3117_s9, 4 }
  0x23   : > { %s2812_s16 = scalar_lea.vmem %s3105_s1, %s2305_s13 }
  0x24   : > { %v2409_v7 = vld [vmem:[%s2812_s16 + $0x4] ss:$16 sps:$4 sm:$0xff]   ;;  %v2411_v8 = vld [vmem:[%s2812_s16 + $0xc] ss:$16 sps:$4 sm:$0xff]   ;;  %v2413_v9 = vld [vmem:[%s2812_s16] ss:$16 sps:$4 sm:$0xff]  }
  0x25   : > { %1302 = vmatprep.subr.bf16.mxu0 %v2409_v7  ;;  %v2414_v10 = vld [vmem:[%s2812_s16 + $0x8] ss:$16 sps:$4 sm:$0xff]   ;;  %1431 = vmatprep.subr.bf16.mxu1 %v2411_v8  ;;  %v2415_v11 = vld [vmem:[%s2812_s16 + $0x24] ss:$16 sps:$4 sm:$0xff]   ;;  %v2417_v12 = vld [vmem:[%s2812_s16 + $0x2c] ss:$16 sps:$4 sm:$0xff]  }
  0x26   : > { %1303 = vmatpush1.bf16.msra.mxu0 %v2413_v9  ;;  %1432 = vmatpush1.bf16.msra.mxu1 %v2414_v10  ;;  %v2419_v13 = vld [vmem:[%s2812_s16 + $0x20] ss:$16 sps:$4 sm:$0xff]   ;;  %v2420_v14 = vld [vmem:[%s2812_s16 + $0x28] ss:$16 sps:$4 sm:$0xff]   ;;  %v2421_v15 = vld [vmem:[%s2812_s16 + $0x44] ss:$16 sps:$4 sm:$0xff]  }
  0x27   : > { %1304 = vmatprep.subr.bf16.mxu0 %v2415_v11  ;;  %1433 = vmatprep.subr.bf16.mxu1 %v2417_v12  ;;  %v2423_v16 = vld [vmem:[%s2812_s16 + $0x4c] ss:$16 sps:$4 sm:$0xff]   ;;  %v2425_v17 = vld [vmem:[%s2812_s16 + $0x40] ss:$16 sps:$4 sm:$0xff]   ;;  %v2426_v18 = vld [vmem:[%s2812_s16 + $0x48] ss:$16 sps:$4 sm:$0xff]  }
  0x28   : > { %v2427_v19 = vld [vmem:[%s2812_s16 + $0x64] ss:$16 sps:$4 sm:$0xff]   ;;  %v2429_v20 = vld [vmem:[%s2812_s16 + $0x6c] ss:$16 sps:$4 sm:$0xff]   ;;  %v2431_v21 = vld [vmem:[%s2812_s16 + $0x60] ss:$16 sps:$4 sm:$0xff]  }
  0x29   : > { %v2432_v22 = vld [vmem:[%s2812_s16 + $0x68] ss:$16 sps:$4 sm:$0xff]   ;;  %v2433_v23 = vld [vmem:[%s2812_s16 + $0x84] ss:$16 sps:$4 sm:$0xff]   ;;  %v2435_v24 = vld [vmem:[%s2812_s16 + $0x8c] ss:$16 sps:$4 sm:$0xff]  }
  0x2a   : > { %1305 = vmatpush1.bf16.msra.mxu0 %v2419_v13  ;;  %1434 = vmatpush1.bf16.msra.mxu1 %v2420_v14  ;;  %v2437_v25 = vld [vmem:[%s2812_s16 + $0x80] ss:$16 sps:$4 sm:$0xff]   ;;  %v2438_v26 = vld [vmem:[%s2812_s16 + $0x88] ss:$16 sps:$4 sm:$0xff]   ;;  %v2439_v27 = vld [vmem:[%s2812_s16 + $0xa4] ss:$16 sps:$4 sm:$0xff]  }
  0x2b   : > { %1306 = vmatprep.subr.bf16.mxu0 %v2421_v15  ;;  %1435 = vmatprep.subr.bf16.mxu1 %v2423_v16  ;;  %v2441_v28 = vld [vmem:[%s2812_s16 + $0xac] ss:$16 sps:$4 sm:$0xff]   ;;  %v2443_v29 = vld [vmem:[%s2812_s16 + $0xa0] ss:$16 sps:$4 sm:$0xff]   ;;  %v2444_v30 = vld [vmem:[%s2812_s16 + $0xa8] ss:$16 sps:$4 sm:$0xff]  }
  0x2c   : > { %v2445_v31 = vld [vmem:[%s2812_s16 + $0xc4] ss:$16 sps:$4 sm:$0xff]   ;;  %v2447_v32 = vld [vmem:[%s2812_s16 + $0xcc] ss:$16 sps:$4 sm:$0xff]   ;;  %v2449_v33 = vld [vmem:[%s2812_s16 + $0xc0] ss:$16 sps:$4 sm:$0xff]  }
  0x2d   : > { %v2450_v34 = vld [vmem:[%s2812_s16 + $0xc8] ss:$16 sps:$4 sm:$0xff]   ;;  %v2451_v35 = vld [vmem:[%s2812_s16 + $0xe4] ss:$16 sps:$4 sm:$0xff]   ;;  %v2453_v36 = vld [vmem:[%s2812_s16 + $0xec] ss:$16 sps:$4 sm:$0xff]  }
  0x2e   : > { %1307 = vmatpush1.bf16.msra.mxu0 %v2425_v17  ;;  %1436 = vmatpush1.bf16.msra.mxu1 %v2426_v18  ;;  %v2455_v37 = vld [vmem:[%s2812_s16 + $0xe0] ss:$16 sps:$4 sm:$0xff]   ;;  %v2456_v38 = vld [vmem:[%s2812_s16 + $0xe8] ss:$16 sps:$4 sm:$0xff]   ;;  %v2457_v39 = vld [vmem:[%s2812_s16 + $0x104] ss:$16 sps:$4 sm:$0xff]  }
  0x2f   : > { %1308 = vmatprep.subr.bf16.mxu0 %v2427_v19  ;;  %1437 = vmatprep.subr.bf16.mxu1 %v2429_v20  ;;  %v2459_v40 = vld [vmem:[%s2812_s16 + $0x10c] ss:$16 sps:$4 sm:$0xff]   ;;  %v2461_v41 = vld [vmem:[%s2812_s16 + $0x100] ss:$16 sps:$4 sm:$0xff]   ;;  %v2462_v42 = vld [vmem:[%s2812_s16 + $0x108] ss:$16 sps:$4 sm:$0xff]  }
  0x30   : > { %v2463_v43 = vld [vmem:[%s2812_s16 + $0x124] ss:$16 sps:$4 sm:$0xff]   ;;  %v2465_v44 = vld [vmem:[%s2812_s16 + $0x12c] ss:$16 sps:$4 sm:$0xff]   ;;  %v2467_v45 = vld [vmem:[%s2812_s16 + $0x120] ss:$16 sps:$4 sm:$0xff]  }
  0x31   : > { %v2468_v46 = vld [vmem:[%s2812_s16 + $0x128] ss:$16 sps:$4 sm:$0xff]   ;;  %v2469_v47 = vld [vmem:[%s2812_s16 + $0x144] ss:$16 sps:$4 sm:$0xff]   ;;  %v2471_v48 = vld [vmem:[%s2812_s16 + $0x14c] ss:$16 sps:$4 sm:$0xff]  }
  0x32   : > { %1309 = vmatpush1.bf16.msra.mxu0 %v2431_v21  ;;  %1438 = vmatpush1.bf16.msra.mxu1 %v2432_v22  ;;  %v2473_v49 = vld [vmem:[%s2812_s16 + $0x140] ss:$16 sps:$4 sm:$0xff]   ;;  %v2474_v50 = vld [vmem:[%s2812_s16 + $0x148] ss:$16 sps:$4 sm:$0xff]   ;;  %v2475_v51 = vld [vmem:[%s2812_s16 + $0x164] ss:$16 sps:$4 sm:$0xff]  }
  0x33   : > { %1310 = vmatprep.subr.bf16.mxu0 %v2433_v23  ;;  %1439 = vmatprep.subr.bf16.mxu1 %v2435_v24  ;;  %v2477_v52 = vld [vmem:[%s2812_s16 + $0x16c] ss:$16 sps:$4 sm:$0xff]   ;;  %v2479_v53 = vld [vmem:[%s2812_s16 + $0x160] ss:$16 sps:$4 sm:$0xff]   ;;  %v2480_v54 = vld [vmem:[%s2812_s16 + $0x168] ss:$16 sps:$4 sm:$0xff]  }
  0x34   : > { %v2481_v55 = vld [vmem:[%s2812_s16 + $0x184] ss:$16 sps:$4 sm:$0xff]   ;;  %v2483_v56 = vld [vmem:[%s2812_s16 + $0x18c] ss:$16 sps:$4 sm:$0xff]   ;;  %v2485_v57 = vld [vmem:[%s2812_s16 + $0x180] ss:$16 sps:$4 sm:$0xff]  }
  0x35   : > { %v2486_v58 = vld [vmem:[%s2812_s16 + $0x188] ss:$16 sps:$4 sm:$0xff]   ;;  %v2487_v59 = vld [vmem:[%s2812_s16 + $0x1a4] ss:$16 sps:$4 sm:$0xff]   ;;  %v2489_v60 = vld [vmem:[%s2812_s16 + $0x1ac] ss:$16 sps:$4 sm:$0xff]  }
  0x36   : > { %1311 = vmatpush1.bf16.msra.mxu0 %v2437_v25  ;;  %1440 = vmatpush1.bf16.msra.mxu1 %v2438_v26  ;;  %v2491_v61 = vld [vmem:[%s2812_s16 + $0x1a0] ss:$16 sps:$4 sm:$0xff]   ;;  %v2492_v62 = vld [vmem:[%s2812_s16 + $0x1a8] ss:$16 sps:$4 sm:$0xff]   ;;  %v2493_v63 = vld [vmem:[%s2812_s16 + $0x1c4] ss:$16 sps:$4 sm:$0xff]  }
  0x37   : > { %1312 = vmatprep.subr.bf16.mxu0 %v2439_v27  ;;  %1441 = vmatprep.subr.bf16.mxu1 %v2441_v28  ;;  %v2495_v0 = vld [vmem:[%s2812_s16 + $0x1cc] ss:$16 sps:$4 sm:$0xff]   ;;  %v2497_v1 = vld [vmem:[%s2812_s16 + $0x1c0] ss:$16 sps:$4 sm:$0xff]   ;;  %v2498_v2 = vld [vmem:[%s2812_s16 + $0x1c8] ss:$16 sps:$4 sm:$0xff]  }
  0x38   : > { %v2499_v3 = vld [vmem:[%s2812_s16 + $0x1e4] ss:$16 sps:$4 sm:$0xff]   ;;  %v2501_v4 = vld [vmem:[%s2812_s16 + $0x1ec] ss:$16 sps:$4 sm:$0xff]   ;;  %v2503_v5 = vld [vmem:[%s2812_s16 + $0x1e0] ss:$16 sps:$4 sm:$0xff]  }
  0x39   : > { %v2504_v6 = vld [vmem:[%s2812_s16 + $0x1e8] ss:$16 sps:$4 sm:$0xff]   ;;  %v2510_v7 = vld [vmem:[%s2812_s16 + $0x204] ss:$16 sps:$4 sm:$0xff]   ;;  %v2513_v8 = vld [vmem:[%s2812_s16 + $0x20c] ss:$16 sps:$4 sm:$0xff]  }
  0x3a   : > { %1313 = vmatpush1.bf16.msra.mxu0 %v2443_v29  ;;  %1442 = vmatpush1.bf16.msra.mxu1 %v2444_v30  ;;  %v2505_v9 = vld [vmem:[%s2806_s12] ss:$20 sps:$4 sm:$0xff]  }
  0x3b   : > { %1314 = vmatprep.subr.bf16.mxu0 %v2445_v31  ;;  %1443 = vmatprep.subr.bf16.mxu1 %v2447_v32  ;;  %v2508_v10 = vld [vmem:[%s2812_s16 + $0x200] ss:$16 sps:$4 sm:$0xff]   ;;  %v2511_v11 = vld [vmem:[%s2812_s16 + $0x208] ss:$16 sps:$4 sm:$0xff]   ;;  %v2516_v12 = vld [vmem:[%s2812_s16 + $0x224] ss:$16 sps:$4 sm:$0xff]  }
  0x3c   : > { %v2519_v13 = vld [vmem:[%s2812_s16 + $0x22c] ss:$16 sps:$4 sm:$0xff]   ;;  %v2514_v14 = vld [vmem:[%s2812_s16 + $0x220] ss:$16 sps:$4 sm:$0xff]   ;;  %v2517_v15 = vld [vmem:[%s2812_s16 + $0x228] ss:$16 sps:$4 sm:$0xff]  }
  0x3d   : > { %v2522_v16 = vld [vmem:[%s2812_s16 + $0x244] ss:$16 sps:$4 sm:$0xff]   ;;  %v2525_v17 = vld [vmem:[%s2812_s16 + $0x24c] ss:$16 sps:$4 sm:$0xff]   ;;  %v2520_v18 = vld [vmem:[%s2812_s16 + $0x240] ss:$16 sps:$4 sm:$0xff]  }
  0x3e   : > { %1315 = vmatpush1.bf16.msra.mxu0 %v2449_v33  ;;  %1444 = vmatpush1.bf16.msra.mxu1 %v2450_v34  ;;  %v2523_v19 = vld [vmem:[%s2812_s16 + $0x248] ss:$16 sps:$4 sm:$0xff]   ;;  %v2528_v20 = vld [vmem:[%s2812_s16 + $0x264] ss:$16 sps:$4 sm:$0xff]   ;;  %v2531_v21 = vld [vmem:[%s2812_s16 + $0x26c] ss:$16 sps:$4 sm:$0xff]  }
  0x3f   : > { %1316 = vmatprep.subr.bf16.mxu0 %v2451_v35  ;;  %1445 = vmatprep.subr.bf16.mxu1 %v2453_v36  ;;  %v2526_v22 = vld [vmem:[%s2812_s16 + $0x260] ss:$16 sps:$4 sm:$0xff]   ;;  %v2529_v23 = vld [vmem:[%s2812_s16 + $0x268] ss:$16 sps:$4 sm:$0xff]   ;;  %v2534_v24 = vld [vmem:[%s2812_s16 + $0x284] ss:$16 sps:$4 sm:$0xff]  }
  0x40   : > { %v2537_v25 = vld [vmem:[%s2812_s16 + $0x28c] ss:$16 sps:$4 sm:$0xff]   ;;  %v2532_v26 = vld [vmem:[%s2812_s16 + $0x280] ss:$16 sps:$4 sm:$0xff]   ;;  %v2535_v27 = vld [vmem:[%s2812_s16 + $0x288] ss:$16 sps:$4 sm:$0xff]  }
  0x41   : > { %v2540_v28 = vld [vmem:[%s2812_s16 + $0x2a4] ss:$16 sps:$4 sm:$0xff]   ;;  %v2543_v29 = vld [vmem:[%s2812_s16 + $0x2ac] ss:$16 sps:$4 sm:$0xff]   ;;  %v2538_v30 = vld [vmem:[%s2812_s16 + $0x2a0] ss:$16 sps:$4 sm:$0xff]  }
  0x42   : > { %1317 = vmatpush1.bf16.msra.mxu0 %v2455_v37  ;;  %1446 = vmatpush1.bf16.msra.mxu1 %v2456_v38  ;;  %v2541_v31 = vld [vmem:[%s2812_s16 + $0x2a8] ss:$16 sps:$4 sm:$0xff]   ;;  %v2546_v32 = vld [vmem:[%s2812_s16 + $0x2c4] ss:$16 sps:$4 sm:$0xff]   ;;  %v2549_v33 = vld [vmem:[%s2812_s16 + $0x2cc] ss:$16 sps:$4 sm:$0xff]  }
  0x43   : > { %1318 = vmatprep.subr.bf16.mxu0 %v2457_v39  ;;  %1447 = vmatprep.subr.bf16.mxu1 %v2459_v40  ;;  %v2606_v34 = vld [vmem:[%s2806_s12 + $0xc] ss:$20 sps:$4 sm:$0xff]  }
  0x44   : > { %v2544_v35 = vld [vmem:[%s2812_s16 + $0x2c0] ss:$16 sps:$4 sm:$0xff]   ;;  %v2547_v36 = vld [vmem:[%s2812_s16 + $0x2c8] ss:$16 sps:$4 sm:$0xff]   ;;  %v2552_v37 = vld [vmem:[%s2812_s16 + $0x2e4] ss:$16 sps:$4 sm:$0xff]  }
  0x45   : > { %v2555_v38 = vld [vmem:[%s2812_s16 + $0x2ec] ss:$16 sps:$4 sm:$0xff]   ;;  %v2550_v39 = vld [vmem:[%s2812_s16 + $0x2e0] ss:$16 sps:$4 sm:$0xff]   ;;  %v2553_v40 = vld [vmem:[%s2812_s16 + $0x2e8] ss:$16 sps:$4 sm:$0xff]  }
  0x46   : > { %1319 = vmatpush1.bf16.msra.mxu0 %v2461_v41  ;;  %1448 = vmatpush1.bf16.msra.mxu1 %v2462_v42  ;;  %v2558_v41 = vld [vmem:[%s2812_s16 + $0x304] ss:$16 sps:$4 sm:$0xff]   ;;  %v2561_v42 = vld [vmem:[%s2812_s16 + $0x30c] ss:$16 sps:$4 sm:$0xff]  }
  0x47   : > { %1320 = vmatprep.subr.bf16.mxu0 %v2463_v43  ;;  %1449 = vmatprep.subr.bf16.mxu1 %v2465_v44  ;;  %v2556_v43 = vld [vmem:[%s2812_s16 + $0x300] ss:$16 sps:$4 sm:$0xff]   ;;  %v2559_v44 = vld [vmem:[%s2812_s16 + $0x308] ss:$16 sps:$4 sm:$0xff]  }
  0x4a   : > { %1321 = vmatpush1.bf16.msra.mxu0 %v2467_v45  ;;  %1450 = vmatpush1.bf16.msra.mxu1 %v2468_v46  ;;  %v2564_v45 = vld [vmem:[%s2812_s16 + $0x324] ss:$16 sps:$4 sm:$0xff]   ;;  %v2567_v46 = vld [vmem:[%s2812_s16 + $0x32c] ss:$16 sps:$4 sm:$0xff]  }
  0x4b   : > { %1322 = vmatprep.subr.bf16.mxu0 %v2469_v47  ;;  %1451 = vmatprep.subr.bf16.mxu1 %v2471_v48  ;;  %v2562_v47 = vld [vmem:[%s2812_s16 + $0x320] ss:$16 sps:$4 sm:$0xff]   ;;  %v2565_v48 = vld [vmem:[%s2812_s16 + $0x328] ss:$16 sps:$4 sm:$0xff]  }
  0x4e   : > { %1323 = vmatpush1.bf16.msra.mxu0 %v2473_v49  ;;  %1452 = vmatpush1.bf16.msra.mxu1 %v2474_v50  ;;  %v2570_v49 = vld [vmem:[%s2812_s16 + $0x344] ss:$16 sps:$4 sm:$0xff]   ;;  %v2573_v50 = vld [vmem:[%s2812_s16 + $0x34c] ss:$16 sps:$4 sm:$0xff]  }
  0x4f   : > { %1324 = vmatprep.subr.bf16.mxu0 %v2475_v51  ;;  %1453 = vmatprep.subr.bf16.mxu1 %v2477_v52  ;;  %v2568_v51 = vld [vmem:[%s2812_s16 + $0x340] ss:$16 sps:$4 sm:$0xff]   ;;  %v2571_v52 = vld [vmem:[%s2812_s16 + $0x348] ss:$16 sps:$4 sm:$0xff]  }
  0x52   : > { %1325 = vmatpush1.bf16.msra.mxu0 %v2479_v53  ;;  %1454 = vmatpush1.bf16.msra.mxu1 %v2480_v54  ;;  %v2576_v53 = vld [vmem:[%s2812_s16 + $0x364] ss:$16 sps:$4 sm:$0xff]   ;;  %v2579_v54 = vld [vmem:[%s2812_s16 + $0x36c] ss:$16 sps:$4 sm:$0xff]  }
  0x53   : > { %1326 = vmatprep.subr.bf16.mxu0 %v2481_v55  ;;  %1455 = vmatprep.subr.bf16.mxu1 %v2483_v56  ;;  %v2574_v55 = vld [vmem:[%s2812_s16 + $0x360] ss:$16 sps:$4 sm:$0xff]   ;;  %v2577_v56 = vld [vmem:[%s2812_s16 + $0x368] ss:$16 sps:$4 sm:$0xff]  }
  0x56   : > { %1327 = vmatpush1.bf16.msra.mxu0 %v2485_v57  ;;  %1456 = vmatpush1.bf16.msra.mxu1 %v2486_v58  ;;  %v2582_v57 = vld [vmem:[%s2812_s16 + $0x384] ss:$16 sps:$4 sm:$0xff]   ;;  %v2585_v58 = vld [vmem:[%s2812_s16 + $0x38c] ss:$16 sps:$4 sm:$0xff]  }
  0x57   : > { %1328 = vmatprep.subr.bf16.mxu0 %v2487_v59  ;;  %1457 = vmatprep.subr.bf16.mxu1 %v2489_v60  ;;  %v2580_v59 = vld [vmem:[%s2812_s16 + $0x380] ss:$16 sps:$4 sm:$0xff]   ;;  %v2583_v60 = vld [vmem:[%s2812_s16 + $0x388] ss:$16 sps:$4 sm:$0xff]  }
  0x5a   : > { %1329 = vmatpush1.bf16.msra.mxu0 %v2491_v61  ;;  %1458 = vmatpush1.bf16.msra.mxu1 %v2492_v62  ;;  %v2588_v61 = vld [vmem:[%s2812_s16 + $0x3a4] ss:$16 sps:$4 sm:$0xff]   ;;  %v2591_v62 = vld [vmem:[%s2812_s16 + $0x3ac] ss:$16 sps:$4 sm:$0xff]  }
  0x5b   : > { %1330 = vmatprep.subr.bf16.mxu0 %v2493_v63  ;;  %1459 = vmatprep.subr.bf16.mxu1 %v2495_v0  ;;  %v2586_v63 = vld [vmem:[%s2812_s16 + $0x3a0] ss:$16 sps:$4 sm:$0xff]   ;;  %v2589_v0 = vld [vmem:[%s2812_s16 + $0x3a8] ss:$16 sps:$4 sm:$0xff]  }
  0x5e   : > { %1331 = vmatpush1.bf16.msra.mxu0 %v2497_v1  ;;  %1460 = vmatpush1.bf16.msra.mxu1 %v2498_v2  ;;  %v2594_v1 = vld [vmem:[%s2812_s16 + $0x3c4] ss:$16 sps:$4 sm:$0xff]   ;;  %v2597_v2 = vld [vmem:[%s2812_s16 + $0x3cc] ss:$16 sps:$4 sm:$0xff]  }
  0x5f   : > { %1332 = vmatprep.subr.bf16.mxu0 %v2499_v3  ;;  %1461 = vmatprep.subr.bf16.mxu1 %v2501_v4  ;;  %v2592_v3 = vld [vmem:[%s2812_s16 + $0x3c0] ss:$16 sps:$4 sm:$0xff]   ;;  %v2595_v4 = vld [vmem:[%s2812_s16 + $0x3c8] ss:$16 sps:$4 sm:$0xff]  }
  0x62   : > { %1333 = vmatpush1.bf16.msra.mxu0 %v2503_v5  ;;  %1462 = vmatpush1.bf16.msra.mxu1 %v2504_v6  ;;  %v2600_v5 = vld [vmem:[%s2812_s16 + $0x3e4] ss:$16 sps:$4 sm:$0xff]   ;;  %v2603_v6 = vld [vmem:[%s2812_s16 + $0x3ec] ss:$16 sps:$4 sm:$0xff]  }
  0x63   : > { %1345 = vmatprep.subr.bf16.mxu0 %v2510_v7  ;;  %1474 = vmatprep.subr.bf16.mxu1 %v2513_v8  ;;  %v2598_v7 = vld [vmem:[%s2812_s16 + $0x3e0] ss:$16 sps:$4 sm:$0xff]   ;;  %v2601_v8 = vld [vmem:[%s2812_s16 + $0x3e8] ss:$16 sps:$4 sm:$0xff]  }
  0x65   : > { %1335 = vmatmul.mubr.bf16.vlgmr.msra.gmra.mrb[0].mxu0 %v2505_v9  ;;  %1464 = vmatmul.mubr.bf16.vlgmr.msra.gmra.mrb[0].mxu1 %v2505_v9  ;;  %v2609_v9 = vld [vmem:[%s2812_s16 + $0x404] ss:$16 sps:$4 sm:$0xff]  }
  0x66   : > { %1346 = vmatpush1.bf16.msra.mxu0 %v2508_v10  ;;  %1475 = vmatpush1.bf16.msra.mxu1 %v2511_v11  ;;  %v2612_v10 = vld [vmem:[%s2812_s16 + $0x40c] ss:$16 sps:$4 sm:$0xff]  }
  0x67   : > { %1347 = vmatprep.subr.bf16.mxu0 %v2516_v12  ;;  %1476 = vmatprep.subr.bf16.mxu1 %v2519_v13  ;;  %v2604_v11 = vld [vmem:[%s2806_s12 + $0x8] ss:$20 sps:$4 sm:$0xff]  }
  0x68   : > { %1377 = vmatprep.mubr.bf16.mxu0 %v2606_v34  ;;  %1506 = vmatprep.mubr.bf16.mxu1 %v2606_v34  ;;  %v2607_v12 = vld [vmem:[%s2812_s16 + $0x400] ss:$16 sps:$4 sm:$0xff]   ;;  %v2610_v13 = vld [vmem:[%s2812_s16 + $0x408] ss:$16 sps:$4 sm:$0xff]  }
  0x69   : > { %v2640_v34 = vld [vmem:[%s2812_s16 + $0x4a8] ss:$16 sps:$4 sm:$0xff]  }
  0x6a   : > { %1348 = vmatpush1.bf16.msra.mxu0 %v2514_v14  ;;  %1477 = vmatpush1.bf16.msra.mxu1 %v2517_v15  ;;  %v2615_v14 = vld [vmem:[%s2812_s16 + $0x424] ss:$16 sps:$4 sm:$0xff]   ;;  %v2618_v15 = vld [vmem:[%s2812_s16 + $0x42c] ss:$16 sps:$4 sm:$0xff]  }
  0x6b   : > { %1349 = vmatprep.subr.bf16.mxu0 %v2522_v16  ;;  %1478 = vmatprep.subr.bf16.mxu1 %v2525_v17  ;;  %v2613_v16 = vld [vmem:[%s2812_s16 + $0x420] ss:$16 sps:$4 sm:$0xff]   ;;  %v2616_v17 = vld [vmem:[%s2812_s16 + $0x428] ss:$16 sps:$4 sm:$0xff]  }
  0x6e   : > { %1350 = vmatpush1.bf16.msra.mxu0 %v2520_v18  ;;  %1479 = vmatpush1.bf16.msra.mxu1 %v2523_v19  ;;  %v2621_v18 = vld [vmem:[%s2812_s16 + $0x444] ss:$16 sps:$4 sm:$0xff]   ;;  %v2624_v19 = vld [vmem:[%s2812_s16 + $0x44c] ss:$16 sps:$4 sm:$0xff]  }
  0x6f   : > { %1351 = vmatprep.subr.bf16.mxu0 %v2528_v20  ;;  %1480 = vmatprep.subr.bf16.mxu1 %v2531_v21  ;;  %v2728_v20 = vmov 0   ;;  %v2619_v21 = vld [vmem:[%s2812_s16 + $0x440] ss:$16 sps:$4 sm:$0xff]  }
  0x72   : > { %1352 = vmatpush1.bf16.msra.mxu0 %v2526_v22  ;;  %1481 = vmatpush1.bf16.msra.mxu1 %v2529_v23  ;;  %v2622_v22 = vld [vmem:[%s2812_s16 + $0x448] ss:$16 sps:$4 sm:$0xff]   ;;  %v2627_v23 = vld [vmem:[%s2812_s16 + $0x464] ss:$16 sps:$4 sm:$0xff]  }
  0x73   : > { %1353 = vmatprep.subr.bf16.mxu0 %v2534_v24  ;;  %1482 = vmatprep.subr.bf16.mxu1 %v2537_v25  ;;  %v2630_v24 = vld [vmem:[%s2812_s16 + $0x46c] ss:$16 sps:$4 sm:$0xff]   ;;  %v2625_v25 = vld [vmem:[%s2812_s16 + $0x460] ss:$16 sps:$4 sm:$0xff]  }
  0x76   : > { %1354 = vmatpush1.bf16.msra.mxu0 %v2532_v26  ;;  %1483 = vmatpush1.bf16.msra.mxu1 %v2535_v27  ;;  %v2628_v26 = vld [vmem:[%s2812_s16 + $0x468] ss:$16 sps:$4 sm:$0xff]   ;;  %v2633_v27 = vld [vmem:[%s2812_s16 + $0x484] ss:$16 sps:$4 sm:$0xff]  }
  0x77   : > { %1355 = vmatprep.subr.bf16.mxu0 %v2540_v28  ;;  %1484 = vmatprep.subr.bf16.mxu1 %v2543_v29  ;;  %v2636_v28 = vld [vmem:[%s2812_s16 + $0x48c] ss:$16 sps:$4 sm:$0xff]   ;;  %v2631_v29 = vld [vmem:[%s2812_s16 + $0x480] ss:$16 sps:$4 sm:$0xff]  }
  0x7a   : > { %1356 = vmatpush1.bf16.msra.mxu0 %v2538_v30  ;;  %1485 = vmatpush1.bf16.msra.mxu1 %v2541_v31  ;;  %v2634_v30 = vld [vmem:[%s2812_s16 + $0x488] ss:$16 sps:$4 sm:$0xff]   ;;  %v2639_v31 = vld [vmem:[%s2812_s16 + $0x4a4] ss:$16 sps:$4 sm:$0xff]  }
  0x7b   : > { %1357 = vmatprep.subr.bf16.mxu0 %v2546_v32  ;;  %1486 = vmatprep.subr.bf16.mxu1 %v2549_v33  ;;  %v2642_v32 = vld [vmem:[%s2812_s16 + $0x4ac] ss:$16 sps:$4 sm:$0xff]   ;;  %v2637_v33 = vld [vmem:[%s2812_s16 + $0x4a0] ss:$16 sps:$4 sm:$0xff]  }
  0x7e   : > { %1358 = vmatpush1.bf16.msra.mxu0 %v2544_v35  ;;  %1487 = vmatpush1.bf16.msra.mxu1 %v2547_v36  ;;  %v2645_v35 = vld [vmem:[%s2812_s16 + $0x4c4] ss:$16 sps:$4 sm:$0xff]   ;;  %v2648_v36 = vld [vmem:[%s2812_s16 + $0x4cc] ss:$16 sps:$4 sm:$0xff]  }
  0x7f   : > { %1359 = vmatprep.subr.bf16.mxu0 %v2552_v37  ;;  %1488 = vmatprep.subr.bf16.mxu1 %v2555_v38  ;;  %v2643_v37 = vld [vmem:[%s2812_s16 + $0x4c0] ss:$16 sps:$4 sm:$0xff]   ;;  %v2646_v38 = vld [vmem:[%s2812_s16 + $0x4c8] ss:$16 sps:$4 sm:$0xff]  }
  0x82   : > { %1360 = vmatpush1.bf16.msra.mxu0 %v2550_v39  ;;  %1489 = vmatpush1.bf16.msra.mxu1 %v2553_v40  ;;  %v2651_v39 = vld [vmem:[%s2812_s16 + $0x4e4] ss:$16 sps:$4 sm:$0xff]   ;;  %v2654_v40 = vld [vmem:[%s2812_s16 + $0x4ec] ss:$16 sps:$4 sm:$0xff]  }
  0x83   : > { %1361 = vmatprep.subr.bf16.mxu0 %v2558_v41  ;;  %1490 = vmatprep.subr.bf16.mxu1 %v2561_v42  ;;  %v2649_v41 = vld [vmem:[%s2812_s16 + $0x4e0] ss:$16 sps:$4 sm:$0xff]   ;;  %v2652_v42 = vld [vmem:[%s2812_s16 + $0x4e8] ss:$16 sps:$4 sm:$0xff]  }
  0x86   : > { %1362 = vmatpush1.bf16.msra.mxu0 %v2556_v43  ;;  %1491 = vmatpush1.bf16.msra.mxu1 %v2559_v44  ;;  %v2655_v43 = vld [vmem:[%s2806_s12 + $0x10] ss:$20 sps:$4 sm:$0xff]  }
  0x87   : > { %1363 = vmatprep.subr.bf16.mxu0 %v2564_v45  ;;  %1492 = vmatprep.subr.bf16.mxu1 %v2567_v46 }
  0x8a   : > { %1364 = vmatpush1.bf16.msra.mxu0 %v2562_v47  ;;  %1493 = vmatpush1.bf16.msra.mxu1 %v2565_v48 }
  0x8b   : > { %1365 = vmatprep.subr.bf16.mxu0 %v2570_v49  ;;  %1494 = vmatprep.subr.bf16.mxu1 %v2573_v50 }
  0x8e   : > { %1366 = vmatpush1.bf16.msra.mxu0 %v2568_v51  ;;  %1495 = vmatpush1.bf16.msra.mxu1 %v2571_v52 }
  0x8f   : > { %1367 = vmatprep.subr.bf16.mxu0 %v2576_v53  ;;  %1496 = vmatprep.subr.bf16.mxu1 %v2579_v54 }
  0x92   : > { %1368 = vmatpush1.bf16.msra.mxu0 %v2574_v55  ;;  %1497 = vmatpush1.bf16.msra.mxu1 %v2577_v56 }
  0x93   : > { %1369 = vmatprep.subr.bf16.mxu0 %v2582_v57  ;;  %1498 = vmatprep.subr.bf16.mxu1 %v2585_v58 }
  0x96   : > { %1370 = vmatpush1.bf16.msra.mxu0 %v2580_v59  ;;  %1499 = vmatpush1.bf16.msra.mxu1 %v2583_v60 }
  0x97   : > { %1371 = vmatprep.subr.bf16.mxu0 %v2588_v61  ;;  %1500 = vmatprep.subr.bf16.mxu1 %v2591_v62 }
  0x9a   : > { %1372 = vmatpush1.bf16.msra.mxu0 %v2586_v63  ;;  %1501 = vmatpush1.bf16.msra.mxu1 %v2589_v0 }
  0x9b   : > { %1373 = vmatprep.subr.bf16.mxu0 %v2594_v1  ;;  %1502 = vmatprep.subr.bf16.mxu1 %v2597_v2 }
  0x9e   : > { %1374 = vmatpush1.bf16.msra.mxu0 %v2592_v3  ;;  %1503 = vmatpush1.bf16.msra.mxu1 %v2595_v4 }
  0x9f   : > { %1375 = vmatprep.subr.bf16.mxu0 %v2600_v5  ;;  %1504 = vmatprep.subr.bf16.mxu1 %v2603_v6 }
  0xa2   : > { %1376 = vmatpush1.bf16.msra.mxu0 %v2598_v7  ;;  %1505 = vmatpush1.bf16.msra.mxu1 %v2601_v8 }
  0xa3   : > { %1388 = vmatprep.subr.bf16.mxu0 %v2609_v9  ;;  %1517 = vmatprep.subr.bf16.mxu1 %v2612_v10 }
  0xa5   : > { %1378 = vmatmul.mubr.bf16.vlgmr.msra.gmra.mrb[0].mxu0 %v2604_v11  ;;  %1507 = vmatmul.mubr.bf16.vlgmr.msra.gmra.mrb[0].mxu1 %v2604_v11 }
  0xa6   : > { %1389 = vmatpush1.bf16.msra.mxu0 %v2607_v12  ;;  %1518 = vmatpush1.bf16.msra.mxu1 %v2610_v13 }
  0xa7   : > { %1390 = vmatprep.subr.bf16.mxu0 %v2615_v14  ;;  %1519 = vmatprep.subr.bf16.mxu1 %v2618_v15 }
  0xa8   : > { %1420 = vmatprep.mubr.bf16.mxu0 %v2728_v20  ;;  %1549 = vmatprep.mubr.bf16.mxu1 %v2728_v20 }
  0xaa   : > { %1391 = vmatpush1.bf16.msra.mxu0 %v2613_v16  ;;  %1520 = vmatpush1.bf16.msra.mxu1 %v2616_v17 }
  0xab   : > { %1392 = vmatprep.subr.bf16.mxu0 %v2621_v18  ;;  %1521 = vmatprep.subr.bf16.mxu1 %v2624_v19 }
  0xae   : > { %1393 = vmatpush1.bf16.msra.mxu0 %v2619_v21  ;;  %1522 = vmatpush1.bf16.msra.mxu1 %v2622_v22 }
  0xaf   : > { %1394 = vmatprep.subr.bf16.mxu0 %v2627_v23  ;;  %1523 = vmatprep.subr.bf16.mxu1 %v2630_v24 }
  0xb2   : > { %1395 = vmatpush1.bf16.msra.mxu0 %v2625_v25  ;;  %1524 = vmatpush1.bf16.msra.mxu1 %v2628_v26 }
  0xb3   : > { %1396 = vmatprep.subr.bf16.mxu0 %v2633_v27  ;;  %1525 = vmatprep.subr.bf16.mxu1 %v2636_v28 }
  0xb6   : > { %1397 = vmatpush1.bf16.msra.mxu0 %v2631_v29  ;;  %1526 = vmatpush1.bf16.msra.mxu1 %v2634_v30 }
  0xb7   : > { %1398 = vmatprep.subr.bf16.mxu0 %v2639_v31  ;;  %1527 = vmatprep.subr.bf16.mxu1 %v2642_v32 }
  0xba   : > { %1399 = vmatpush1.bf16.msra.mxu0 %v2637_v33  ;;  %1528 = vmatpush1.bf16.msra.mxu1 %v2640_v34 }
  0xbb   : > { %1400 = vmatprep.subr.bf16.mxu0 %v2645_v35  ;;  %1529 = vmatprep.subr.bf16.mxu1 %v2648_v36 }
  0xbe   : > { %1401 = vmatpush1.bf16.msra.mxu0 %v2643_v37  ;;  %1530 = vmatpush1.bf16.msra.mxu1 %v2646_v38 }
  0xbf   : > { %1402 = vmatprep.subr.bf16.mxu0 %v2651_v39  ;;  %1531 = vmatprep.subr.bf16.mxu1 %v2654_v40 }
  0xc2   : > { %1403 = vmatpush1.bf16.msra.mxu0 %v2649_v41  ;;  %1532 = vmatpush1.bf16.msra.mxu1 %v2652_v42 }
  0xc5   : > { %1421 = vmatmul.mubr.bf16.vlgmr.msra.gmra.mrb[0].mxu0 %v2655_v43  ;;  %1550 = vmatmul.mubr.bf16.vlgmr.msra.gmra.mrb[0].mxu1 %v2655_v43 }
 0x195   : > { %1563 = sbr.rel (%p2264_p10) target bundleno = 413 (0x19d), region = 70 }
 0x198   : > { %v1422_v44 = vpop.f32.mrb[0].mxu0  ;;  %v1551_v45 = vpop.f32.mrb[0].mxu1 }
 0x199   : > { %v1424_v46 = vpop.f32.mrb[1].mxu0  ;;  %v1553_v47 = vpop.f32.mrb[1].mxu1  ;;  %1564 = vst [vmem:[#allocation2] sm:$0xff] (!%p2264_p10), %v1422_v44  ;;  %1566 = vst [vmem:[#allocation2 + $0x10] sm:$0xff] (!%p2264_p10), %v1551_v45 }
 0x19a   : > { %v1426_v48 = vpop.f32.mrb[2].mxu0  ;;  %v1555_v49 = vpop.f32.mrb[2].mxu1  ;;  %1565 = vst [vmem:[#allocation2 + $0x8] sm:$0xff] (!%p2264_p10), %v1424_v46  ;;  %1567 = vst [vmem:[#allocation2 + $0x18] sm:$0xff] (!%p2264_p10), %v1553_v47 }
 0x19b   : > { %v1428_v50 = vpop.f32.mrb[3].mxu0  ;;  %v1557_v51 = vpop.f32.mrb[3].mxu1  ;;  %1568 = vst [vmem:[#allocation2 + $0x20] sm:$0xff] (!%p2264_p10), %v1426_v48  ;;  %1570 = vst [vmem:[#allocation2 + $0x30] sm:$0xff] (!%p2264_p10), %v1555_v49 }
 0x19c   : > { %1569 = vst [vmem:[#allocation2 + $0x28] sm:$0xff] %v1428_v50  ;;  %1571 = vst [vmem:[#allocation2 + $0x38] sm:$0xff] %v1557_v51 }
 0x19d PF: > { %p2265_p11 = scmp.le.s32.totalorder %s2718_s20, 0 }
 0x19f   : > { %1575 = sbr.rel (%p2265_p11) target bundleno = 424 (0x1a8), region = 74 }
 0x1a1   : > { %v1576_v52 = vld [vmem:[#allocation2] sm:$0xff] (!%p2265_p11)  ;;  %v1578_v54 = vld [vmem:[#allocation2 + $0x10] sm:$0xff] (!%p2265_p11) }
 0x1a2   : > { %v1577_v53 = vld [vmem:[#allocation2 + $0x8] sm:$0xff] (!%p2265_p11)  ;;  %v1584_v55 = vadd.f32 (!%p2265_p11), %v1576_v52, %v1422_v44  ;;  %v1586_v57 = vadd.f32 (!%p2265_p11), %v1578_v54, %v1551_v45  ;;  %v1579_v58 = vld [vmem:[#allocation2 + $0x18] sm:$0xff] (!%p2265_p11) }
 0x1a3   : > { %v1585_v56 = vadd.f32 (!%p2265_p11), %v1577_v53, %v1424_v46  ;;  %v1580_v59 = vld [vmem:[#allocation2 + $0x20] sm:$0xff] (!%p2265_p11)  ;;  %v1581_v60 = vld [vmem:[#allocation2 + $0x28] sm:$0xff] (!%p2265_p11)  ;;  %v1587_v61 = vadd.f32 (!%p2265_p11), %v1579_v58, %v1553_v47  ;;  %v1582_v0 = vld [vmem:[#allocation2 + $0x30] sm:$0xff] (!%p2265_p11) }
 0x1a4   : > { %v1588_v62 = vadd.f32 (!%p2265_p11), %v1580_v59, %v1426_v48  ;;  %v1589_v63 = vadd.f32 (!%p2265_p11), %v1581_v60, %v1428_v50  ;;  %v1583_v1 = vld [vmem:[#allocation2 + $0x38] sm:$0xff] (!%p2265_p11)  ;;  %1592 = vst [vmem:[#allocation2] sm:$0xff] (!%p2265_p11), %v1584_v55  ;;  %1594 = vst [vmem:[#allocation2 + $0x10] sm:$0xff] (!%p2265_p11), %v1586_v57  ;;  %v1590_v2 = vadd.f32 (!%p2265_p11), %v1582_v0, %v1555_v49 }
 0x1a5   : > { %1593 = vst [vmem:[#allocation2 + $0x8] sm:$0xff] (!%p2265_p11), %v1585_v56  ;;  %v1591_v3 = vadd.f32 (!%p2265_p11), %v1583_v1, %v1557_v51  ;;  %1595 = vst [vmem:[#allocation2 + $0x18] sm:$0xff] (!%p2265_p11), %v1587_v61 }
 0x1a6   : > { %1596 = vst [vmem:[#allocation2 + $0x20] sm:$0xff] %v1588_v62  ;;  %1597 = vst [vmem:[#allocation2 + $0x28] sm:$0xff] %v1589_v63 }
 0x1a7   : > { %1598 = vst [vmem:[#allocation2 + $0x30] sm:$0xff] %v1590_v2  ;;  %1599 = vst [vmem:[#allocation2 + $0x38] sm:$0xff] %v1591_v3 }
 0x1a8 PF: > { %p2266_p12 = scmp.ne.s32.totalorder %s2718_s20, 4 }
 0x1a9   : > { %v2656_v4 = vld [vmem:[%s3107_s3 + $0x40] sm:$0xff] (!%p2266_p12)   ;;  %v2660_v8 = vld [vmem:[%s3107_s3 + $0x48] sm:$0xff] (!%p2266_p12)   ;;  %v2664_v12 = vld [vmem:[%s3107_s3 + $0x50] sm:$0xff] (!%p2266_p12)   ;;  %v1614_v23 = vlaneseq (!%p2266_p12) }
 0x1aa   : > { %1603 = sbr.rel (%p2266_p12) target bundleno = 681 (0x2a9), region = 78  ;;  %v2657_v5 = vld [vmem:[%s3107_s3 + $0xc0] sm:$0xff] (!%p2266_p12)   ;;  %2306 = vmatprep.subr.bf16.mxu0 (!%p2266_p12), %v2656_v4  ;;  %v2661_v9 = vld [vmem:[%s3107_s3 + $0xc8] sm:$0xff] (!%p2266_p12)   ;;  %v2665_v13 = vld [vmem:[%s3107_s3 + $0xd0] sm:$0xff] (!%p2266_p12)  }
 0x1ab   : > { %v2658_v6 = vld [vmem:[%s3107_s3] sm:$0xff] (!%p2266_p12)   ;;  %2328 = vmatprep.subr.bf16.mxu1 (!%p2266_p12), %v2657_v5  ;;  %v2662_v10 = vld [vmem:[%s3107_s3 + $0x8] sm:$0xff] (!%p2266_p12)   ;;  %v2666_v14 = vld [vmem:[%s3107_s3 + $0x10] sm:$0xff] (!%p2266_p12)   ;;  %v1615_v28 = vshrl.u32 (!%p2266_p12), %v1614_v23, 7 }
 0x1ac   : > { %v2659_v7 = vld [vmem:[%s3107_s3 + $0x80] sm:$0xff] (!%p2266_p12)   ;;  %2307 = vmatpush3.bf16.msra.mxu0 (!%p2266_p12), %v2658_v6  ;;  %v2663_v11 = vld [vmem:[%s3107_s3 + $0x88] sm:$0xff] (!%p2266_p12)   ;;  %v2667_v15 = vld [vmem:[%s3107_s3 + $0x90] sm:$0xff] (!%p2266_p12)  }
 0x1ad   : > { %2329 = vmatpush3.bf16.msra.mxu1 (!%p2266_p12), %v2659_v7  ;;  %2308 = vmatprep.subr.bf16.mxu0 (!%p2266_p12), %v2660_v8  ;;  %v2668_v16 = vld [vmem:[%s3107_s3 + $0x58] sm:$0xff] (!%p2266_p12)   ;;  %v2672_v20 = vld [vmem:[%s3107_s3 + $0x60] sm:$0xff] (!%p2266_p12)   ;;  %v2676_v25 = vld [vmem:[%s3107_s3 + $0x68] sm:$0xff] (!%p2266_p12)   ;;  %v1620_v33 = vsub.s32 (!%p2266_p12), 1, %v1615_v28  ;;  %v1628_v35 = vsub.s32 (!%p2266_p12), 3, %v1615_v28  ;;  %v1616_v37 = vsub.s32 (!%p2266_p12), 0, %v1615_v28 }
 0x1ae   : > { %2330 = vmatprep.subr.bf16.mxu1 (!%p2266_p12), %v2661_v9  ;;  %v2669_v17 = vld [vmem:[%s3107_s3 + $0xd8] sm:$0xff] (!%p2266_p12)   ;;  %v2673_v21 = vld [vmem:[%s3107_s3 + $0xe0] sm:$0xff] (!%p2266_p12)   ;;  %v2677_v26 = vld [vmem:[%s3107_s3 + $0xe8] sm:$0xff] (!%p2266_p12)   ;;  %v1624_v39 = vsub.s32 (!%p2266_p12), 2, %v1615_v28 }
 0x1af   : > { %v2670_v18 = vld [vmem:[%s3107_s3 + $0x18] sm:$0xff] (!%p2266_p12)   ;;  %v2674_v22 = vld [vmem:[%s3107_s3 + $0x20] sm:$0xff] (!%p2266_p12)   ;;  %v2678_v27 = vld [vmem:[%s3107_s3 + $0x28] sm:$0xff] (!%p2266_p12)  }
 0x1b0   : > { %2309 = vmatpush3.bf16.msra.mxu0 (!%p2266_p12), %v2662_v10  ;;  %v2671_v19 = vld [vmem:[%s3107_s3 + $0x98] sm:$0xff] (!%p2266_p12)   ;;  %v2675_v24 = vld [vmem:[%s3107_s3 + $0xa0] sm:$0xff] (!%p2266_p12)   ;;  %v2679_v29 = vld [vmem:[%s3107_s3 + $0xa8] sm:$0xff] (!%p2266_p12)  }
 0x1b1   : > { %2331 = vmatpush3.bf16.msra.mxu1 %v2663_v11  ;;  %2310 = vmatprep.subr.bf16.mxu0 %v2664_v12  ;;  %v2680_v30 = vld [vmem:[%s3107_s3 + $0x70] sm:$0xff]   ;;  %v2684_v36 = vld [vmem:[%s3107_s3 + $0x78] sm:$0xff]   ;;  %v1605_v42 = vld [vmem:[#allocation2 + $0x8] sm:$0xff] }
 0x1b2   : > { %2332 = vmatprep.subr.bf16.mxu1 %v2665_v13  ;;  %v2681_v31 = vld [vmem:[%s3107_s3 + $0xf0] sm:$0xff]   ;;  %v2685_v38 = vld [vmem:[%s3107_s3 + $0xf8] sm:$0xff]   ;;  %v1609_v43 = vld [vmem:[#allocation2 + $0x28] sm:$0xff] }
 0x1b3   : > { %v2682_v32 = vld [vmem:[%s3107_s3 + $0x30] sm:$0xff]   ;;  %v2686_v40 = vld [vmem:[%s3107_s3 + $0x38] sm:$0xff]   ;;  %v1612_v44 = vld [vmem:[%s3106_s2] sm:$0xf] }
 0x1b4   : > { %2311 = vmatpush3.bf16.msra.mxu0 %v2666_v14  ;;  %v2683_v34 = vld [vmem:[%s3107_s3 + $0xb0] sm:$0xff]   ;;  %v2687_v41 = vld [vmem:[%s3107_s3 + $0xb8] sm:$0xff]   ;;  %v1621_v45 = vrot.slane %v1612_v44, %v1620_v33  ;;  %v1629_v48 = vrot.slane %v1612_v44, %v1628_v35  ;;  %v1604_v49 = vld [vmem:[#allocation2] sm:$0xff]  ;;  %v1617_v50 = vrot.slane %v1612_v44, %v1616_v37  ;;  %v1625_v51 = vrot.slane %v1612_v44, %v1624_v39 }
 0x1b5   : > { %2333 = vmatpush3.bf16.msra.mxu1 %v2667_v15  ;;  %2312 = vmatprep.subr.bf16.mxu0 %v2668_v16  ;;  %v1607_v46 = vld [vmem:[#allocation2 + $0x18] sm:$0xff]  ;;  %v1608_v52 = vld [vmem:[#allocation2 + $0x20] sm:$0xff]  ;;  %v1606_v53 = vld [vmem:[#allocation2 + $0x10] sm:$0xff] }
 0x1b6   : > { %2334 = vmatprep.subr.bf16.mxu1 %v2669_v17  ;;  %v1611_v47 = vld [vmem:[#allocation2 + $0x38] sm:$0xff]  ;;  %v1610_v54 = vld [vmem:[#allocation2 + $0x30] sm:$0xff]  ;;  %v1635_v55 = vadd.f32 %v1621_v45, %v1605_v42  ;;  %v1639_v56 = vadd.f32 %v1621_v45, %v1609_v43  ;;  %v1637_v57 = vadd.f32 %v1629_v48, %v1607_v46  ;;  %v1634_v59 = vadd.f32 %v1617_v50, %v1604_v49  ;;  %v2267_v13 = vld [vmem:[%s3108_s4] ss:$0 sm:$0xff] }
 0x1b7   : > { %v1641_v58 = vadd.f32 %v1629_v48, %v1611_v47  ;;  %v1638_v60 = vadd.f32 %v1617_v50, %v1608_v52  ;;  %v1636_v61 = vadd.f32 %v1625_v51, %v1606_v53  ;;  %v1640_v62 = vadd.f32 %v1625_v51, %v1610_v54 }
 0x1b8   : > { %2313 = vmatpush3.bf16.msra.mxu0 %v2670_v18  ;;  %v1643_v63 = vmax.f32 %v1635_v55, 0.0  ;;  %v1647_v0 = vmax.f32 %v1639_v56, 0.0  ;;  %v1645_v1 = vmax.f32 %v1637_v57, 0.0  ;;  %v1642_v3 = vmax.f32 %v1634_v59, 0.0 }
 0x1b9   : > { %2335 = vmatpush3.bf16.msra.mxu1 %v2671_v19  ;;  %2314 = vmatprep.subr.bf16.mxu0 %v2672_v20  ;;  %v1649_v2 = vmax.f32 %v1641_v58, 0.0  ;;  %v1646_v4 = vmax.f32 %v1638_v60, 0.0  ;;  %v1644_v5 = vmax.f32 %v1636_v61, 0.0  ;;  %v1648_v6 = vmax.f32 %v1640_v62, 0.0 }
 0x1ba   : > { %2336 = vmatprep.subr.bf16.mxu1 %v2673_v21  ;;  %v1651_v7 = vpack.c.bf16 %v1647_v0, %v1643_v63 }
 0x1bb   : > { %v1653_v8 = vpack.c.bf16 %v1649_v2, %v1645_v1  ;;  %v1650_v9 = vpack.c.bf16 %v1646_v4, %v1642_v3  ;;  %v1652_v10 = vpack.c.bf16 %v1648_v6, %v1644_v5 }
 0x1bc   : > { %2315 = vmatpush3.bf16.msra.mxu0 %v2674_v22  ;;  %1949 = vmatprep.mubr.bf16.mxu0 %v1651_v7 }
 0x1bd   : > { %2337 = vmatpush3.bf16.msra.mxu1 %v2675_v24  ;;  %2316 = vmatprep.subr.bf16.mxu0 %v2676_v25 }
 0x1be   : > { %2338 = vmatprep.subr.bf16.mxu1 %v2677_v26  ;;  %1990 = vmatprep.mubr.bf16.mxu1 %v1653_v8 }
 0x1c0   : > { %2317 = vmatpush3.bf16.msra.mxu0 %v2678_v27 }
 0x1c1   : > { %2339 = vmatpush3.bf16.msra.mxu1 %v2679_v29  ;;  %2318 = vmatprep.subr.bf16.mxu0 %v2680_v30 }
 0x1c2   : > { %2340 = vmatprep.subr.bf16.mxu1 %v2681_v31 }
 0x1c4   : > { %2319 = vmatpush3.bf16.msra.mxu0 %v2682_v32 }
 0x1c5   : > { %2341 = vmatpush3.bf16.msra.mxu1 %v2683_v34  ;;  %2320 = vmatprep.subr.bf16.mxu0 %v2684_v36 }
 0x1c6   : > { %2342 = vmatprep.subr.bf16.mxu1 %v2685_v38 }
 0x1c8   : > { %2321 = vmatpush3.bf16.msra.mxu0 %v2686_v40 }
 0x1c9   : > { %2343 = vmatpush3.bf16.msra.mxu1 %v2687_v41 }
 0x1cb   : > { %1950 = vmatmul.mubr.bf16.vlgmr.msra.gmra.mrb[0].mxu0 %v1650_v9 }
 0x1cc   : > { %1991 = vmatmul.mubr.bf16.vlgmr.msra.gmra.mrb[0].mxu1 %v1652_v10 }
 0x29e   : > { %v2322_v11 = vpop.f32.mrb[0].mxu0 }
 0x29f   : > { %v2344_v12 = vpop.f32.mrb[0].mxu1  ;;  %v2323_v14 = vpop.f32.mrb[1].mxu0 }
 0x2a0   : > { %v2345_v15 = vpop.f32.mrb[1].mxu1  ;;  %v2324_v16 = vadd.f32 %v2323_v14, %v2322_v11  ;;  %v2325_v18 = vpop.f32.mrb[2].mxu0 }
 0x2a1   : > { %v2346_v17 = vadd.f32 %v2345_v15, %v2344_v12  ;;  %v2347_v19 = vpop.f32.mrb[2].mxu1  ;;  %v2326_v20 = vpop.f32.mrb[3].mxu0 }
 0x2a2   : > { %v2348_v21 = vpop.f32.mrb[3].mxu1  ;;  %v1952_v22 = vadd.f32 %v2324_v16, %v2267_v13  ;;  %v2327_v23 = vadd.f32 %v2326_v20, %v2325_v18 }
 0x2a3   : > { %v2349_v24 = vadd.f32 %v2348_v21, %v2347_v19 }
 0x2a4   : > { %v1993_v25 = vadd.f32 %v2346_v17, %v1952_v22  ;;  %v1955_v26 = vadd.f32 %v2327_v23, %v2267_v13 }
 0x2a6   : > { %1999 = vst [vmem:[%s3109_s5] sm:$0xff] %v1993_v25  ;;  %v1996_v27 = vadd.f32 %v2349_v24, %v1955_v26 }
 0x2a8   : > { %2000 = vst [vmem:[%s3109_s5 + $0x8] sm:$0xff] %v1996_v27 }
 0x2a9 PF: > { %s15_s22 = sadd.s32 1, %s2726_s22   ;;  %s3110_s18 = smov %s2714_s19 }
 0x2aa   : > { %p12_p13 = scmp.ge.s32.totalorder %s15_s22, 7   ;;  %s3111_s19 = smov %s2794_s26 }
 0x2ab   : > { %s3112_s20 = smov %s2722_s21  ;;  %s3113_s21 = smov %s3115_s23 }
 0x2ac   :  { %14 = sbr.rel (!%p12_p13) target bundleno = 3 (0x3), region = 122 }

// kernel: _lambda_.2
= control target key start
LH: loop header
LB: loop body
LE: loop exit
PB: predicated region body
PF: predicated region fallthrough
CT: control target
= control target key end

     0   :  { %s7563_s24 = smov 0   ;;  %s8915_s0 = inlined_call_operand.vmem [shape: bf16[2,400,256], index: 0, kind: input, shape index: {}]   ;;  %s8916_s1 = inlined_call_operand.vmem [shape: bf16[256,32], index: 1, kind: input, shape index: {}]   ;;  %s8917_s2 = inlined_call_operand.vmem [shape: f32[1,32], index: 2, kind: input, shape index: {}]   ;;  %s8918_s3 = inlined_call_operand.vmem [shape: bf16[16,32,64], index: 3, kind: input, shape index: {}]   ;;  %s8919_s4 = inlined_call_operand.vmem [shape: f32[1,64], index: 4, kind: input, shape index: {}]   ;;  %s8920_s5 = inlined_call_operand.vmem [shape: bf16[9,64,64], index: 5, kind: input, shape index: {}]   ;;  %s8921_s6 = inlined_call_operand.vmem [shape: f32[1,64], index: 6, kind: input, shape index: {}]   ;;  %s8922_s7 = inlined_call_operand.vmem [shape: bf16[2,50,64], index: 7, kind: output, shape index: {}]  }
   0x1 LB: > { %s5772_s25 = sadd.s32 4294967295, %s7518_s24   ;;  %p5776_p0 = scmp.ge.s32.totalorder %s7518_s24, 1  ;;  %s7518_s24 = sphi %s7563_s24, %s17_s24  }
   0x2   : > { %p237_p1 = scmp.lt.s32.totalorder %s7518_s24, 3 }
   0x4   : > { %p238_p2 = pnand %p5776_p0, %p237_p1 }
   0x5   : > { %v7278_v0 = vld [vmem:[%s8916_s1] sm:$0xff] (!%p238_p2)   ;;  %v7520_v1 = vmov (!%p238_p2), 0   ;;  %v7279_v2 = vld [vmem:[%s8916_s1 + $0x8] sm:$0xff] (!%p238_p2)   ;;  %p269_p3 = scmp.lt.s32.totalorder (!%p238_p2), %s5772_s25, 1  ;;  %v7280_v3 = vld [vmem:[%s8916_s1 + $0x10] sm:$0xff] (!%p238_p2)   ;;  %vm1148_vm0 = vcmask (!%p238_p2), 257024  }
   0x6   : > { %241 = sbr.rel (%p238_p2) target bundleno = 1465 (0x5b9), region = 48  ;;  %715 = vmatprep.subr.bf16.mxu0 (!%p238_p2), %v7520_v1  ;;  %v7281_v4 = vld [vmem:[%s8916_s1 + $0x18] sm:$0xff] (!%p238_p2)   ;;  %v7282_v5 = vld [vmem:[%s8916_s1 + $0x20] sm:$0xff] (!%p238_p2)   ;;  %v7283_v7 = vld [vmem:[%s8916_s1 + $0x28] sm:$0xff] (!%p238_p2)   ;;  %1199 = vst.msk [vmem:[#allocation2 + $0xc8] sm:$0xf] (!%p238_p2), %vm1148_vm0, %v7520_v1 }
   0x7   : > { %716 = vmatpush1.bf16.msra.mxu0 (!%p238_p2), %v7278_v0  ;;  %v7284_v8 = vld [vmem:[%s8916_s1 + $0x30] sm:$0xff] (!%p238_p2)   ;;  %v7285_v9 = vld [vmem:[%s8916_s1 + $0x38] sm:$0xff] (!%p238_p2)   ;;  %v7286_v10 = vld [vmem:[%s8916_s1 + $0x40] sm:$0xff] (!%p238_p2)   ;;  %vm3334_vm1 = vsmask.f32 (!%p238_p2), 6400  ;;  %vm1263_vm2 = vcmask (!%p238_p2), 1045504  }
   0x8   : > { %717 = vmatprep.subr.bf16.mxu0 (!%p238_p2), %v7520_v1  ;;  %v7287_v11 = vld [vmem:[%s8916_s1 + $0x48] sm:$0xff] (!%p238_p2)   ;;  %v7288_v12 = vld [vmem:[%s8916_s1 + $0x50] sm:$0xff] (!%p238_p2)   ;;  %v7289_v13 = vld [vmem:[%s8916_s1 + $0x58] sm:$0xff] (!%p238_p2)   ;;  %vm1287_vm3 = vcmask (!%p238_p2), 261120   ;;  %vm2063_vm4 = vsmask.f32 (!%p238_p2), 5376 }
   0x9   : > { %v7290_v14 = vld [vmem:[%s8916_s1 + $0x60] sm:$0xff] (!%p238_p2)   ;;  %v7291_v15 = vld [vmem:[%s8916_s1 + $0x68] sm:$0xff] (!%p238_p2)   ;;  %v7292_v16 = vld [vmem:[%s8916_s1 + $0x70] sm:$0xff] (!%p238_p2)   ;;  %vm1888_vm5 = vsmask.f32 (!%p238_p2), 7424  ;;  %vm2646_vm6 = vcmask (!%p238_p2), 1046528  }
   0xa   : > { %v7293_v17 = vld [vmem:[%s8916_s1 + $0x78] sm:$0xff] (!%p238_p2)   ;;  %v7369_v59 = vld [vmem:[%s8918_s3 + $0x10] sm:$0xff] (!%p238_p2)   ;;  %vm2828_vm7 = vcmask (!%p238_p2), 1044480   ;;  %vm3562_vm8 = vsmask.f32 (!%p238_p2), 4352  ;;  %vm7522_vm9 = vmmov (!%p238_p2), 0  }
   0xb   : > { %718 = vmatpush1.bf16.msra.mxu0 (!%p238_p2), %v7279_v2  ;;  %6577 = vmatprep.subr.bf16.mxu1 (!%p238_p2), %v7369_v59  ;;  %v7372_v61 = vld [vmem:[%s8918_s3 + $0x18] sm:$0xff] (!%p238_p2)   ;;  %vm4194_vm10 = vcmask (!%p238_p2), 523269   ;;  %vm4186_vm11 = vcmask (!%p238_p2), 523264   ;;  %vm4192_vm12 = vcmask (!%p238_p2), 520192   ;;  %vm4778_vm13 = vsmask.f32 (!%p238_p2), 2304 }
   0xc   : > { %719 = vmatprep.subr.bf16.mxu0 (!%p238_p2), %v7520_v1  ;;  %6578 = vmatpush3.bf16.msra.mxu1 (!%p238_p2), %v7369_v59  ;;  %4195 = vst.msk [vmem:[#allocation3 + $0x28] sm:$0xe0] (!%p238_p2), %vm4194_vm10, %v7520_v1  ;;  %vm4633_vm14 = vcmask (!%p238_p2), 1042432   ;;  %vm4964_vm15 = vcmask (!%p238_p2), 1041408  }
   0xd   : > { %s8932_s25 = smov (!%p269_p3, %s5772_s25), 1  ;;  %6579 = vmatprep.subr.bf16.mxu1 %v7372_v61 }
   0xe   : > { %s7265_s11 = smul.u32 400, %s8932_s25 }
   0xf   : > { %720 = vmatpush1.bf16.msra.mxu0 %v7280_v3  ;;  %s7266_s13 = smul.u32 28, %s8932_s25 }
  0x10   : > { %721 = vmatprep.subr.bf16.mxu0 %v7520_v1  ;;  %s7596_s16 = scalar_lea.vmem %s8915_s0, %s7265_s11  ;;  %6580 = vmatpush3.bf16.msra.mxu1 %v7372_v61 }
  0x11   : > { %v7296_v6 = vld [vmem:[%s7596_s16 + $0x4] ss:$8 sps:$4 sm:$0xff]   ;;  %v7294_v18 = vld [vmem:[%s7596_s16] ss:$8 sps:$4 sm:$0xff]   ;;  %v7297_v19 = vld [vmem:[%s7596_s16 + $0x14] ss:$8 sps:$4 sm:$0xff]   ;;  %s8821_s19 = scalar_lea.vmem %s8922_s7, %s7266_s13 }
  0x12   : > { %747 = vmatprep.mubr.bf16.mxu0 %v7296_v6  ;;  %v7299_v20 = vld [vmem:[%s7596_s16 + $0x10] ss:$8 sps:$4 sm:$0xff]   ;;  %v7300_v21 = vld [vmem:[%s7596_s16 + $0x24] ss:$8 sps:$4 sm:$0xff]   ;;  %v7302_v22 = vld [vmem:[%s7596_s16 + $0x20] ss:$8 sps:$4 sm:$0xff]  }
  0x13   : > { %722 = vmatpush1.bf16.msra.mxu0 %v7281_v4  ;;  %v7303_v23 = vld [vmem:[%s7596_s16 + $0x34] ss:$8 sps:$4 sm:$0xff]   ;;  %v7305_v24 = vld [vmem:[%s7596_s16 + $0x30] ss:$8 sps:$4 sm:$0xff]   ;;  %v7306_v25 = vld [vmem:[%s7596_s16 + $0x44] ss:$8 sps:$4 sm:$0xff]  }
  0x14   : > { %723 = vmatprep.subr.bf16.mxu0 %v7520_v1  ;;  %v7308_v26 = vld [vmem:[%s7596_s16 + $0x40] ss:$8 sps:$4 sm:$0xff]   ;;  %v7309_v27 = vld [vmem:[%s7596_s16 + $0x54] ss:$8 sps:$4 sm:$0xff]   ;;  %v7311_v28 = vld [vmem:[%s7596_s16 + $0x50] ss:$8 sps:$4 sm:$0xff]  }
  0x15   : > { %v7312_v29 = vld [vmem:[%s7596_s16 + $0x64] ss:$8 sps:$4 sm:$0xff]   ;;  %v7314_v30 = vld [vmem:[%s7596_s16 + $0x60] ss:$8 sps:$4 sm:$0xff]   ;;  %v7315_v31 = vld [vmem:[%s7596_s16 + $0x74] ss:$8 sps:$4 sm:$0xff]  }
  0x16   : > { %v7317_v32 = vld [vmem:[%s7596_s16 + $0x70] ss:$8 sps:$4 sm:$0xff]   ;;  %v7318_v33 = vld [vmem:[%s7596_s16 + $0x84] ss:$8 sps:$4 sm:$0xff]   ;;  %v7320_v34 = vld [vmem:[%s7596_s16 + $0x80] ss:$8 sps:$4 sm:$0xff]  }
  0x17   : > { %724 = vmatpush1.bf16.msra.mxu0 %v7282_v5  ;;  %v7321_v35 = vld [vmem:[%s7596_s16 + $0x94] ss:$8 sps:$4 sm:$0xff]   ;;  %v7323_v36 = vld [vmem:[%s7596_s16 + $0x90] ss:$8 sps:$4 sm:$0xff]   ;;  %v7324_v37 = vld [vmem:[%s7596_s16 + $0xa4] ss:$8 sps:$4 sm:$0xff]  }
  0x18   : > { %725 = vmatprep.subr.bf16.mxu0 %v7520_v1  ;;  %v7326_v38 = vld [vmem:[%s7596_s16 + $0xa0] ss:$8 sps:$4 sm:$0xff]   ;;  %v7327_v39 = vld [vmem:[%s7596_s16 + $0xb4] ss:$8 sps:$4 sm:$0xff]   ;;  %v7329_v40 = vld [vmem:[%s7596_s16 + $0xb0] ss:$8 sps:$4 sm:$0xff]  }
  0x19   : > { %v7330_v41 = vld [vmem:[%s7596_s16 + $0xc4] ss:$8 sps:$4 sm:$0xff]   ;;  %v7332_v42 = vld [vmem:[%s7596_s16 + $0xc0] ss:$8 sps:$4 sm:$0xff]   ;;  %v7333_v43 = vld [vmem:[%s7596_s16 + $0xd4] ss:$8 sps:$4 sm:$0xff]  }
  0x1a   : > { %v7335_v44 = vld [vmem:[%s7596_s16 + $0xd0] ss:$8 sps:$4 sm:$0xff]   ;;  %v7336_v45 = vld [vmem:[%s7596_s16 + $0xe4] ss:$8 sps:$4 sm:$0xff]   ;;  %v7338_v46 = vld [vmem:[%s7596_s16 + $0xe0] ss:$8 sps:$4 sm:$0xff]  }
  0x1b   : > { %726 = vmatpush1.bf16.msra.mxu0 %v7283_v7  ;;  %v7339_v47 = vld [vmem:[%s7596_s16 + $0xf4] ss:$8 sps:$4 sm:$0xff]   ;;  %v7341_v48 = vld [vmem:[%s7596_s16 + $0xf0] ss:$8 sps:$4 sm:$0xff]   ;;  %v7342_v49 = vld [vmem:[%s7596_s16 + $0x104] ss:$8 sps:$4 sm:$0xff]  }
  0x1c   : > { %727 = vmatprep.subr.bf16.mxu0 %v7520_v1  ;;  %v7344_v50 = vld [vmem:[%s7596_s16 + $0x100] ss:$8 sps:$4 sm:$0xff]   ;;  %v7345_v51 = vld [vmem:[%s7596_s16 + $0x114] ss:$8 sps:$4 sm:$0xff]   ;;  %v7347_v52 = vld [vmem:[%s7596_s16 + $0x110] ss:$8 sps:$4 sm:$0xff]  }
  0x1d   : > { %v7348_v53 = vld [vmem:[%s7596_s16 + $0x124] ss:$8 sps:$4 sm:$0xff]   ;;  %v7350_v54 = vld [vmem:[%s7596_s16 + $0x120] ss:$8 sps:$4 sm:$0xff]   ;;  %v7351_v55 = vld [vmem:[%s7596_s16 + $0x134] ss:$8 sps:$4 sm:$0xff]  }
  0x1e   : > { %v7353_v56 = vld [vmem:[%s7596_s16 + $0x130] ss:$8 sps:$4 sm:$0xff]   ;;  %v7354_v57 = vld [vmem:[%s7596_s16 + $0x144] ss:$8 sps:$4 sm:$0xff]   ;;  %v7356_v58 = vld [vmem:[%s7596_s16 + $0x140] ss:$8 sps:$4 sm:$0xff]  }
  0x1f   : > { %728 = vmatpush1.bf16.msra.mxu0 %v7284_v8  ;;  %v7357_v60 = vld [vmem:[%s7596_s16 + $0x154] ss:$8 sps:$4 sm:$0xff]   ;;  %v7359_v62 = vld [vmem:[%s7596_s16 + $0x150] ss:$8 sps:$4 sm:$0xff]   ;;  %v7360_v63 = vld [vmem:[%s7596_s16 + $0x164] ss:$8 sps:$4 sm:$0xff]  }
  0x20   : > { %729 = vmatprep.subr.bf16.mxu0 %v7520_v1  ;;  %v7362_v0 = vld [vmem:[%s7596_s16 + $0x160] ss:$8 sps:$4 sm:$0xff]   ;;  %v7363_v2 = vld [vmem:[%s7596_s16 + $0x174] ss:$8 sps:$4 sm:$0xff]   ;;  %v7365_v3 = vld [vmem:[%s7596_s16 + $0x170] ss:$8 sps:$4 sm:$0xff]  }
  0x21   : > { %v7366_v4 = vld [vmem:[%s7596_s16 + $0x184] ss:$8 sps:$4 sm:$0xff]   ;;  %v7368_v5 = vld [vmem:[%s7596_s16 + $0x180] ss:$8 sps:$4 sm:$0xff]  }
  0x22   : > { %v7704_v6 = vld [vmem:[%s8918_s3] sm:$0xff]  }
  0x23   : > { %730 = vmatpush1.bf16.msra.mxu0 %v7285_v9  ;;  %6593 = vmatprep.subr.bf16.mxu1 %v7704_v6  ;;  %v7710_v7 = vld [vmem:[%s8917_s2] ss:$0 sm:$0xff] }
  0x24   : > { %731 = vmatprep.subr.bf16.mxu0 %v7520_v1 }
  0x27   : > { %732 = vmatpush1.bf16.msra.mxu0 %v7286_v10 }
  0x28   : > { %733 = vmatprep.subr.bf16.mxu0 %v7520_v1 }
  0x2b   : > { %734 = vmatpush1.bf16.msra.mxu0 %v7287_v11 }
  0x2c   : > { %735 = vmatprep.subr.bf16.mxu0 %v7520_v1 }
  0x2f   : > { %736 = vmatpush1.bf16.msra.mxu0 %v7288_v12 }
  0x30   : > { %737 = vmatprep.subr.bf16.mxu0 %v7520_v1 }
  0x33   : > { %738 = vmatpush1.bf16.msra.mxu0 %v7289_v13 }
  0x34   : > { %739 = vmatprep.subr.bf16.mxu0 %v7520_v1 }
  0x37   : > { %740 = vmatpush1.bf16.msra.mxu0 %v7290_v14 }
  0x38   : > { %741 = vmatprep.subr.bf16.mxu0 %v7520_v1 }
  0x3b   : > { %742 = vmatpush1.bf16.msra.mxu0 %v7291_v15 }
  0x3c   : > { %743 = vmatprep.subr.bf16.mxu0 %v7520_v1 }
  0x3f   : > { %744 = vmatpush1.bf16.msra.mxu0 %v7292_v16 }
  0x40   : > { %745 = vmatprep.subr.bf16.mxu0 %v7520_v1 }
  0x43   : > { %746 = vmatpush1.bf16.msra.mxu0 %v7293_v17 }
  0x46   : > { %748 = vmatmul.mubr.bf16.vlgmr.msra.gmra.mrb[0].mxu0 %v7294_v18 }
  0x47   : > { %755 = vmatprep.mubr.bf16.mxu0 %v7297_v19 }
  0x4e   : > { %756 = vmatmul.mubr.bf16.gmra.mrb[4].mxu0 %v7299_v20 }
  0x4f   : > { %763 = vmatprep.mubr.bf16.mxu0 %v7300_v21 }
  0x56   : > { %764 = vmatmul.mubr.bf16.gmra.mrb[8].mxu0 %v7302_v22 }
  0x57   : > { %771 = vmatprep.mubr.bf16.mxu0 %v7303_v23 }
  0x5e   : > { %772 = vmatmul.mubr.bf16.gmra.mrb[12].mxu0 %v7305_v24 }
  0x5f   : > { %779 = vmatprep.mubr.bf16.mxu0 %v7306_v25 }
  0x66   : > { %780 = vmatmul.mubr.bf16.gmra.mrb[16].mxu0 %v7308_v26 }
  0x67   : > { %787 = vmatprep.mubr.bf16.mxu0 %v7309_v27 }
  0x6e   : > { %788 = vmatmul.mubr.bf16.gmra.mrb[20].mxu0 %v7311_v28 }
  0x6f   : > { %795 = vmatprep.mubr.bf16.mxu0 %v7312_v29 }
  0x76   : > { %796 = vmatmul.mubr.bf16.gmra.mrb[24].mxu0 %v7314_v30 }
  0x77   : > { %803 = vmatprep.mubr.bf16.mxu0 %v7315_v31 }
  0x7e   : > { %804 = vmatmul.mubr.bf16.gmra.mrb[28].mxu0 %v7317_v32 }
  0x7f   : > { %811 = vmatprep.mubr.bf16.mxu0 %v7318_v33 }
  0x86   : > { %812 = vmatmul.mubr.bf16.gmra.mrb[32].mxu0 %v7320_v34 }
  0x87   : > { %819 = vmatprep.mubr.bf16.mxu0 %v7321_v35 }
  0x8e   : > { %820 = vmatmul.mubr.bf16.gmra.mrb[36].mxu0 %v7323_v36 }
  0x8f   : > { %827 = vmatprep.mubr.bf16.mxu0 %v7324_v37 }
  0x96   : > { %828 = vmatmul.mubr.bf16.gmra.mrb[40].mxu0 %v7326_v38 }
  0x97   : > { %835 = vmatprep.mubr.bf16.mxu0 %v7327_v39 }
  0x9e   : > { %836 = vmatmul.mubr.bf16.gmra.mrb[44].mxu0 %v7329_v40 }
  0x9f   : > { %843 = vmatprep.mubr.bf16.mxu0 %v7330_v41 }
  0xa6   : > { %844 = vmatmul.mubr.bf16.gmra.mrb[48].mxu0 %v7332_v42 }
  0xa7   : > { %851 = vmatprep.mubr.bf16.mxu0 %v7333_v43 }
  0xae   : > { %852 = vmatmul.mubr.bf16.gmra.mrb[52].mxu0 %v7335_v44 }
  0xaf   : > { %859 = vmatprep.mubr.bf16.mxu0 %v7336_v45 }
  0xb6   : > { %860 = vmatmul.mubr.bf16.gmra.mrb[56].mxu0 %v7338_v46 }
  0xb7   : > { %867 = vmatprep.mubr.bf16.mxu0 %v7339_v47 }
  0xbe   : > { %868 = vmatmul.mubr.bf16.gmra.mrb[60].mxu0 %v7341_v48 }
  0xbf   : > { %875 = vmatprep.mubr.bf16.mxu0 %v7342_v49 }
  0xc6   : > { %876 = vmatmul.mubr.bf16.gmra.mrb[64].mxu0 %v7344_v50 }
  0xc7   : > { %883 = vmatprep.mubr.bf16.mxu0 %v7345_v51 }
  0xce   : > { %884 = vmatmul.mubr.bf16.gmra.mrb[68].mxu0 %v7347_v52 }
  0xcf   : > { %891 = vmatprep.mubr.bf16.mxu0 %v7348_v53 }
  0xd6   : > { %892 = vmatmul.mubr.bf16.gmra.mrb[72].mxu0 %v7350_v54 }
  0xd7   : > { %899 = vmatprep.mubr.bf16.mxu0 %v7351_v55 }
  0xde   : > { %900 = vmatmul.mubr.bf16.gmra.mrb[76].mxu0 %v7353_v56 }
  0xdf   : > { %907 = vmatprep.mubr.bf16.mxu0 %v7354_v57 }
  0xe6   : > { %908 = vmatmul.mubr.bf16.gmra.mrb[80].mxu0 %v7356_v58 }
  0xe7   : > { %915 = vmatprep.mubr.bf16.mxu0 %v7357_v60 }
  0xee   : > { %916 = vmatmul.mubr.bf16.gmra.mrb[84].mxu0 %v7359_v62 }
  0xef   : > { %923 = vmatprep.mubr.bf16.mxu0 %v7360_v63 }
  0xf6   : > { %924 = vmatmul.mubr.bf16.gmra.mrb[88].mxu0 %v7362_v0 }
  0xf7   : > { %931 = vmatprep.mubr.bf16.mxu0 %v7363_v2 }
  0xfe   : > { %932 = vmatmul.mubr.bf16.gmra.mrb[92].mxu0 %v7365_v3 }
  0xff   : > { %939 = vmatprep.mubr.bf16.mxu0 %v7366_v4 }
 0x106   : > { %940 = vmatmul.mubr.bf16.gmra.mrb[96].mxu0 %v7368_v5 }
 0x119   : > { %v749_v8 = vpop.f32.mrb[0].mxu0 }
 0x11a   : > { %v750_v9 = vadd.f32 %v7710_v7, %v749_v8  ;;  %v751_v10 = vpop.f32.mrb[1].mxu0 }
 0x11b   : > { %v752_v11 = vpop.f32.mrb[2].mxu0 }
 0x11c   : > { %v6310_v12 = vpack.c.bf16 %v750_v9, %v750_v9  ;;  %v753_v13 = vadd.f32 %v7710_v7, %v752_v11  ;;  %v754_v14 = vpop.f32.mrb[3].mxu0 }
 0x11e   : > { %1149 = vst.msk [vmem:[#allocation2] sm:$0xf] %vm1148_vm0, %v6310_v12  ;;  %v6311_v15 = vpack.c.bf16 %v753_v13, %v753_v13 }
 0x120   : > { %1150 = vst.msk [vmem:[#allocation2 + $0x4] sm:$0xf] %vm1148_vm0, %v6311_v15 }
 0x121   : > { %v757_v16 = vpop.f32.mrb[4].mxu0 }
 0x122   : > { %v758_v17 = vadd.f32 %v7710_v7, %v757_v16  ;;  %v759_v18 = vpop.f32.mrb[5].mxu0 }
 0x123   : > { %v760_v19 = vpop.f32.mrb[6].mxu0 }
 0x124   : > { %v6312_v20 = vpack.c.bf16 %v758_v17, %v758_v17  ;;  %v761_v21 = vadd.f32 %v7710_v7, %v760_v19  ;;  %v762_v22 = vpop.f32.mrb[7].mxu0 }
 0x126   : > { %1151 = vst.msk [vmem:[#allocation2 + $0x8] sm:$0xf] %vm1148_vm0, %v6312_v20  ;;  %v6313_v23 = vpack.c.bf16 %v761_v21, %v761_v21 }
 0x128   : > { %1152 = vst.msk [vmem:[#allocation2 + $0xc] sm:$0xf] %vm1148_vm0, %v6313_v23 }
 0x129   : > { %v765_v24 = vpop.f32.mrb[8].mxu0 }
 0x12a   : > { %v766_v25 = vadd.f32 %v7710_v7, %v765_v24  ;;  %v767_v26 = vpop.f32.mrb[9].mxu0 }
 0x12b   : > { %v768_v27 = vpop.f32.mrb[10].mxu0 }
 0x12c   : > { %v6314_v28 = vpack.c.bf16 %v766_v25, %v766_v25  ;;  %v769_v29 = vadd.f32 %v7710_v7, %v768_v27  ;;  %v770_v30 = vpop.f32.mrb[11].mxu0 }
 0x12d   : > { %v7415_v32 = vld [vmem:[#allocation2 + $0x4] sm:$0xfe]  }
 0x12e   : > { %1153 = vst.msk [vmem:[#allocation2 + $0x10] sm:$0xf] %vm1148_vm0, %v6314_v28  ;;  %v6315_v31 = vpack.c.bf16 %v769_v29, %v769_v29  ;;  %v3336_v40 = vshrl.u32 %v7415_v32, 16  ;;  %v3339_v41 = vshll.u32 %v7415_v32, 16 }
 0x130   : > { %1154 = vst.msk [vmem:[#allocation2 + $0x14] sm:$0xf] %vm1148_vm0, %v6315_v31  ;;  %v3338_v44 = vrot.slane %v3336_v40, 1  ;;  %v3341_v45 = vrot.slane %v3339_v41, 2 }
 0x131   : > { %v773_v33 = vpop.f32.mrb[12].mxu0 }
 0x132   : > { %v774_v34 = vadd.f32 %v7710_v7, %v773_v33  ;;  %v775_v35 = vpop.f32.mrb[13].mxu0  ;;  %v3342_v57 = vor.u32 %v3341_v45, %v3338_v44 }
 0x133   : > { %v776_v36 = vpop.f32.mrb[14].mxu0 }
 0x134   : > { %v6316_v37 = vpack.c.bf16 %v774_v34, %v774_v34  ;;  %v777_v38 = vadd.f32 %v7710_v7, %v776_v36  ;;  %v778_v39 = vpop.f32.mrb[15].mxu0 }
 0x135   : > { %v7416_v42 = vld [vmem:[#allocation2 + $0xc] sm:$0xff]  }
 0x136   : > { %1155 = vst.msk [vmem:[#allocation2 + $0x18] sm:$0xf] %vm1148_vm0, %v6316_v37  ;;  %v6317_v43 = vpack.c.bf16 %v777_v38, %v777_v38  ;;  %v3344_v46 = vshrl.u32 %v7416_v42, 16  ;;  %v3347_v47 = vshll.u32 %v7416_v42, 16 }
 0x138   : > { %1156 = vst.msk [vmem:[#allocation2 + $0x1c] sm:$0xf] %vm1148_vm0, %v6317_v43  ;;  %v3346_v51 = vrot.slane %v3344_v46, 1  ;;  %v3349_v52 = vrot.slane %v3347_v47, 2 }
 0x139   : > { %v781_v48 = vpop.f32.mrb[16].mxu0 }
 0x13a   : > { %v782_v49 = vadd.f32 %v7710_v7, %v781_v48  ;;  %v783_v50 = vpop.f32.mrb[17].mxu0  ;;  %v3350_v58 = vor.u32 %v3349_v52, %v3346_v51 }
 0x13b   : > { %v784_v53 = vpop.f32.mrb[18].mxu0 }
 0x13c   : > { %v6318_v54 = vpack.c.bf16 %v782_v49, %v782_v49  ;;  %v785_v55 = vadd.f32 %v7710_v7, %v784_v53  ;;  %v786_v56 = vpop.f32.mrb[19].mxu0  ;;  %v7732_v61 = vsel %vm3334_vm1, %v3342_v57, %v3350_v58 }
 0x13d   : > { %v7418_v59 = vld [vmem:[#allocation2 + $0x14] sm:$0xff]  }
 0x13e   : > { %1157 = vst.msk [vmem:[#allocation2 + $0x20] sm:$0xf] %vm1148_vm0, %v6318_v54  ;;  %v6319_v60 = vpack.c.bf16 %v785_v55, %v785_v55  ;;  %v3353_v62 = vshrl.u32 %v7418_v59, 16  ;;  %v3356_v63 = vshll.u32 %v7418_v59, 16 }
 0x140   : > { %1158 = vst.msk [vmem:[#allocation2 + $0x24] sm:$0xf] %vm1148_vm0, %v6319_v60  ;;  %v3355_v4 = vrot.slane %v3353_v62, 1  ;;  %v3358_v5 = vrot.slane %v3356_v63, 2 }
 0x141   : > { %v789_v0 = vpop.f32.mrb[20].mxu0 }
 0x142   : > { %v790_v2 = vadd.f32 %v7710_v7, %v789_v0  ;;  %v791_v3 = vpop.f32.mrb[21].mxu0  ;;  %v3359_v12 = vor.u32 %v3358_v5, %v3355_v4 }
 0x143   : > { %v792_v8 = vpop.f32.mrb[22].mxu0 }
 0x144   : > { %v6320_v9 = vpack.c.bf16 %v790_v2, %v790_v2  ;;  %v793_v10 = vadd.f32 %v7710_v7, %v792_v8  ;;  %v794_v11 = vpop.f32.mrb[23].mxu0  ;;  %v7739_v15 = vsel %vm3334_vm1, %v3350_v58, %v3359_v12 }
 0x145   : > { %v7419_v13 = vld [vmem:[#allocation2 + $0x1c] sm:$0xff]  }
 0x146   : > { %1159 = vst.msk [vmem:[#allocation2 + $0x28] sm:$0xf] %vm1148_vm0, %v6320_v9  ;;  %v6321_v14 = vpack.c.bf16 %v793_v10, %v793_v10  ;;  %v3362_v16 = vshrl.u32 %v7419_v13, 16  ;;  %v3365_v17 = vshll.u32 %v7419_v13, 16 }
 0x148   : > { %1160 = vst.msk [vmem:[#allocation2 + $0x2c] sm:$0xf] %vm1148_vm0, %v6321_v14  ;;  %v3364_v21 = vrot.slane %v3362_v16, 1  ;;  %v3367_v22 = vrot.slane %v3365_v17, 2 }
 0x149   : > { %v797_v18 = vpop.f32.mrb[24].mxu0 }
 0x14a   : > { %v798_v19 = vadd.f32 %v7710_v7, %v797_v18  ;;  %v799_v20 = vpop.f32.mrb[25].mxu0  ;;  %v3368_v27 = vor.u32 %v3367_v22, %v3364_v21 }
 0x14b   : > { %v800_v23 = vpop.f32.mrb[26].mxu0 }
 0x14c   : > { %v6322_v24 = vpack.c.bf16 %v798_v19, %v798_v19  ;;  %v801_v25 = vadd.f32 %v7710_v7, %v800_v23  ;;  %v802_v26 = vpop.f32.mrb[27].mxu0  ;;  %v7746_v30 = vsel %vm3334_vm1, %v3359_v12, %v3368_v27 }
 0x14d   : > { %v7420_v28 = vld [vmem:[#allocation2 + $0x24] sm:$0xff]  }
 0x14e   : > { %1161 = vst.msk [vmem:[#allocation2 + $0x30] sm:$0xf] %vm1148_vm0, %v6322_v24  ;;  %v6323_v29 = vpack.c.bf16 %v801_v25, %v801_v25  ;;  %v3371_v31 = vshrl.u32 %v7420_v28, 16  ;;  %v3374_v32 = vshll.u32 %v7420_v28, 16 }
 0x14f   : > { %v2609_v45 = vld [vmem:[#allocation2 + $0x2c] sm:$0xf] }
 0x150   : > { %1162 = vst.msk [vmem:[#allocation2 + $0x34] sm:$0xf] %vm1148_vm0, %v6323_v29  ;;  %v3373_v34 = vrot.slane %v3371_v31, 1  ;;  %v3376_v37 = vrot.slane %v3374_v32, 2 }
 0x151   : > { %v805_v33 = vpop.f32.mrb[28].mxu0 }
 0x152   : > { %v806_v35 = vadd.f32 %v7710_v7, %v805_v33  ;;  %v807_v36 = vpop.f32.mrb[29].mxu0  ;;  %v3377_v42 = vor.u32 %v3376_v37, %v3373_v34 }
 0x153   : > { %v808_v38 = vpop.f32.mrb[30].mxu0 }
 0x154   : > { %v6324_v39 = vpack.c.bf16 %v806_v35, %v806_v35  ;;  %v809_v40 = vadd.f32 %v7710_v7, %v808_v38  ;;  %v810_v41 = vpop.f32.mrb[31].mxu0  ;;  %v7753_v47 = vsel %vm3334_vm1, %v3368_v27, %v3377_v42  ;;  %v7380_v35 = vld [vmem:[%s8918_s3 + $0x8] sm:$0xff]  }
 0x155   : > { %v3325_v43 = vld [vmem:[#allocation2 + $0x30] sm:$0x7] }
 0x156   : > { %1163 = vst.msk [vmem:[#allocation2 + $0x38] sm:$0xf] %vm1148_vm0, %v6324_v39  ;;  %v6325_v44 = vpack.c.bf16 %v809_v40, %v809_v40  ;;  %v6092_v46 = vcombine.low %v2609_v45, %v3325_v43  ;;  %v7787_v45 = vld [vmem:[%s8918_s3 + $0x20] sm:$0xff]  }
 0x157   : > { %v7370_v48 = vld [vmem:[#allocation2 + $0x30] sm:$0xfc]  }
 0x158   : > { %1164 = vst.msk [vmem:[#allocation2 + $0x3c] sm:$0xf] %vm1148_vm0, %v6325_v44  ;;  %v3380_v50 = vshrl.u32 %v6092_v46, 16  ;;  %v3383_v53 = vshll.u32 %v6092_v46, 16  ;;  %v2065_v59 = vshrl.u32 %v7370_v48, 16  ;;  %v2068_v62 = vshll.u32 %v7370_v48, 16 }
 0x159   : > { %v813_v49 = vpop.f32.mrb[32].mxu0  ;;  %v1264_v3 = vrot.slane %v7370_v48, 2 }
 0x15a   : > { %v814_v51 = vadd.f32 %v7710_v7, %v813_v49  ;;  %v815_v52 = vpop.f32.mrb[33].mxu0  ;;  %v3382_v55 = vrot.slane %v3380_v50, 1  ;;  %v3385_v60 = vrot.slane %v3383_v53, 2  ;;  %v2067_v4 = vrot.slane %v2065_v59, 2 }
 0x15b   : > { %v816_v54 = vpop.f32.mrb[34].mxu0  ;;  %v2070_v10 = vrot.slane %v2068_v62, 3 }
 0x15c   : > { %v6326_v56 = vpack.c.bf16 %v814_v51, %v814_v51  ;;  %v817_v57 = vadd.f32 %v7710_v7, %v816_v54  ;;  %v818_v58 = vpop.f32.mrb[35].mxu0  ;;  %v7759_v0 = vor.u32 %v3385_v60, %v3382_v55 }
 0x15d   : > { %v2071_v23 = vor.u32 %v2070_v10, %v2067_v4 }
 0x15e   : > { %1165 = vst.msk [vmem:[#allocation2 + $0x40] sm:$0xf] %vm1148_vm0, %v6326_v56  ;;  %v6327_v63 = vpack.c.bf16 %v817_v57, %v817_v57  ;;  %v7764_v5 = vsel %vm3334_vm1, %v3377_v42, %v7759_v0 }
 0x15f   : > { %v7371_v2 = vld [vmem:[#allocation2 + $0x38] sm:$0xff]  }
 0x160   : > { %1166 = vst.msk [vmem:[#allocation2 + $0x44] sm:$0xf] %vm1148_vm0, %v6327_v63  ;;  %v1265_v9 = vrot.slane %v7371_v2, 2  ;;  %v2073_v11 = vshrl.u32 %v7371_v2, 16  ;;  %v2076_v12 = vshll.u32 %v7371_v2, 16 }
 0x161   : > { %v821_v8 = vpop.f32.mrb[36].mxu0 }
 0x162   : > { %v822_v13 = vadd.f32 %v7710_v7, %v821_v8  ;;  %v823_v14 = vpop.f32.mrb[37].mxu0  ;;  %v1266_v17 = vsel %vm1263_vm2, %v1264_v3, %v1265_v9  ;;  %v2075_v18 = vrot.slane %v2073_v11, 2  ;;  %v2078_v19 = vrot.slane %v2076_v12, 3 }
 0x163   : > { %v824_v16 = vpop.f32.mrb[38].mxu0  ;;  %6581 = vmatprep.mubr.msk.bf16.mxu1 %vm1287_vm3, %v1266_v17 }
 0x164   : > { %v6328_v20 = vpack.c.bf16 %v822_v13, %v822_v13  ;;  %v825_v21 = vadd.f32 %v7710_v7, %v824_v16  ;;  %v826_v22 = vpop.f32.mrb[39].mxu0  ;;  %v2079_v24 = vor.u32 %v2078_v19, %v2075_v18 }
 0x166   : > { %1167 = vst.msk [vmem:[#allocation2 + $0x48] sm:$0xf] %vm1148_vm0, %v6328_v20  ;;  %v6329_v25 = vpack.c.bf16 %v825_v21, %v825_v21  ;;  %v7772_v27 = vsel %vm2063_vm4, %v2071_v23, %v2079_v24 }
 0x167   : > { %v7373_v26 = vld [vmem:[#allocation2 + $0x40] sm:$0xff]  }
 0x168   : > { %1168 = vst.msk [vmem:[#allocation2 + $0x4c] sm:$0xf] %vm1148_vm0, %v6329_v25  ;;  %v1267_v29 = vrot.slane %v7373_v26, 2  ;;  %v2082_v31 = vshrl.u32 %v7373_v26, 16  ;;  %v2085_v32 = vshll.u32 %v7373_v26, 16 }
 0x169   : > { %v829_v28 = vpop.f32.mrb[40].mxu0 }
 0x16a   : > { %v830_v33 = vadd.f32 %v7710_v7, %v829_v28  ;;  %v831_v34 = vpop.f32.mrb[41].mxu0  ;;  %v1268_v37 = vsel %vm1263_vm2, %v1265_v9, %v1267_v29  ;;  %v2084_v38 = vrot.slane %v2082_v31, 2  ;;  %v2087_v39 = vrot.slane %v2085_v32, 3 }
 0x16b   : > { %v832_v36 = vpop.f32.mrb[42].mxu0  ;;  %6582 = vmatmul.mubr.msk.bf16.vlgmr.msra.gmra.mrb[0].mxu1 %vm1287_vm3, %v1268_v37 }
 0x16c   : > { %v6330_v40 = vpack.c.bf16 %v830_v33, %v830_v33  ;;  %v833_v41 = vadd.f32 %v7710_v7, %v832_v36  ;;  %v834_v42 = vpop.f32.mrb[43].mxu0  ;;  %6594 = vmatpush3.bf16.msra.mxu1 %v7704_v6  ;;  %v2088_v43 = vor.u32 %v2087_v39, %v2084_v38 }
 0x16d   : > { %6595 = vmatprep.subr.bf16.mxu1 %v7380_v35 }
 0x16e   : > { %1169 = vst.msk [vmem:[#allocation2 + $0x50] sm:$0xf] %vm1148_vm0, %v6330_v40  ;;  %v6331_v44 = vpack.c.bf16 %v833_v41, %v833_v41  ;;  %v7790_v48 = vsel %vm2063_vm4, %v2079_v24, %v2088_v43 }
 0x16f   : > { %v7374_v46 = vld [vmem:[#allocation2 + $0x48] sm:$0xff]  }
 0x170   : > { %1170 = vst.msk [vmem:[#allocation2 + $0x54] sm:$0xf] %vm1148_vm0, %v6331_v44  ;;  %v1269_v50 = vrot.slane %v7374_v46, 2  ;;  %6596 = vmatpush3.bf16.msra.mxu1 %v7380_v35  ;;  %v2091_v6 = vshrl.u32 %v7374_v46, 16  ;;  %v2094_v51 = vshll.u32 %v7374_v46, 16 }
 0x171   : > { %v837_v49 = vpop.f32.mrb[44].mxu0  ;;  %6609 = vmatprep.subr.bf16.mxu1 %v7787_v45 }
 0x172   : > { %v838_v52 = vadd.f32 %v7710_v7, %v837_v49  ;;  %v839_v53 = vpop.f32.mrb[45].mxu0  ;;  %v1270_v55 = vsel %vm1263_vm2, %v1267_v29, %v1269_v50  ;;  %v2093_v56 = vrot.slane %v2091_v6, 2  ;;  %v2096_v57 = vrot.slane %v2094_v51, 3 }
 0x173   : > { %v840_v54 = vpop.f32.mrb[46].mxu0  ;;  %6585 = vmatprep.mubr.msk.bf16.mxu1 %vm1287_vm3, %v1270_v55 }
 0x174   : > { %v6332_v58 = vpack.c.bf16 %v838_v52, %v838_v52  ;;  %v841_v59 = vadd.f32 %v7710_v7, %v840_v54  ;;  %v842_v60 = vpop.f32.mrb[47].mxu0  ;;  %v2097_v62 = vor.u32 %v2096_v57, %v2093_v56  ;;  %v7831_v57 = vld [vmem:[#allocation2 + $0x8] sm:$0xff]  }
 0x176   : > { %1171 = vst.msk [vmem:[#allocation2 + $0x58] sm:$0xf] %vm1148_vm0, %v6332_v58  ;;  %v6333_v63 = vpack.c.bf16 %v841_v59, %v841_v59  ;;  %v7800_v3 = vsel %vm2063_vm4, %v2088_v43, %v2097_v62  ;;  %v7816_v43 = vld [vmem:[#allocation2] sm:$0xff]   ;;  %v7833_v58 = vld [vmem:[#allocation2 + $0x10] sm:$0xff]   ;;  %v7389_v59 = vld [vmem:[%s8918_s3 + $0x28] sm:$0xff]  }
 0x177   : > { %v7375_v2 = vld [vmem:[#allocation2 + $0x50] sm:$0xff]  }
 0x178   : > { %1172 = vst.msk [vmem:[#allocation2 + $0x5c] sm:$0xf] %vm1148_vm0, %v6333_v63  ;;  %v1271_v8 = vrot.slane %v7375_v2, 2  ;;  %v2100_v9 = vshrl.u32 %v7375_v2, 16  ;;  %v2103_v10 = vshll.u32 %v7375_v2, 16  ;;  %v7848_v63 = vld [vmem:[%s8918_s3 + $0x30] sm:$0xff]  }
 0x179   : > { %v845_v4 = vpop.f32.mrb[48].mxu0 }
 0x17a   : > { %v846_v11 = vadd.f32 %v7710_v7, %v845_v4  ;;  %v847_v12 = vpop.f32.mrb[49].mxu0  ;;  %v1272_v14 = vsel %vm1263_vm2, %v1269_v50, %v1271_v8  ;;  %v2102_v16 = vrot.slane %v2100_v9, 2  ;;  %v2105_v17 = vrot.slane %v2103_v10, 3 }
 0x17b   : > { %v848_v13 = vpop.f32.mrb[50].mxu0  ;;  %6586 = vmatmul.mubr.msk.bf16.gmra.mrb[4].mxu1 %vm1287_vm3, %v1272_v14  ;;  %v7854_v14 = vld [vmem:[#allocation2 + $0x18] sm:$0xff]  }
 0x17c   : > { %v6334_v18 = vpack.c.bf16 %v846_v11, %v846_v11  ;;  %v849_v19 = vadd.f32 %v7710_v7, %v848_v13  ;;  %v850_v20 = vpop.f32.mrb[51].mxu0  ;;  %v2106_v21 = vor.u32 %v2105_v17, %v2102_v16  ;;  %v7857_v16 = vld [vmem:[#allocation2 + $0x20] sm:$0xff]  }
 0x17d   : > { %v1226_v23 = vld [vmem:[#allocation2 + $0x58] sm:$0xf] }
 0x17e   : > { %1173 = vst.msk [vmem:[#allocation2 + $0x60] sm:$0xf] %vm1148_vm0, %v6334_v18  ;;  %v6335_v22 = vpack.c.bf16 %v849_v19, %v849_v19  ;;  %v7809_v26 = vsel %vm2063_vm4, %v2097_v62, %v2106_v21 }
 0x17f   : > { %v1227_v24 = vld [vmem:[#allocation2 + $0x5c] sm:$0x7] }
 0x180   : > { %v2054_v25 = vld [vmem:[#allocation2 + $0x5c] sm:$0xf]  ;;  %1174 = vst.msk [vmem:[#allocation2 + $0x64] sm:$0xf] %vm1148_vm0, %v6335_v22  ;;  %v5905_v28 = vcombine.low %v1226_v23, %v1227_v24 }
 0x181   : > { %v5981_v29 = vcombine.low %v1226_v23, %v2054_v25  ;;  %v853_v31 = vpop.f32.mrb[52].mxu0 }
 0x182   : > { %v854_v32 = vadd.f32 %v7710_v7, %v853_v31  ;;  %v855_v33 = vpop.f32.mrb[53].mxu0  ;;  %v1273_v34 = vrot.slane %v5905_v28, 2  ;;  %v1211_v28 = vld [vmem:[#allocation2 + $0x2c] sm:$0x1] }
 0x183   : > { %v2109_v35 = vshrl.u32 %v5981_v29, 16  ;;  %v2112_v36 = vshll.u32 %v5981_v29, 16  ;;  %v856_v37 = vpop.f32.mrb[54].mxu0 }
 0x184   : > { %v6336_v38 = vpack.c.bf16 %v854_v32, %v854_v32  ;;  %v857_v39 = vadd.f32 %v7710_v7, %v856_v37  ;;  %v858_v40 = vpop.f32.mrb[55].mxu0  ;;  %v1274_v41 = vsel %vm1263_vm2, %v1271_v8, %v1273_v34  ;;  %v7872_v37 = vld [vmem:[#allocation2 + $0x28] sm:$0xf] }
 0x185   : > { %v2111_v42 = vrot.slane %v2109_v35, 2  ;;  %6589 = vmatprep.mubr.msk.bf16.mxu1 %vm1287_vm3, %v1274_v41  ;;  %v2114_v44 = vrot.slane %v2112_v36, 3 }
 0x186   : > { %1175 = vst.msk [vmem:[#allocation2 + $0x68] sm:$0xf] %vm1148_vm0, %v6336_v38  ;;  %v6337_v46 = vpack.c.bf16 %v857_v39, %v857_v39  ;;  %6590 = vmatmul.mubr.msk.bf16.gmra.mrb[8].mxu1 %vm1287_vm3, %v1273_v34 }
 0x187   : > { %6597 = vmatprep.mubr.msk.bf16.mxu1 %vm1287_vm3, %v7816_v43  ;;  %v7822_v49 = vor.u32 %v2114_v44, %v2111_v42 }
 0x188   : > { %1176 = vst.msk [vmem:[#allocation2 + $0x6c] sm:$0xf] %vm1148_vm0, %v6337_v46  ;;  %v5919_v46 = vcombine.low %v7872_v37, %v1211_v28 }
 0x189   : > { %v861_v50 = vpop.f32.mrb[56].mxu0  ;;  %v7827_v6 = vsel %vm2063_vm4, %v2106_v21, %v7822_v49 }
 0x18a   : > { %v862_v51 = vadd.f32 %v7710_v7, %v861_v50  ;;  %v863_v52 = vpop.f32.mrb[57].mxu0 }
 0x18b   : > { %v864_v53 = vpop.f32.mrb[58].mxu0 }
 0x18c   : > { %v6338_v54 = vpack.c.bf16 %v862_v51, %v862_v51  ;;  %v865_v55 = vadd.f32 %v7710_v7, %v864_v53  ;;  %v866_v56 = vpop.f32.mrb[59].mxu0 }
 0x18d   : > { %v7388_v60 = vld [vmem:[#allocation2 + $0x64] sm:$0xff]  }
 0x18e   : > { %1177 = vst.msk [vmem:[#allocation2 + $0x70] sm:$0xf] %vm1148_vm0, %v6338_v54  ;;  %v6339_v62 = vpack.c.bf16 %v865_v55, %v865_v55  ;;  %6598 = vmatmul.mubr.msk.bf16.vlgmr.msra.gmra.mrb[0].mxu1 %vm1287_vm3, %v7831_v57  ;;  %v2251_v4 = vshll.u32 %v7388_v60, 16  ;;  %v2249_v20 = vshrl.u32 %v7388_v60, 16 }
 0x18f   : > { %6601 = vmatprep.mubr.msk.bf16.mxu1 %vm1287_vm3, %v7833_v58  ;;  %6610 = vmatpush3.bf16.msra.mxu1 %v7787_v45  ;;  %v7851_v10 = vld [vmem:[#allocation2 + $0x68] sm:$0xfe]  }
 0x190   : > { %1178 = vst.msk [vmem:[#allocation2 + $0x74] sm:$0xf] %vm1148_vm0, %v6339_v62  ;;  %6611 = vmatprep.subr.bf16.mxu1 %v7389_v59  ;;  %v2253_v18 = vrot.slane %v2251_v4, 1  ;;  %v3754_v21 = vshrl.u32 %v7851_v10, 16  ;;  %v3757_v23 = vshll.u32 %v7851_v10, 16 }
 0x191   : > { %v869_v2 = vpop.f32.mrb[60].mxu0 }
 0x192   : > { %v870_v8 = vadd.f32 %v7710_v7, %v869_v2  ;;  %v871_v9 = vpop.f32.mrb[61].mxu0  ;;  %v2254_v29 = vor.u32 %v2253_v18, %v2249_v20  ;;  %v3756_v39 = vrot.slane %v3754_v21, 1  ;;  %v3759_v40 = vrot.slane %v3757_v23, 2 }
 0x193   : > { %v872_v11 = vpop.f32.mrb[62].mxu0  ;;  %6612 = vmatpush3.bf16.msra.mxu1 %v7389_v59 }
 0x194   : > { %v6340_v12 = vpack.c.bf16 %v870_v8, %v870_v8  ;;  %v873_v45 = vadd.f32 %v7710_v7, %v872_v11  ;;  %v874_v13 = vpop.f32.mrb[63].mxu0  ;;  %6625 = vmatprep.subr.bf16.mxu1 %v7848_v63  ;;  %v3760_v56 = vor.u32 %v3759_v40, %v3756_v39 }
 0x195   : > { %v7390_v17 = vld [vmem:[#allocation2 + $0x6c] sm:$0xff]  }
 0x196   : > { %1179 = vst.msk [vmem:[#allocation2 + $0x78] sm:$0xf] %vm1148_vm0, %v6340_v12  ;;  %v6341_v19 = vpack.c.bf16 %v873_v45, %v873_v45  ;;  %6602 = vmatmul.mubr.msk.bf16.gmra.mrb[4].mxu1 %vm1287_vm3, %v7854_v14  ;;  %v2255_v22 = vshll.u32 %v7390_v17, 16  ;;  %v2259_v55 = vshrl.u32 %v7390_v17, 16 }
 0x197   : > { %6605 = vmatprep.mubr.msk.bf16.mxu1 %vm1287_vm3, %v7857_v16  ;;  %v7867_v24 = vld [vmem:[#allocation2 + $0x70] sm:$0xff]  }
 0x198   : > { %1180 = vst.msk [vmem:[#allocation2 + $0x7c] sm:$0xf] %vm1148_vm0, %v6341_v19  ;;  %v2257_v31 = vrot.slane %v2255_v22, 1  ;;  %v3762_v34 = vshrl.u32 %v7867_v24, 16  ;;  %v3765_v35 = vshll.u32 %v7867_v24, 16  ;;  %v7399_v22 = vld [vmem:[%s8918_s3 + $0x38] sm:$0xff]  }
 0x199   : > { %v877_v25 = vpop.f32.mrb[64].mxu0 }
 0x19a   : > { %v878_v32 = vadd.f32 %v7710_v7, %v877_v25  ;;  %v879_v33 = vpop.f32.mrb[65].mxu0  ;;  %v7875_v38 = vsel %vm1888_vm5, %v2254_v29, %v2257_v31  ;;  %v3764_v50 = vrot.slane %v3762_v34, 1  ;;  %v3767_v52 = vrot.slane %v3765_v35, 2  ;;  %v7906_v34 = vld [vmem:[%s8918_s3 + $0x40] sm:$0xff]  }
 0x19b   : > { %v880_v36 = vpop.f32.mrb[66].mxu0  ;;  %v2261_v8 = vor.u32 %v2259_v55, %v2257_v31 }
 0x19c   : > { %v6342_v41 = vpack.c.bf16 %v878_v32, %v878_v32  ;;  %v881_v42 = vadd.f32 %v7710_v7, %v880_v36  ;;  %v882_v44 = vpop.f32.mrb[67].mxu0  ;;  %v3768_v59 = vor.u32 %v3767_v52, %v3764_v50 }
 0x19d   : > { %v7391_v51 = vld [vmem:[#allocation2 + $0x74] sm:$0xff]  }
 0x19e   : > { %1181 = vst.msk [vmem:[#allocation2 + $0x80] sm:$0xf] %vm1148_vm0, %v6342_v41  ;;  %v6343_v53 = vpack.c.bf16 %v881_v42, %v881_v42  ;;  %6606 = vmatmul.mubr.msk.bf16.gmra.mrb[8].mxu1 %vm1287_vm3, %v5919_v46  ;;  %v2262_v54 = vshll.u32 %v7391_v51, 16  ;;  %v7886_v9 = vsel %vm3334_vm1, %v3760_v56, %v3768_v59  ;;  %v2266_v31 = vshrl.u32 %v7391_v51, 16 }
 0x19f   : > { %6613 = vmatprep.mubr.msk.bf16.mxu1 %vm1287_vm3, %v7388_v60  ;;  %v7883_v62 = vld [vmem:[#allocation2 + $0x78] sm:$0xff]  }
 0x1a0   : > { %1182 = vst.msk [vmem:[#allocation2 + $0x84] sm:$0xf] %vm1148_vm0, %v6343_v53  ;;  %v2264_v4 = vrot.slane %v2262_v54, 1  ;;  %v3771_v45 = vshrl.u32 %v7883_v62, 16  ;;  %v3774_v60 = vshll.u32 %v7883_v62, 16 }
 0x1a1   : > { %v885_v2 = vpop.f32.mrb[68].mxu0 }
 0x1a2   : > { %v886_v11 = vadd.f32 %v7710_v7, %v885_v2  ;;  %v887_v12 = vpop.f32.mrb[69].mxu0  ;;  %v7892_v18 = vsel %vm1888_vm5, %v2261_v8, %v2264_v4  ;;  %v3773_v23 = vrot.slane %v3771_v45, 1  ;;  %v3776_v28 = vrot.slane %v3774_v60, 2 }
 0x1a3   : > { %v888_v13 = vpop.f32.mrb[70].mxu0  ;;  %v2268_v39 = vor.u32 %v2266_v31, %v2264_v4 }
 0x1a4   : > { %v6344_v19 = vpack.c.bf16 %v886_v11, %v886_v11  ;;  %v889_v20 = vadd.f32 %v7710_v7, %v888_v13  ;;  %v890_v21 = vpop.f32.mrb[71].mxu0  ;;  %v3777_v33 = vor.u32 %v3776_v28, %v3773_v23 }
 0x1a5   : > { %v7392_v25 = vld [vmem:[#allocation2 + $0x7c] sm:$0xff]  }
 0x1a6   : > { %1183 = vst.msk [vmem:[#allocation2 + $0x88] sm:$0xf] %vm1148_vm0, %v6344_v19  ;;  %v6345_v29 = vpack.c.bf16 %v889_v20, %v889_v20  ;;  %6614 = vmatmul.mubr.msk.bf16.vlgmr.msra.gmra.mrb[0].mxu1 %vm1287_vm3, %v7390_v17  ;;  %v2269_v32 = vshll.u32 %v7392_v25, 16  ;;  %v7911_v40 = vsel %vm3334_vm1, %v3768_v59, %v3777_v33  ;;  %v2273_v2 = vshrl.u32 %v7392_v25, 16 }
 0x1a7   : > { %6617 = vmatprep.mubr.msk.bf16.mxu1 %vm1287_vm3, %v7391_v51  ;;  %6626 = vmatpush3.bf16.msra.mxu1 %v7848_v63  ;;  %v7908_v35 = vld [vmem:[#allocation2 + $0x80] sm:$0xff]  }
 0x1a8   : > { %1184 = vst.msk [vmem:[#allocation2 + $0x8c] sm:$0xf] %vm1148_vm0, %v6345_v29  ;;  %6627 = vmatprep.subr.bf16.mxu1 %v7399_v22  ;;  %v2271_v17 = vrot.slane %v2269_v32, 1  ;;  %v3780_v42 = vshrl.u32 %v7908_v35, 16  ;;  %v3783_v44 = vshll.u32 %v7908_v35, 16 }
 0x1a9   : > { %v893_v36 = vpop.f32.mrb[72].mxu0 }
 0x1aa   : > { %v894_v63 = vadd.f32 %v7710_v7, %v893_v36  ;;  %v895_v41 = vpop.f32.mrb[73].mxu0  ;;  %v7917_v50 = vsel %vm1888_vm5, %v2268_v39, %v2271_v17  ;;  %v3782_v54 = vrot.slane %v3780_v42, 1  ;;  %v3785_v56 = vrot.slane %v3783_v44, 2 }
 0x1ab   : > { %v896_v46 = vpop.f32.mrb[74].mxu0  ;;  %6628 = vmatpush3.bf16.msra.mxu1 %v7399_v22  ;;  %v2275_v45 = vor.u32 %v2273_v2, %v2271_v17 }
 0x1ac   : > { %v6346_v51 = vpack.c.bf16 %v894_v63, %v894_v63  ;;  %v897_v52 = vadd.f32 %v7710_v7, %v896_v46  ;;  %v898_v53 = vpop.f32.mrb[75].mxu0  ;;  %6641 = vmatprep.subr.bf16.mxu1 %v7906_v34  ;;  %v3786_v8 = vor.u32 %v3785_v56, %v3782_v54 }
 0x1ad   : > { %v7393_v55 = vld [vmem:[#allocation2 + $0x84] sm:$0xff]  }
 0x1ae   : > { %1185 = vst.msk [vmem:[#allocation2 + $0x90] sm:$0xf] %vm1148_vm0, %v6346_v51  ;;  %v6347_v59 = vpack.c.bf16 %v897_v52, %v897_v52  ;;  %6618 = vmatmul.mubr.msk.bf16.gmra.mrb[4].mxu1 %vm1287_vm3, %v7392_v25  ;;  %v2276_v4 = vshll.u32 %v7393_v55, 16  ;;  %v7928_v13 = vsel %vm3334_vm1, %v3777_v33, %v3786_v8  ;;  %v2280_v52 = vshrl.u32 %v7393_v55, 16 }
 0x1af   : > { %6621 = vmatprep.mubr.msk.bf16.mxu1 %vm1287_vm3, %v7393_v55  ;;  %v7925_v11 = vld [vmem:[#allocation2 + $0x88] sm:$0xff]  }
 0x1b0   : > { %1186 = vst.msk [vmem:[#allocation2 + $0x94] sm:$0xf] %vm1148_vm0, %v6347_v59  ;;  %v2278_v60 = vrot.slane %v2276_v4, 1  ;;  %v3789_v21 = vshrl.u32 %v7925_v11, 16  ;;  %v3792_v22 = vshll.u32 %v7925_v11, 16 }
 0x1b1   : > { %v901_v12 = vpop.f32.mrb[76].mxu0  ;;  %v1538_v32 = vld [vmem:[#allocation2 + $0x8c] sm:$0xf] }
 0x1b2   : > { %v902_v19 = vadd.f32 %v7710_v7, %v901_v12  ;;  %v903_v20 = vpop.f32.mrb[77].mxu0  ;;  %v7934_v25 = vsel %vm1888_vm5, %v2275_v45, %v2278_v60  ;;  %v3791_v36 = vrot.slane %v3789_v21, 1  ;;  %v3794_v17 = vrot.slane %v3792_v22, 2 }
 0x1b3   : > { %v904_v23 = vpop.f32.mrb[78].mxu0  ;;  %v2282_v12 = vor.u32 %v2280_v52, %v2278_v60 }
 0x1b4   : > { %v6348_v28 = vpack.c.bf16 %v902_v19, %v902_v19  ;;  %v905_v29 = vadd.f32 %v7710_v7, %v904_v23  ;;  %v906_v31 = vpop.f32.mrb[79].mxu0  ;;  %v3795_v51 = vor.u32 %v3794_v17, %v3791_v36 }
 0x1b5   : > { %v1539_v39 = vld [vmem:[#allocation2 + $0x90] sm:$0x1] }
 0x1b6   : > { %v2240_v33 = vld [vmem:[#allocation2 + $0x90] sm:$0x3]  ;;  %1187 = vst.msk [vmem:[#allocation2 + $0x98] sm:$0xf] %vm1148_vm0, %v6348_v28  ;;  %v6349_v63 = vpack.c.bf16 %v905_v29, %v905_v29  ;;  %v5937_v41 = vcombine.low %v1538_v32, %v1539_v39  ;;  %v7947_v59 = vsel %vm3334_vm1, %v3786_v8, %v3795_v51 }
 0x1b7   : > { %v7938_v42 = vcombine.low %v1538_v32, %v2240_v33  ;;  %v7940_v44 = vld [vmem:[#allocation2 + $0x90] sm:$0xf]  ;;  %v3744_v46 = vld [vmem:[#allocation2 + $0x94] sm:$0x7] }
 0x1b8   : > { %1188 = vst.msk [vmem:[#allocation2 + $0x9c] sm:$0xf] %vm1148_vm0, %v6349_v63  ;;  %6622 = vmatmul.mubr.msk.bf16.gmra.mrb[8].mxu1 %vm1287_vm3, %v5937_v41  ;;  %v6124_v54 = vcombine.low %v7940_v44, %v3744_v46 }
 0x1b9   : > { %v2284_v53 = vshll.u32 %v7938_v42, 16  ;;  %v909_v56 = vpop.f32.mrb[80].mxu0 }
 0x1ba   : > { %v910_v2 = vadd.f32 %v7710_v7, %v909_v56  ;;  %v911_v4 = vpop.f32.mrb[81].mxu0  ;;  %v3798_v19 = vshrl.u32 %v6124_v54, 16  ;;  %v3801_v21 = vshll.u32 %v6124_v54, 16 }
 0x1bb   : > { %v7950_v45 = vrot.slane %v2284_v53, 1  ;;  %v912_v20 = vpop.f32.mrb[82].mxu0 }
 0x1bc   : > { %v6350_v22 = vpack.c.bf16 %v910_v2, %v910_v2  ;;  %v913_v55 = vadd.f32 %v7710_v7, %v912_v20  ;;  %v914_v23 = vpop.f32.mrb[83].mxu0  ;;  %v3800_v31 = vrot.slane %v3798_v19, 1  ;;  %v3803_v32 = vrot.slane %v3801_v21, 2  ;;  %v7964_v7 = vld [vmem:[%s8917_s2] ss:$0 sm:$0xff] }
 0x1bd   : > { %v7955_v28 = vsel %vm1888_vm5, %v2282_v12, %v7950_v45  ;;  %v7397_v29 = vld [vmem:[#allocation2 + $0x94] sm:$0xfc]  }
 0x1be   : > { %1189 = vst.msk [vmem:[#allocation2 + $0xa0] sm:$0xf] %vm1148_vm0, %v6350_v22  ;;  %v6351_v8 = vpack.c.bf16 %v913_v55, %v913_v55  ;;  %v7959_v60 = vor.u32 %v3803_v32, %v3800_v31  ;;  %v2424_v17 = vshrl.u32 %v7397_v29, 16  ;;  %v2427_v46 = vshll.u32 %v7397_v29, 16 }
 0x1bf   : > { %v1745_v4 = vrot.slane %v7397_v29, 2 }
 0x1c0   : > { %1190 = vst.msk [vmem:[#allocation2 + $0xa4] sm:$0xf] %vm1148_vm0, %v6351_v8  ;;  %v7969_v63 = vsel %vm3334_vm1, %v3795_v51, %v7959_v60  ;;  %v2426_v12 = vrot.slane %v2424_v17, 2  ;;  %v2429_v20 = vrot.slane %v2427_v46, 3  ;;  %vm5560_vm1 = vsmask.f32 3328 }
 0x1c1   : > { %v917_v36 = vpop.f32.mrb[84].mxu0 }
 0x1c2   : > { %v918_v39 = vadd.f32 %v7964_v7, %v917_v36  ;;  %v919_v33 = vpop.f32.mrb[85].mxu0 }
 0x1c3   : > { %v920_v41 = vpop.f32.mrb[86].mxu0 }
 0x1c4   : > { %v6352_v52 = vpack.c.bf16 %v918_v39, %v918_v39  ;;  %v921_v53 = vadd.f32 %v7964_v7, %v920_v41  ;;  %v922_v54 = vpop.f32.mrb[87].mxu0  ;;  %v2430_v39 = vor.u32 %v2429_v20, %v2426_v12 }
 0x1c5   : > { %v7398_v56 = vld [vmem:[#allocation2 + $0x9c] sm:$0xff]  }
 0x1c6   : > { %1191 = vst.msk [vmem:[#allocation2 + $0xa8] sm:$0xf] %vm1148_vm0, %v6352_v52  ;;  %v6353_v2 = vpack.c.bf16 %v921_v53, %v921_v53  ;;  %v1746_v19 = vrot.slane %v7398_v56, 2  ;;  %v2432_v21 = vshrl.u32 %v7398_v56, 16  ;;  %v2435_v22 = vshll.u32 %v7398_v56, 16 }
 0x1c8   : > { %1192 = vst.msk [vmem:[#allocation2 + $0xac] sm:$0xf] %vm1148_vm0, %v6353_v2  ;;  %v1747_v55 = vsel %vm1263_vm2, %v1745_v4, %v1746_v19  ;;  %v2434_v23 = vrot.slane %v2432_v21, 2  ;;  %v2437_v8 = vrot.slane %v2435_v22, 3  ;;  %v7404_v4 = vld [vmem:[%s8918_s3 + $0x48] sm:$0xff]  }
 0x1c9   : > { %v925_v51 = vpop.f32.mrb[88].mxu0  ;;  %6629 = vmatprep.mubr.msk.bf16.mxu1 %vm1287_vm3, %v1747_v55 }
 0x1ca   : > { %v926_v31 = vadd.f32 %v7964_v7, %v925_v51  ;;  %v927_v32 = vpop.f32.mrb[89].mxu0  ;;  %v2438_v29 = vor.u32 %v2437_v8, %v2434_v23 }
 0x1cb   : > { %v928_v36 = vpop.f32.mrb[90].mxu0 }
 0x1cc   : > { %v6354_v33 = vpack.c.bf16 %v926_v31, %v926_v31  ;;  %v929_v17 = vadd.f32 %v7964_v7, %v928_v36  ;;  %v930_v41 = vpop.f32.mrb[91].mxu0  ;;  %v7979_v52 = vsel %vm2063_vm4, %v2430_v39, %v2438_v29 }
 0x1cd   : > { %v7400_v46 = vld [vmem:[#allocation2 + $0xa4] sm:$0xff]  }
 0x1ce   : > { %1193 = vst.msk [vmem:[#allocation2 + $0xb0] sm:$0xf] %vm1148_vm0, %v6354_v33  ;;  %v6355_v53 = vpack.c.bf16 %v929_v17, %v929_v17  ;;  %v1748_v54 = vrot.slane %v7400_v46, 2  ;;  %v2441_v56 = vshrl.u32 %v7400_v46, 16  ;;  %v2444_v2 = vshll.u32 %v7400_v46, 16 }
 0x1d0   : > { %1194 = vst.msk [vmem:[#allocation2 + $0xb4] sm:$0xf] %vm1148_vm0, %v6355_v53  ;;  %v1749_v20 = vsel %vm1263_vm2, %v1746_v19, %v1748_v54  ;;  %v2443_v21 = vrot.slane %v2441_v56, 2  ;;  %v2446_v22 = vrot.slane %v2444_v2, 3  ;;  %v7994_v19 = vld [vmem:[%s8918_s3 + $0x50] sm:$0xff]  }
 0x1d1   : > { %v933_v12 = vpop.f32.mrb[92].mxu0  ;;  %6630 = vmatmul.mubr.msk.bf16.vlgmr.msra.gmra.mrb[0].mxu1 %vm1287_vm3, %v1749_v20 }
 0x1d2   : > { %v934_v51 = vadd.f32 %v7964_v7, %v933_v12  ;;  %v935_v55 = vpop.f32.mrb[93].mxu0  ;;  %6642 = vmatpush3.bf16.msra.mxu1 %v7906_v34  ;;  %v2447_v8 = vor.u32 %v2446_v22, %v2443_v21 }
 0x1d3   : > { %v936_v23 = vpop.f32.mrb[94].mxu0  ;;  %6643 = vmatprep.subr.bf16.mxu1 %v7404_v4 }
 0x1d4   : > { %v6356_v31 = vpack.c.bf16 %v934_v51, %v934_v51  ;;  %v937_v32 = vadd.f32 %v7964_v7, %v936_v23  ;;  %v938_v36 = vpop.f32.mrb[95].mxu0  ;;  %v7997_v33 = vsel %vm2063_vm4, %v2438_v29, %v2447_v8 }
 0x1d5   : > { %v7401_v39 = vld [vmem:[#allocation2 + $0xac] sm:$0xff]  }
 0x1d6   : > { %1195 = vst.msk [vmem:[#allocation2 + $0xb8] sm:$0xf] %vm1148_vm0, %v6356_v31  ;;  %v6357_v17 = vpack.c.bf16 %v937_v32, %v937_v32  ;;  %v1750_v41 = vrot.slane %v7401_v39, 2  ;;  %6644 = vmatpush3.bf16.msra.mxu1 %v7404_v4  ;;  %v2450_v34 = vshrl.u32 %v7401_v39, 16  ;;  %v2453_v46 = vshll.u32 %v7401_v39, 16 }
 0x1d7   : > { %6657 = vmatprep.subr.bf16.mxu1 %v7994_v19 }
 0x1d8   : > { %1196 = vst.msk [vmem:[#allocation2 + $0xbc] sm:$0xf] %vm1148_vm0, %v6357_v17  ;;  %v1751_v56 = vsel %vm1263_vm2, %v1748_v54, %v1750_v41  ;;  %v2452_v2 = vrot.slane %v2450_v34, 2  ;;  %v2455_v12 = vrot.slane %v2453_v46, 3  ;;  %v1891_v17 = vshll.u32 %v7816_v43, 16 }
 0x1d9   : > { %v941_v53 = vpop.f32.mrb[96].mxu0  ;;  %6633 = vmatprep.mubr.msk.bf16.mxu1 %vm1287_vm3, %v1751_v56 }
 0x1da   : > { %v942_v20 = vadd.f32 %v7964_v7, %v941_v53  ;;  %v943_v29 = vpop.f32.mrb[97].mxu0  ;;  %v2456_v22 = vor.u32 %v2455_v12, %v2452_v2  ;;  %v1893_v56 = vrot.slane %v1891_v17, 1 }
 0x1db   : > { %v944_v21 = vpop.f32.mrb[98].mxu0 }
 0x1dc   : > { %v6358_v51 = vpack.c.bf16 %v942_v20, %v942_v20  ;;  %v945_v4 = vadd.f32 %v7964_v7, %v944_v21  ;;  %v946_v55 = vpop.f32.mrb[99].mxu0  ;;  %v8007_v31 = vsel %vm2063_vm4, %v2447_v8, %v2456_v22  ;;  %v1895_v8 = vshll.u32 %v7831_v57, 16 }
 0x1dd   : > { %v7403_v23 = vld [vmem:[#allocation2 + $0xb4] sm:$0xff]  }
 0x1de   : > { %1197 = vst.msk [vmem:[#allocation2 + $0xc0] sm:$0xf] %vm1148_vm0, %v6358_v51  ;;  %v6359_v54 = vpack.c.bf16 %v945_v4, %v945_v4  ;;  %v1752_v32 = vrot.slane %v7403_v23, 2  ;;  %v2459_v36 = vshrl.u32 %v7403_v23, 16  ;;  %v2462_v39 = vshll.u32 %v7403_v23, 16 }
 0x1df   : > { %v1708_v2 = vld [vmem:[#allocation2 + $0xbc] sm:$0xf]  ;;  %v1889_v4 = vshrl.u32 %v7816_v43, 16 }
 0x1e0   : > { %1198 = vst.msk [vmem:[#allocation2 + $0xc4] sm:$0xf] %vm1148_vm0, %v6359_v54  ;;  %v1753_v34 = vsel %vm1263_vm2, %v1750_v41, %v1752_v32  ;;  %v2461_v46 = vrot.slane %v2459_v36, 2  ;;  %v2464_v53 = vrot.slane %v2462_v39, 3  ;;  %v1897_v41 = vrot.slane %v1895_v8, 1 }
 0x1e1   : > { %6634 = vmatmul.mubr.msk.bf16.gmra.mrb[4].mxu1 %vm1287_vm3, %v1753_v34  ;;  %v1894_v36 = vor.u32 %v1893_v56, %v1889_v4  ;;  %v1902_v39 = vshll.u32 %v7833_v58, 16  ;;  %v1879_v8 = vld [vmem:[#allocation2 + $0x2c] sm:$0x3]  ;;  %vm5559_vm0 = vcmask 519168  }
 0x1e2   : > { %v2465_v7 = vor.u32 %v2464_v53, %v2461_v46  ;;  %v1909_v53 = vshll.u32 %v7854_v14, 16 }
 0x1e3   : > { %v1904_v56 = vrot.slane %v1902_v39, 1 }
 0x1e4   : > { %v8016_v29 = vsel %vm2063_vm4, %v2456_v22, %v2465_v7  ;;  %v1898_v22 = vsel %vm1888_vm5, %v1894_v36, %v1897_v41  ;;  %v1920_v36 = vshrl.u32 %v7857_v16, 16 }
 0x1e5   : > { %v1709_v12 = vld [vmem:[#allocation2 + $0xc0] sm:$0x7] }
 0x1e6   : > { %v2414_v20 = vld [vmem:[#allocation2 + $0xc0] sm:$0xf]  ;;  %v5955_v21 = vcombine.low %v1708_v2, %v1709_v12  ;;  %v5968_v12 = vcombine.low %v7872_v37, %v1879_v8 }
 0x1e7   : > { %v6007_v51 = vcombine.low %v1708_v2, %v2414_v20  ;;  %v1906_v20 = vshrl.u32 %v7833_v58, 16  ;;  %v7409_v37 = vld [vmem:[%s8918_s3 + $0x60] sm:$0xff]  }
 0x1e8   : > { %v1754_v55 = vrot.slane %v5955_v21, 2  ;;  %v1911_v21 = vrot.slane %v1909_v53, 1 }
 0x1e9   : > { %v2468_v23 = vshrl.u32 %v6007_v51, 16  ;;  %v2471_v54 = vshll.u32 %v6007_v51, 16  ;;  %v1908_v4 = vor.u32 %v1906_v20, %v1904_v56 }
 0x1ea   : > { %v1755_v17 = vsel %vm1263_vm2, %v1752_v32, %v1754_v55  ;;  %v1899_v32 = vshrl.u32 %v7831_v57, 16  ;;  %v1924_v57 = vshll.u32 %v5968_v12, 16 }
 0x1eb   : > { %v2470_v34 = vrot.slane %v2468_v23, 2  ;;  %v2473_v46 = vrot.slane %v2471_v54, 3  ;;  %6637 = vmatprep.mubr.msk.bf16.mxu1 %vm1287_vm3, %v1755_v17  ;;  %v7408_v23 = vld [vmem:[%s8918_s3 + $0x58] sm:$0xff]  }
 0x1ec   : > { %6638 = vmatmul.mubr.msk.bf16.gmra.mrb[8].mxu1 %vm1287_vm3, %v1754_v55  ;;  %v1901_v51 = vor.u32 %v1899_v32, %v1897_v41  ;;  %v1916_v55 = vshll.u32 %v7857_v16, 16  ;;  %v1913_v41 = vshrl.u32 %v7854_v14, 16  ;;  %v1926_v39 = vrot.slane %v1924_v57, 1  ;;  %v7410_v14 = vld [vmem:[%s8918_s3 + $0x68] sm:$0xff]   ;;  %v7411_v16 = vld [vmem:[%s8918_s3 + $0x70] sm:$0xff]   ;;  %v7426_v32 = vld [vmem:[%s8918_s3 + $0xa0] sm:$0xff]  }
 0x1ed   : > { %v8025_v43 = vor.u32 %v2473_v46, %v2470_v34  ;;  %6645 = vmatprep.mubr.msk.bf16.mxu1 %vm1287_vm3, %v1898_v22  ;;  %v1928_v22 = vshrl.u32 %v5968_v12, 16  ;;  %v7511_v12 = vld [vmem:[#allocation2 + $0x24] sm:$0xff]  }
 0x1ee   : > { %v1905_v54 = vsel %vm1888_vm5, %v1901_v51, %v1904_v56  ;;  %v1918_v58 = vrot.slane %v1916_v55, 1  ;;  %v1915_v17 = vor.u32 %v1913_v41, %v1911_v21  ;;  %v2654_v20 = vrot.slane %v7511_v12, 1  ;;  %v7425_v55 = vld [vmem:[#allocation2 + $0x3c] sm:$0xff]   ;;  %v7427_v57 = vld [vmem:[#allocation2 + $0x44] sm:$0xff]  }
 0x1ef   : > { %v8030_v2 = vsel %vm2063_vm4, %v2465_v7, %v8025_v43  ;;  %v1912_v7 = vsel %vm1888_vm5, %v1908_v4, %v1911_v21  ;;  %v1930_v53 = vor.u32 %v1928_v22, %v1926_v39  ;;  %v2832_v41 = vrot.slane %v7427_v57, 3  ;;  %v7434_v22 = vld [vmem:[%s8918_s3 + $0xb0] sm:$0xff]  }
 0x1f0   : > { %v1922_v34 = vor.u32 %v1920_v36, %v1918_v58  ;;  %v1919_v46 = vsel %vm1888_vm5, %v1915_v17, %v1918_v58 }
 0x1f4   : > { %6646 = vmatmul.mubr.msk.bf16.vlgmr.msra.gmra.mrb[0].mxu1 %vm1287_vm3, %v1905_v54  ;;  %v2830_v54 = vrot.slane %v7425_v55, 3 }
 0x1f5   : > { %6658 = vmatpush3.bf16.msra.mxu1 %v7994_v19  ;;  %6649 = vmatprep.mubr.msk.bf16.mxu1 %vm1287_vm3, %v1912_v7  ;;  %v1927_v19 = vsel %vm1888_vm5, %v1922_v34, %v1926_v39  ;;  %v7431_v39 = vld [vmem:[%s8918_s3 + $0xa8] sm:$0xff]   ;;  %v7429_v34 = vld [vmem:[#allocation2 + $0x54] sm:$0xff]  }
 0x1f6   : > { %6659 = vmatprep.subr.bf16.mxu1 %v7408_v23  ;;  %v2833_v17 = vsel %vm2828_vm7, %v2830_v54, %v2832_v41 }
 0x1f9   : > { %6660 = vmatpush3.bf16.msra.mxu1 %v7408_v23  ;;  %v7424_v23 = vld [vmem:[#allocation2 + $0x34] sm:$0xf8]  }
 0x1fa   : > { %6673 = vmatprep.subr.bf16.mxu1 %v7409_v37  ;;  %v2829_v7 = vrot.slane %v7424_v23, 3  ;;  %v7447_v23 = vld [vmem:[#allocation2 + $0xc0] sm:$0xff]  }
 0x1fb   : > { %v3200_v57 = vrot.slane %v7447_v23, 3  ;;  %v7463_v23 = vld [vmem:[#allocation2 + $0xa0] sm:$0xff]  }
 0x1fc   : > { %6650 = vmatmul.mubr.msk.bf16.gmra.mrb[4].mxu1 %vm1287_vm3, %v1919_v46  ;;  %v2831_v58 = vsel %vm2828_vm7, %v2829_v7, %v2830_v54  ;;  %v7449_v54 = vld [vmem:[%s8918_s3 + $0xd0] sm:$0xff]  }
 0x1fd   : > { %6653 = vmatprep.mubr.msk.bf16.mxu1 %vm1287_vm3, %v1927_v19  ;;  %v7430_v19 = vld [vmem:[#allocation2 + $0x5c] sm:$0xff]  }
 0x204   : > { %6654 = vmatmul.mubr.msk.bf16.gmra.mrb[8].mxu1 %vm1287_vm3, %v1930_v53  ;;  %v2836_v53 = vrot.slane %v7429_v34, 3 }
 0x205   : > { %6661 = vmatprep.mubr.msk.bf16.mxu1 %vm1287_vm3, %v7772_v27  ;;  %v7412_v27 = vld [vmem:[%s8918_s3 + $0x78] sm:$0xff]  }
 0x20c   : > { %6662 = vmatmul.mubr.msk.bf16.vlgmr.msra.gmra.mrb[0].mxu1 %vm1287_vm3, %v7790_v48  ;;  %v7413_v48 = vld [vmem:[%s8918_s3 + $0x80] sm:$0xff]  }
 0x20d   : > { %6674 = vmatpush3.bf16.msra.mxu1 %v7409_v37  ;;  %6665 = vmatprep.mubr.msk.bf16.mxu1 %vm1287_vm3, %v7800_v3  ;;  %v2288_v3 = vshrl.u32 %v7938_v42, 16  ;;  %v7428_v37 = vld [vmem:[#allocation2 + $0x4c] sm:$0xff]  }
 0x20e   : > { %6675 = vmatprep.subr.bf16.mxu1 %v7410_v14  ;;  %v2834_v36 = vrot.slane %v7428_v37, 3 }
 0x210   : > { %v2835_v46 = vsel %vm2828_vm7, %v2832_v41, %v2834_v36  ;;  %v7450_v41 = vld [vmem:[%s8918_s3 + $0xd8] sm:$0xff]  }
 0x211   : > { %6676 = vmatpush3.bf16.msra.mxu1 %v7410_v14  ;;  %v2838_v14 = vrot.slane %v7430_v19, 3 }
 0x212   : > { %6689 = vmatprep.subr.bf16.mxu1 %v7411_v16 }
 0x214   : > { %6666 = vmatmul.mubr.msk.bf16.gmra.mrb[4].mxu1 %vm1287_vm3, %v7809_v26  ;;  %v2290_v26 = vor.u32 %v2288_v3, %v7950_v45  ;;  %v7508_v45 = vld [vmem:[#allocation2 + $0x14] sm:$0xff]   ;;  %v3010_v3 = vrot.slane %v7851_v10, 1 }
 0x215   : > { %6669 = vmatprep.mubr.msk.bf16.mxu1 %vm1287_vm3, %v7827_v6  ;;  %v7417_v6 = vld [vmem:[%s8918_s3 + $0x90] sm:$0xff]  }
 0x21c   : > { %6670 = vmatmul.mubr.msk.bf16.gmra.mrb[8].mxu1 %vm1287_vm3, %v7822_v49  ;;  %v7414_v49 = vld [vmem:[%s8918_s3 + $0x88] sm:$0xff]  }
 0x21d   : > { %6677 = vmatprep.mubr.msk.bf16.mxu1 %vm1287_vm3, %v7875_v38  ;;  %v7506_v38 = vld [vmem:[#allocation2 + $0xc] sm:$0xff]  }
 0x224   : > { %6678 = vmatmul.mubr.msk.bf16.vlgmr.msra.gmra.mrb[0].mxu1 %vm1287_vm3, %v7892_v18  ;;  %v2648_v18 = vrot.slane %v7506_v38, 1  ;;  %v2974_v38 = vld [vmem:[#allocation2 + $0x94] sm:$0x3] }
 0x225   : > { %6690 = vmatpush3.bf16.msra.mxu1 %v7411_v16  ;;  %6681 = vmatprep.mubr.msk.bf16.mxu1 %vm1287_vm3, %v7917_v50  ;;  %v7507_v50 = vld [vmem:[#allocation2 + $0x4] sm:$0xfe]   ;;  %v2837_v16 = vsel %vm2828_vm7, %v2834_v36, %v2836_v53  ;;  %v7452_v36 = vld [vmem:[#allocation2 + $0x3c] sm:$0xff]  }
 0x226   : > { %6691 = vmatprep.subr.bf16.mxu1 %v7412_v27  ;;  %v3572_v34 = vshrl.u32 %v7452_v36, 16 }
 0x229   : > { %6692 = vmatpush3.bf16.msra.mxu1 %v7412_v27  ;;  %v2839_v27 = vsel %vm2828_vm7, %v2836_v53, %v2838_v14 }
 0x22a   : > { %6705 = vmatprep.subr.bf16.mxu1 %v7413_v48 }
 0x22c   : > { %6682 = vmatmul.mubr.msk.bf16.gmra.mrb[4].mxu1 %vm1287_vm3, %v7934_v25  ;;  %v2647_v25 = vrot.slane %v7507_v50, 1 }
 0x22d   : > { %6685 = vmatprep.mubr.msk.bf16.mxu1 %vm1287_vm3, %v7955_v28  ;;  %v2650_v28 = vrot.slane %v7508_v45, 1 }
 0x22e   : > { %v2649_v42 = vsel %vm2646_vm6, %v2647_v25, %v2648_v18 }
 0x22f   : > { %v2651_v8 = vsel %vm2646_vm6, %v2648_v18, %v2650_v28  ;;  %v7440_v18 = vld [vmem:[%s8918_s3 + $0xb8] sm:$0xff]  }
 0x234   : > { %6686 = vmatmul.mubr.msk.bf16.gmra.mrb[8].mxu1 %vm1287_vm3, %v2290_v26 }
 0x235   : > { %6693 = vmatprep.mubr.msk.bf16.mxu1 %vm1287_vm3, %v7979_v52  ;;  %v7509_v52 = vld [vmem:[#allocation2 + $0x1c] sm:$0xff]  }
 0x23c   : > { %6694 = vmatmul.mubr.msk.bf16.vlgmr.msra.gmra.mrb[0].mxu1 %vm1287_vm3, %v7997_v33  ;;  %v2652_v33 = vrot.slane %v7509_v52, 1  ;;  %v7521_v52 = vmov 0.0  }
 0x23d   : > { %6706 = vmatpush3.bf16.msra.mxu1 %v7413_v48  ;;  %6697 = vmatprep.mubr.msk.bf16.mxu1 %vm1287_vm3, %v8007_v31  ;;  %v2610_v31 = vld [vmem:[#allocation2 + $0x30] sm:$0x3]  ;;  %v3011_v48 = vrot.slane %v7867_v24, 1  ;;  %v6061_v24 = vcombine.low %v7940_v44, %v2974_v38  ;;  %v7442_v44 = vld [vmem:[#allocation2 + $0xa0] sm:$0xff]  }
 0x23e   : > { %6707 = vmatprep.subr.bf16.mxu1 %v7414_v49  ;;  %v2653_v56 = vsel %vm2646_vm6, %v2650_v28, %v2652_v33  ;;  %v2655_v51 = vsel %vm2646_vm6, %v2652_v33, %v2654_v20  ;;  %v7469_v28 = vld [vmem:[%s8920_s5 + $0x20] sm:$0xff]   ;;  %6833 = vmatprep.subr.bf16.mxu0 %v7521_v52  ;;  %v7470_v33 = vld [vmem:[%s8920_s5 + $0x28] sm:$0xff]  }
 0x23f   : > { %v3012_v26 = vsel %vm2646_vm6, %v3010_v3, %v3011_v48  ;;  %v3019_v25 = vrot.slane %v6061_v24, 1  ;;  %6834 = vmatpush3.bf16.msra.mxu0 %v7469_v28  ;;  %v7458_v28 = vld [vmem:[%s8918_s3 + $0xe8] sm:$0xff]   ;;  %6841 = vmatprep.mubr.msk.bf16.mxu0 %vm7522_vm9, %v7521_v52 }
 0x240   : > { %6835 = vmatprep.subr.bf16.mxu0 %v7521_v52 }
 0x241   : > { %6708 = vmatpush3.bf16.msra.mxu1 %v7414_v49  ;;  %v3013_v49 = vrot.slane %v7883_v62, 1  ;;  %v7443_v62 = vld [vmem:[%s8918_s3 + $0xc0] sm:$0xff]  }
 0x242   : > { %6721 = vmatprep.subr.bf16.mxu1 %v7417_v6 }
 0x243   : > { %v3014_v50 = vsel %vm2646_vm6, %v3011_v48, %v3013_v49  ;;  %6836 = vmatpush3.bf16.msra.mxu0 %v7470_v33 }
 0x244   : > { %6698 = vmatmul.mubr.msk.bf16.gmra.mrb[4].mxu1 %vm1287_vm3, %v8016_v29  ;;  %v7423_v29 = vld [vmem:[%s8918_s3 + $0x98] sm:$0xff]   ;;  %6837 = vmatprep.subr.bf16.mxu0 %v7521_v52 }
 0x245   : > { %6701 = vmatprep.mubr.msk.bf16.mxu1 %vm1287_vm3, %v8030_v2 }
 0x24c   : > { %6702 = vmatmul.mubr.msk.bf16.gmra.mrb[8].mxu1 %vm1287_vm3, %v8025_v43  ;;  %v7510_v43 = vld [vmem:[#allocation2 + $0x2c] sm:$0xf] }
 0x24d   : > { %6709 = vmatprep.mubr.msk.bf16.mxu1 %vm1287_vm3, %v2649_v42  ;;  %v6025_v2 = vcombine.low %v7510_v43, %v2610_v31  ;;  %v3192_v31 = vrot.slane %v7442_v44, 3 }
 0x24f   : > { %v2656_v21 = vrot.slane %v6025_v2, 1  ;;  %v7445_v2 = vld [vmem:[#allocation2 + $0xb0] sm:$0xff]  }
 0x251   : > { %v2657_v4 = vsel %vm2646_vm6, %v2654_v20, %v2656_v21  ;;  %v3196_v20 = vrot.slane %v7445_v2, 3  ;;  %v7459_v2 = vld [vmem:[#allocation2 + $0x64] ss:$0 sps:$4 sm:$0x11]  }
 0x254   : > { %6710 = vmatmul.mubr.msk.bf16.vlgmr.msra.gmra.mrb[0].mxu1 %vm1287_vm3, %v2651_v8  ;;  %v7471_v8 = vld [vmem:[%s8920_s5 + $0x30] sm:$0xff]  }
 0x255   : > { %6722 = vmatpush3.bf16.msra.mxu1 %v7417_v6  ;;  %6713 = vmatprep.mubr.msk.bf16.mxu1 %vm1287_vm3, %v2653_v56  ;;  %v3015_v6 = vrot.slane %v7908_v35, 1  ;;  %v3017_v35 = vrot.slane %v7925_v11, 1  ;;  %v7441_v11 = vld [vmem:[#allocation2 + $0x98] sm:$0xf8]   ;;  %v7444_v56 = vld [vmem:[#allocation2 + $0xa8] sm:$0xff]  }
 0x256   : > { %6723 = vmatprep.subr.bf16.mxu1 %v7423_v29  ;;  %6838 = vmatpush3.bf16.msra.mxu0 %v7471_v8  ;;  %v3194_v12 = vrot.slane %v7444_v56, 3  ;;  %v7460_v56 = vld [vmem:[%s8918_s3 + $0xf0] sm:$0xff]  }
 0x257   : > { %v3016_v10 = vsel %vm2646_vm6, %v3013_v49, %v3015_v6  ;;  %v3018_v42 = vsel %vm2646_vm6, %v3015_v6, %v3017_v35  ;;  %v3020_v45 = vsel %vm2646_vm6, %v3017_v35, %v3019_v25  ;;  %6839 = vmatprep.subr.bf16.mxu0 %v7521_v52 }
 0x258   : > { %v3197_v55 = vsel %vm2828_vm7, %v3194_v12, %v3196_v20 }
 0x259   : > { %6724 = vmatpush3.bf16.msra.mxu1 %v7423_v29  ;;  %v3191_v29 = vrot.slane %v7441_v11, 3 }
 0x25a   : > { %6737 = vmatprep.subr.bf16.mxu1 %v7426_v32 }
 0x25b   : > { %v3193_v43 = vsel %vm2828_vm7, %v3191_v29, %v3192_v31 }
 0x25c   : > { %6714 = vmatmul.mubr.msk.bf16.gmra.mrb[4].mxu1 %vm1287_vm3, %v2655_v51  ;;  %v3195_v51 = vsel %vm2828_vm7, %v3192_v31, %v3194_v12 }
 0x25d   : > { %6717 = vmatprep.mubr.msk.bf16.mxu1 %vm1287_vm3, %v2657_v4  ;;  %v7446_v4 = vld [vmem:[#allocation2 + $0xb8] sm:$0xff]  }
 0x25e   : > { %v3198_v7 = vrot.slane %v7446_v4, 3 }
 0x260   : > { %v3201_v37 = vsel %vm2828_vm7, %v3198_v7, %v3200_v57 }
 0x264   : > { %6718 = vmatmul.mubr.msk.bf16.gmra.mrb[8].mxu1 %vm1287_vm3, %v2656_v21  ;;  %v7448_v21 = vld [vmem:[%s8918_s3 + $0xc8] sm:$0xff]  }
 0x265   : > { %6725 = vmatprep.mubr.msk.bf16.mxu1 %vm1287_vm3, %v2831_v58  ;;  %v3199_v58 = vsel %vm2828_vm7, %v3196_v20, %v3198_v7  ;;  %v3617_v20 = vshll.u32 %v7459_v2, 16  ;;  %v3989_v7 = vshrl.u32 %v7463_v23, 16 }
 0x26c   : > { %6726 = vmatmul.mubr.msk.bf16.vlgmr.msra.gmra.mrb[0].mxu1 %vm1287_vm3, %v2833_v17  ;;  %v7453_v17 = vld [vmem:[%s8918_s3 + $0xe0] sm:$0xff]  }
 0x26d   : > { %6738 = vmatpush3.bf16.msra.mxu1 %v7426_v32  ;;  %6729 = vmatprep.mubr.msk.bf16.mxu1 %vm1287_vm3, %v2835_v46  ;;  %v7472_v32 = vld [vmem:[%s8920_s5 + $0x38] sm:$0xff]  }
 0x26e   : > { %6739 = vmatprep.subr.bf16.mxu1 %v7431_v39  ;;  %6840 = vmatpush3.bf16.msra.mxu0 %v7472_v32 }
 0x26f   : > { %6861 = vmatprep.subr.bf16.mxu0 %v7521_v52 }
 0x271   : > { %6740 = vmatpush3.bf16.msra.mxu1 %v7431_v39  ;;  %v7451_v39 = vld [vmem:[#allocation2 + $0x34] sm:$0xf8]  }
 0x272   : > { %6753 = vmatprep.subr.bf16.mxu1 %v7434_v22  ;;  %v3564_v46 = vshrl.u32 %v7451_v39, 16  ;;  %v3567_v19 = vshll.u32 %v7451_v39, 16 }
 0x274   : > { %6730 = vmatmul.mubr.msk.bf16.gmra.mrb[4].mxu1 %vm1287_vm3, %v2837_v16  ;;  %v3569_v16 = vrot.slane %v3567_v19, 4 }
 0x275   : > { %6733 = vmatprep.mubr.msk.bf16.mxu1 %vm1287_vm3, %v2839_v27 }
 0x27c   : > { %6734 = vmatmul.mubr.msk.bf16.gmra.mrb[8].mxu1 %vm1287_vm3, %v2838_v14  ;;  %v7455_v14 = vld [vmem:[#allocation2 + $0x4c] sm:$0xff]  }
 0x27d   : > { %6741 = vmatprep.mubr.msk.bf16.mxu1 %vm1287_vm3, %v3012_v26  ;;  %v3590_v26 = vshrl.u32 %v7455_v14, 16  ;;  %v3593_v49 = vshll.u32 %v7455_v14, 16  ;;  %v7466_v14 = vld [vmem:[#allocation2 + $0xb8] sm:$0xff]  }
 0x27f   : > { %v3595_v24 = vrot.slane %v3593_v49, 4 }
 0x284   : > { %6742 = vmatmul.mubr.msk.bf16.vlgmr.msra.gmra.mrb[0].mxu1 %vm1287_vm3, %v3014_v50  ;;  %v7456_v50 = vld [vmem:[#allocation2 + $0x54] sm:$0xff]  }
 0x285   : > { %6754 = vmatpush3.bf16.msra.mxu1 %v7434_v22  ;;  %6745 = vmatprep.mubr.msk.bf16.mxu1 %vm1287_vm3, %v3016_v10  ;;  %v7454_v22 = vld [vmem:[#allocation2 + $0x44] sm:$0xff]   ;;  %v3592_v10 = vrot.slane %v3590_v26, 3  ;;  %v3599_v35 = vshrl.u32 %v7456_v50, 16 }
 0x286   : > { %6755 = vmatprep.subr.bf16.mxu1 %v7440_v18  ;;  %v3581_v27 = vshrl.u32 %v7454_v22, 16  ;;  %v3584_v48 = vshll.u32 %v7454_v22, 16 }
 0x288   : > { %v3583_v38 = vrot.slane %v3581_v27, 3  ;;  %v7467_v27 = vld [vmem:[#allocation2 + $0xc0] sm:$0xff]  }
 0x289   : > { %6756 = vmatpush3.bf16.msra.mxu1 %v7440_v18  ;;  %v3586_v18 = vrot.slane %v3584_v48, 4  ;;  %v4016_v48 = vshrl.u32 %v7466_v14, 16  ;;  %v4025_v49 = vshrl.u32 %v7467_v27, 16 }
 0x28a   : > { %6769 = vmatprep.subr.bf16.mxu1 %v7443_v62 }
 0x28c   : > { %6746 = vmatmul.mubr.msk.bf16.gmra.mrb[4].mxu1 %vm1287_vm3, %v3018_v42  ;;  %v3596_v42 = vor.u32 %v3595_v24, %v3592_v10 }
 0x28d   : > { %6749 = vmatprep.mubr.msk.bf16.mxu1 %vm1287_vm3, %v3020_v45 }
 0x294   : > { %6750 = vmatmul.mubr.msk.bf16.gmra.mrb[8].mxu1 %vm1287_vm3, %v3019_v25  ;;  %v3602_v25 = vshll.u32 %v7456_v50, 16 }
 0x295   : > { %6757 = vmatprep.mubr.msk.bf16.mxu1 %vm1287_vm3, %v3193_v43 }
 0x296   : > { %v3604_v33 = vrot.slane %v3602_v25, 4 }
 0x29c   : > { %6758 = vmatmul.mubr.msk.bf16.vlgmr.msra.gmra.mrb[0].mxu1 %vm1287_vm3, %v3195_v51  ;;  %v3619_v51 = vrot.slane %v3617_v20, 4 }
 0x29d   : > { %6770 = vmatpush3.bf16.msra.mxu1 %v7443_v62  ;;  %6761 = vmatprep.mubr.msk.bf16.mxu1 %vm1287_vm3, %v3197_v55  ;;  %v3587_v62 = vor.u32 %v3586_v18, %v3583_v38  ;;  %v7461_v55 = vld [vmem:[%s8918_s3 + $0xf8] sm:$0xff]   ;;  %v4018_v18 = vrot.slane %v4016_v48, 3 }
 0x29e   : > { %6771 = vmatprep.subr.bf16.mxu1 %v7448_v21 }
 0x29f   : > { %v3597_v31 = vsel %vm3562_vm8, %v3587_v62, %v3596_v42 }
 0x2a1   : > { %6772 = vmatpush3.bf16.msra.mxu1 %v7448_v21 }
 0x2a2   : > { %6785 = vmatprep.subr.bf16.mxu1 %v7449_v54 }
 0x2a4   : > { %6762 = vmatmul.mubr.msk.bf16.gmra.mrb[4].mxu1 %vm1287_vm3, %v3199_v58 }
 0x2a5   : > { %6765 = vmatprep.mubr.msk.bf16.mxu1 %vm1287_vm3, %v3201_v37 }
 0x2ac   : > { %6766 = vmatmul.mubr.msk.bf16.gmra.mrb[8].mxu1 %vm1287_vm3, %v3200_v57  ;;  %v3992_v57 = vshll.u32 %v7463_v23, 16 }
 0x2ad   : > { %6773 = vmatprep.mubr.msk.bf16.mxu1 %vm1287_vm3, %v7732_v61  ;;  %v3575_v61 = vshll.u32 %v7452_v36, 16  ;;  %v7465_v36 = vld [vmem:[#allocation2 + $0xb0] sm:$0xff]  }
 0x2ae   : > { %v4010_v19 = vshll.u32 %v7465_v36, 16 }
 0x2af   : > { %v3577_v53 = vrot.slane %v3575_v61, 4 }
 0x2b4   : > { %6774 = vmatmul.mubr.msk.bf16.vlgmr.msra.gmra.mrb[0].mxu1 %vm1287_vm3, %v7739_v15  ;;  %v3574_v15 = vrot.slane %v3572_v34, 3 }
 0x2b5   : > { %6786 = vmatpush3.bf16.msra.mxu1 %v7449_v54  ;;  %6777 = vmatprep.mubr.msk.bf16.mxu1 %vm1287_vm3, %v7746_v30  ;;  %v3566_v30 = vrot.slane %v3564_v46, 3  ;;  %v7462_v54 = vld [vmem:[#allocation2 + $0x98] sm:$0xf8]   ;;  %v4007_v46 = vshrl.u32 %v7465_v36, 16 }
 0x2b6   : > { %6787 = vmatprep.subr.bf16.mxu1 %v7450_v41  ;;  %v3578_v3 = vor.u32 %v3577_v53, %v3574_v15  ;;  %v3981_v58 = vshrl.u32 %v7462_v54, 16  ;;  %v3984_v37 = vshll.u32 %v7462_v54, 16 }
 0x2b7   : > { %v3570_v6 = vor.u32 %v3569_v16, %v3566_v30  ;;  %v4009_v30 = vrot.slane %v4007_v46, 3  ;;  %v4012_v16 = vrot.slane %v4010_v19, 4 }
 0x2b8   : > { %v3588_v11 = vsel %vm3562_vm8, %v3578_v3, %v3587_v62  ;;  %v3986_v39 = vrot.slane %v3984_v37, 4 }
 0x2b9   : > { %6788 = vmatpush3.bf16.msra.mxu1 %v7450_v41  ;;  %v3991_v41 = vrot.slane %v3989_v7, 3  ;;  %v4013_v26 = vor.u32 %v4012_v16, %v4009_v30 }
 0x2ba   : > { %6801 = vmatprep.subr.bf16.mxu1 %v7453_v17 }
 0x2bc   : > { %6778 = vmatmul.mubr.msk.bf16.gmra.mrb[4].mxu1 %vm1287_vm3, %v7753_v47  ;;  %v3579_v47 = vsel %vm3562_vm8, %v3570_v6, %v3578_v3  ;;  %v4019_v3 = vshll.u32 %v7466_v14, 16  ;;  %v4028_v6 = vshll.u32 %v7467_v27, 16 }
 0x2bd   : > { %6781 = vmatprep.mubr.msk.bf16.mxu1 %vm1287_vm3, %v7764_v5  ;;  %v7457_v5 = vld [vmem:[#allocation2 + $0x5c] sm:$0xff]  }
 0x2be   : > { %v3608_v45 = vshrl.u32 %v7457_v5, 16  ;;  %v3611_v44 = vshll.u32 %v7457_v5, 16  ;;  %v4021_v50 = vrot.slane %v4019_v3, 4  ;;  %v4030_v10 = vrot.slane %v4028_v6, 4 }
 0x2bf   : > { %v7468_v5 = vld [vmem:[#allocation2 + $0xc8] ss:$0 sps:$4 sm:$0x11]  }
 0x2c0   : > { %v3610_v29 = vrot.slane %v3608_v45, 3  ;;  %v3613_v8 = vrot.slane %v3611_v44, 4  ;;  %v4022_v24 = vor.u32 %v4021_v50, %v4018_v18  ;;  %v4034_v25 = vshll.u32 %v7468_v5, 16  ;;  %v7477_v18 = vld [vmem:[%s8920_s5] sm:$0xff]  }
 0x2c2   : > { %v3614_v32 = vor.u32 %v3613_v8, %v3610_v29  ;;  %v4036_v45 = vrot.slane %v4034_v25, 4  ;;  %v6152_v29 = vld [vmem:[%s8919_s4] ss:$0 sm:$0xff] }
 0x2c4   : > { %6782 = vmatmul.mubr.msk.bf16.gmra.mrb[8].mxu1 %vm1287_vm3, %v7759_v0  ;;  %v3601_v0 = vrot.slane %v3599_v35, 3  ;;  %v3620_v4 = vsel %vm3562_vm8, %v3614_v32, %v3619_v51  ;;  %v4023_v35 = vsel %vm3562_vm8, %v4013_v26, %v4022_v24 }
 0x2c5   : > { %6789 = vmatprep.mubr.msk.bf16.mxu1 %vm1287_vm3, %v3579_v47  ;;  %v4027_v47 = vrot.slane %v4025_v49, 3 }
 0x2c6   : > { %v3605_v43 = vor.u32 %v3604_v33, %v3601_v0  ;;  %v7475_v0 = vld [vmem:[%s8920_s5 + $0x90] sm:$0xff]   ;;  %v7476_v33 = vld [vmem:[%s8920_s5 + $0x98] sm:$0xff]  }
 0x2c7   : > { %v4031_v62 = vor.u32 %v4030_v10, %v4027_v47 }
 0x2c8   : > { %v3606_v12 = vsel %vm3562_vm8, %v3596_v42, %v3605_v43  ;;  %v3615_v21 = vsel %vm3562_vm8, %v3605_v43, %v3614_v32 }
 0x2c9   : > { %v4032_v42 = vsel %vm3562_vm8, %v4022_v24, %v4031_v62  ;;  %v4037_v44 = vsel %vm3562_vm8, %v4031_v62, %v4036_v45  ;;  %v7480_v62 = vld [vmem:[%s8920_s5 + $0xc0] sm:$0xff]   ;;  %v7478_v45 = vld [vmem:[%s8920_s5 + $0x8] sm:$0xff]  }
 0x2cc   : > { %6790 = vmatmul.mubr.msk.bf16.vlgmr.msra.gmra.mrb[0].mxu1 %vm1287_vm3, %v3588_v11  ;;  %v7474_v11 = vld [vmem:[%s8920_s5 + $0x88] sm:$0xff]  }
 0x2cd   : > { %6802 = vmatpush3.bf16.msra.mxu1 %v7453_v17  ;;  %6793 = vmatprep.mubr.msk.bf16.mxu1 %vm1287_vm3, %v3597_v31 }
 0x2ce   : > { %6803 = vmatprep.subr.bf16.mxu1 %v7458_v28 }
 0x2d1   : > { %6804 = vmatpush3.bf16.msra.mxu1 %v7458_v28  ;;  %v7473_v28 = vld [vmem:[%s8920_s5 + $0x80] sm:$0xff]  }
 0x2d2   : > { %6817 = vmatprep.subr.bf16.mxu1 %v7460_v56 }
 0x2d4   : > { %6794 = vmatmul.mubr.msk.bf16.gmra.mrb[4].mxu1 %vm1287_vm3, %v3606_v12 }
 0x2d5   : > { %6797 = vmatprep.mubr.msk.bf16.mxu1 %vm1287_vm3, %v3615_v21 }
 0x2dc   : > { %6798 = vmatmul.mubr.msk.bf16.gmra.mrb[8].mxu1 %vm1287_vm3, %v3620_v4 }
 0x2dd   : > { %6805 = vmatprep.mubr.msk.bf16.mxu1 %vm1287_vm3, %v7886_v9  ;;  %v7464_v9 = vld [vmem:[#allocation2 + $0xa8] sm:$0xff]  }
 0x2de   : > { %v3998_v17 = vshrl.u32 %v7464_v9, 16  ;;  %v4001_v34 = vshll.u32 %v7464_v9, 16 }
 0x2e0   : > { %v4000_v15 = vrot.slane %v3998_v17, 3  ;;  %v4003_v53 = vrot.slane %v4001_v34, 4 }
 0x2e4   : > { %6806 = vmatmul.mubr.msk.bf16.vlgmr.msra.gmra.mrb[0].mxu1 %vm1287_vm3, %v7911_v40  ;;  %v3994_v40 = vrot.slane %v3992_v57, 4 }
 0x2e5   : > { %6818 = vmatpush3.bf16.msra.mxu1 %v7460_v56  ;;  %6809 = vmatprep.mubr.msk.bf16.mxu1 %vm1287_vm3, %v7928_v13  ;;  %v3983_v13 = vrot.slane %v3981_v58, 3 }
 0x2e6   : > { %6819 = vmatprep.subr.bf16.mxu1 %v7461_v55  ;;  %v3995_v61 = vor.u32 %v3994_v40, %v3991_v41 }
 0x2e7   : > { %v3987_v22 = vor.u32 %v3986_v39, %v3983_v13 }
 0x2e9   : > { %6820 = vmatpush3.bf16.msra.mxu1 %v7461_v55 }
 0x2ea   : > { %6945 = vmatprep.subr.bf16.mxu1 %v7521_v52 }
 0x2ec   : > { %6810 = vmatmul.mubr.msk.bf16.gmra.mrb[4].mxu1 %vm1287_vm3, %v7947_v59  ;;  %v3996_v59 = vsel %vm3562_vm8, %v3987_v22, %v3995_v61 }
 0x2ed   : > { %6813 = vmatprep.mubr.msk.bf16.mxu1 %vm1287_vm3, %v7969_v63  ;;  %v4004_v63 = vor.u32 %v4003_v53, %v4000_v15 }
 0x2ef   : > { %v4005_v38 = vsel %vm3562_vm8, %v3995_v61, %v4004_v63 }
 0x2f4   : > { %6814 = vmatmul.mubr.msk.bf16.gmra.mrb[8].mxu1 %vm1287_vm3, %v7959_v60  ;;  %v4014_v60 = vsel %vm3562_vm8, %v4004_v63, %v4013_v26 }
 0x2f5   : > { %6821 = vmatprep.mubr.msk.bf16.mxu1 %vm1287_vm3, %v3996_v59 }
 0x2fc   : > { %6822 = vmatmul.mubr.msk.bf16.vlgmr.msra.gmra.mrb[0].mxu1 %vm1287_vm3, %v4005_v38 }
 0x2fd   : > { %6825 = vmatprep.mubr.msk.bf16.mxu1 %vm1287_vm3, %v4014_v60  ;;  %6946 = vmatpush3.bf16.msra.mxu1 %v7473_v28 }
 0x2fe   : > { %6947 = vmatprep.subr.bf16.mxu1 %v7521_v52 }
 0x301   : > { %6948 = vmatpush3.bf16.msra.mxu1 %v7474_v11 }
 0x302   : > { %6949 = vmatprep.subr.bf16.mxu1 %v7521_v52 }
 0x304   : > { %6826 = vmatmul.mubr.msk.bf16.gmra.mrb[4].mxu1 %vm1287_vm3, %v4023_v35 }
 0x305   : > { %6829 = vmatprep.mubr.msk.bf16.mxu1 %vm1287_vm3, %v4032_v42  ;;  %6950 = vmatpush3.bf16.msra.mxu1 %v7475_v0 }
 0x306   : > { %6951 = vmatprep.subr.bf16.mxu1 %v7521_v52 }
 0x309   : > { %6952 = vmatpush3.bf16.msra.mxu1 %v7476_v33 }
 0x30a   : > { %7001 = vmatprep.subr.bf16.mxu1 %v7521_v52 }
 0x30c   : > { %6830 = vmatmul.mubr.msk.bf16.gmra.mrb[8].mxu1 %vm1287_vm3, %v4037_v44  ;;  %vm5589_vm3 = vcmask 519171  }
 0x30d   : > { %6953 = vmatprep.mubr.msk.bf16.mxu1 %vm7522_vm9, %v7521_v52 }
 0x3cf   : > { %v6823_v31 = vpop.f32.mrb[0].mxu1 }
 0x3d0   : > { %v4102_v8 = vpop.f32.mrb[1].mxu1  ;;  %v4170_v43 = vadd.f32 %v6823_v31, %v6152_v29 }
 0x3d1   : > { %v6824_v56 = vpop.f32.mrb[2].mxu1  ;;  %v4168_v12 = vadd.f32 %v6152_v29, %v4102_v8 }
 0x3d2   : > { %v4171_v2 = vadd.f32 %v6824_v56, %v6152_v29  ;;  %v4105_v32 = vpop.f32.mrb[3].mxu1  ;;  %v7481_v56 = vld [vmem:[%s8920_s5 + $0xc8] sm:$0xff]  }
 0x3d3   : > { %v4169_v20 = vadd.f32 %v6152_v29, %v4105_v32 }
 0x3d4   : > { %v4181_v21 = vpack.c.bf16 %v4171_v2, %v4170_v43 }
 0x3d5   : > { %v4180_v51 = vpack.c.bf16 %v4169_v20, %v4168_v12  ;;  %v7479_v12 = vld [vmem:[%s8920_s5 + $0x10] sm:$0xff]  }
 0x3d6   : > { %4188 = vst.msk [vmem:[#allocation3 + $0x8] sm:$0xff] %vm4186_vm11, %v4181_v21 }
 0x3d7   : > { %4187 = vst.msk [vmem:[#allocation3] sm:$0xff] %vm4186_vm11, %v4180_v51  ;;  %v6827_v1 = vpop.f32.mrb[4].mxu1 }
 0x3d8   : > { %v4118_v4 = vpop.f32.mrb[5].mxu1  ;;  %v4174_v23 = vadd.f32 %v6827_v1, %v6152_v29 }
 0x3d9   : > { %v6828_v55 = vpop.f32.mrb[6].mxu1  ;;  %v4172_v57 = vadd.f32 %v6152_v29, %v4118_v4 }
 0x3da   : > { %v4175_v54 = vadd.f32 %v6828_v55, %v6152_v29  ;;  %v4121_v7 = vpop.f32.mrb[7].mxu1 }
 0x3db   : > { %v4173_v58 = vadd.f32 %v6152_v29, %v4121_v7 }
 0x3dc   : > { %v4183_v37 = vpack.c.bf16 %v4175_v54, %v4174_v23  ;;  %v7483_v54 = vld [vmem:[%s8920_s5 + $0xd0] sm:$0xff]  }
 0x3dd   : > { %v4182_v9 = vpack.c.bf16 %v4173_v58, %v4172_v57  ;;  %v8290_v41 = vld [vmem:[#allocation3 + $0x8] sm:$0xff] }
 0x3de   : > { %4190 = vst.msk [vmem:[#allocation3 + $0x18] sm:$0xff] %vm4186_vm11, %v4183_v37  ;;  %v8293_v40 = vld [vmem:[#allocation3] sm:$0xff]  ;;  %v4227_v36 = vshll.u32 %v8290_v41, 16  ;;  %v4788_v39 = vshrl.u32 %v8290_v41, 16  ;;  %v4492_v43 = vrot.slane %v8290_v41, 1 }
 0x3df   : > { %v4763_v13 = vld [vmem:[#allocation3] sm:$0xe0]  ;;  %4189 = vst.msk [vmem:[#allocation3 + $0x10] sm:$0xff] %vm4186_vm11, %v4182_v9  ;;  %v6831_v17 = vpop.f32.mrb[8].mxu1  ;;  %v4222_v34 = vshll.u32 %v8293_v40, 16  ;;  %v4220_v14 = vshrl.u32 %v8293_v40, 16 }
 0x3e0   : > { %v4780_v61 = vshrl.u32 %v4763_v13, 16  ;;  %v4783_v46 = vshll.u32 %v4763_v13, 16  ;;  %v4134_v19 = vpop.f32.mrb[9].mxu1  ;;  %v4790_v22 = vrot.slane %v4788_v39, 5  ;;  %v4793_v15 = vrot.slane %v4227_v36, 6  ;;  %v7482_v13 = vld [vmem:[%s8920_s5 + $0x18] sm:$0xff]  }
 0x3e1   : > { %v6832_v53 = vpop.f32.mrb[10].mxu1  ;;  %v4224_v59 = vrot.slane %v4222_v34, 1  ;;  %v4178_v27 = vadd.f32 %v6831_v17, %v6152_v29  ;;  %v4229_v3 = vrot.slane %v4227_v36, 1  ;;  %v4176_v49 = vadd.f32 %v6152_v29, %v4134_v19 }
 0x3e2   : > { %v4782_v30 = vrot.slane %v4780_v61, 5  ;;  %v4785_v16 = vrot.slane %v4783_v46, 6  ;;  %v4179_v63 = vadd.f32 %v6832_v53, %v6152_v29  ;;  %v4137_v48 = vpop.f32.mrb[11].mxu1  ;;  %v4794_v26 = vor.u32 %v4793_v15, %v4790_v22  ;;  %v7484_v46 = vld [vmem:[%s8920_s5 + $0xd8] sm:$0xff]  }
 0x3e3   : > { %v4177_v6 = vadd.f32 %v6152_v29, %v4137_v48  ;;  %v4225_v38 = vor.u32 %v4224_v59, %v4220_v14  ;;  %v4233_v2 = vor.u32 %v4788_v39, %v4229_v3  ;;  %v4635_v14 = vrot.slane %v8290_v41, 5 }
 0x3e4   : > { %v4786_v50 = vor.u32 %v4785_v16, %v4782_v30  ;;  %v4185_v60 = vpack.c.bf16 %v4179_v63, %v4178_v27 }
 0x3e5   : > { %v4184_v47 = vpack.c.bf16 %v4177_v6, %v4176_v49  ;;  %v4230_v10 = vsel %vm1888_vm5, %v4225_v38, %v4229_v3  ;;  %v8305_v5 = vld [vmem:[#allocation3 + $0x18] sm:$0xff]  ;;  %v8415_v3 = vld [vmem:[#allocation3 + $0x8] sm:$0xfc] }
 0x3e6   : > { %v4795_v24 = vsel %vm4778_vm13, %v4786_v50, %v4794_v26  ;;  %4193 = vst.msk [vmem:[#allocation3 + $0x28] sm:$0x1f] %vm4192_vm12, %v4185_v60  ;;  %6842 = vmatmul.mubr.msk.bf16.vlgmr.msra.gmra.mrb[100].mxu0 %vm4186_vm11, %v4230_v10  ;;  %v8313_v35 = vld [vmem:[#allocation3 + $0x10] sm:$0xff]  ;;  %v8331_v44 = vshll.u32 %v8305_v5, 16  ;;  %v5412_v0 = vrot.slane %v8305_v5, 3  ;;  %v8340_v8 = vshrl.u32 %v8305_v5, 16 }
 0x3e7   : > { %6954 = vmatmul.mubr.msk.bf16.vlgmr.msra.gmra.mrb[12].mxu1 %vm4186_vm11, %v4795_v24  ;;  %4191 = vst.msk [vmem:[#allocation3 + $0x20] sm:$0xff] %vm4186_vm11, %v4184_v47  ;;  %6862 = vmatpush3.bf16.msra.mxu0 %v7477_v18  ;;  %v8319_v25 = vshll.u32 %v8313_v35, 16  ;;  %v8322_v42 = vshrl.u32 %v8313_v35, 16  ;;  %v5410_v28 = vrot.slane %v8313_v35, 3  ;;  %v4494_v11 = vrot.slane %v8313_v35, 1 }
 0x3e8   : > { %6845 = vmatprep.mubr.msk.bf16.mxu0 %vm7522_vm9, %v7521_v52  ;;  %6957 = vmatprep.mubr.msk.bf16.mxu1 %vm7522_vm9, %v7521_v52  ;;  %v4496_v51 = vrot.slane %v8305_v5, 1  ;;  %v4808_v55 = vrot.slane %v8340_v8, 5  ;;  %v4811_v23 = vrot.slane %v8331_v44, 6  ;;  %v4637_v19 = vrot.slane %v8313_v35, 5 }
 0x3e9   : > { %6863 = vmatprep.subr.bf16.mxu0 %v7521_v52  ;;  %v4237_v33 = vrot.slane %v8319_v25, 1  ;;  %v4799_v31 = vrot.slane %v8322_v42, 5  ;;  %v4802_v29 = vrot.slane %v8319_v25, 6  ;;  %7002 = vmatpush3.bf16.msra.mxu1 %v7480_v62  ;;  %v8354_v20 = vsel %vm2646_vm6, %v4492_v43, %v4494_v11 }
 0x3ea   : > { %7003 = vmatprep.subr.bf16.mxu1 %v7521_v52  ;;  %v8359_v21 = vsel %vm2828_vm7, %v5410_v28, %v5412_v0  ;;  %v8376_v58 = vsel %vm2646_vm6, %v4494_v11, %v4496_v51  ;;  %v8391_v34 = vor.u32 %v4811_v23, %v4808_v55  ;;  %v4245_v22 = vrot.slane %v8331_v44, 1 }
 0x3eb   : > { %v4803_v32 = vor.u32 %v4802_v29, %v4799_v31  ;;  %6864 = vmatpush3.bf16.msra.mxu0 %v7478_v45  ;;  %v4238_v1 = vsel %vm1888_vm5, %v4233_v2, %v4237_v33  ;;  %v4241_v36 = vor.u32 %v8322_v42, %v4237_v33  ;;  %v5256_v59 = vrot.slane %v8322_v42, 2 }
 0x3ec   : > { %6865 = vmatprep.subr.bf16.mxu0 %v7521_v52  ;;  %v5257_v30 = vrot.slane %v8319_v25, 3  ;;  %v4639_v49 = vrot.slane %v8305_v5, 5  ;;  %v4966_v50 = vrot.slane %v8290_v41, 6  ;;  %v4968_v60 = vrot.slane %v8313_v35, 6 }
 0x3ed   : > { %v4804_v4 = vsel %vm4778_vm13, %v4794_v26, %v4803_v32  ;;  %7004 = vmatpush3.bf16.msra.mxu1 %v7481_v56  ;;  %v4246_v63 = vsel %vm1888_vm5, %v4241_v36, %v4245_v22  ;;  %v4768_v48 = vld [vmem:[#allocation3 + $0x28] sm:$0x1]  ;;  %v8420_v26 = vsel %vm4633_vm14, %v4635_v14, %v4637_v19  ;;  %v4813_v38 = vsel %vm4778_vm13, %v4803_v32, %v8391_v34 }
 0x3ee   : > { %6846 = vmatmul.mubr.msk.bf16.gmra.mrb[104].mxu0 %vm4186_vm11, %v4238_v1  ;;  %v8371_v7 = vld [vmem:[#allocation3 + $0x20] sm:$0xf]  ;;  %7005 = vmatprep.subr.bf16.mxu1 %v7521_v52  ;;  %v8432_v47 = vsel %vm4633_vm14, %v4637_v19, %v4639_v49  ;;  %v4970_v24 = vrot.slane %v8305_v5, 6  ;;  %v8445_v42 = vld [vmem:[#allocation3 + $0x28] sm:$0x3f]  ;;  %v8450_v45 = vsel %vm4964_vm15, %v4966_v50, %v4968_v60  ;;  %v4974_v11 = vrot.slane %v4768_v48, 6 }
 0x3ef   : > { %6958 = vmatmul.mubr.msk.bf16.gmra.mrb[16].mxu1 %vm4186_vm11, %v4804_v4  ;;  %v8373_v57 = vld [vmem:[#allocation3 + $0x20] sm:$0xff]  ;;  %6849 = vmatprep.mubr.msk.bf16.mxu0 %vm7522_vm9, %v7521_v52  ;;  %v4498_v17 = vrot.slane %v8371_v7, 1  ;;  %v4251_v61 = vshll.u32 %v8371_v7, 16  ;;  %v5252_v29 = vshll.u32 %v8415_v3, 16  ;;  %v5258_v56 = vor.u32 %v5257_v30, %v5256_v59 }
 0x3f0   : > { %6961 = vmatprep.mubr.msk.bf16.mxu1 %vm7522_vm9, %v7521_v52  ;;  %v4815_v37 = vshrl.u32 %v8373_v57, 16  ;;  %v4818_v9 = vshll.u32 %v8373_v57, 16  ;;  %6866 = vmatpush3.bf16.msra.mxu0 %v7479_v12  ;;  %v5414_v39 = vrot.slane %v8373_v57, 3  ;;  %v4641_v6 = vrot.slane %v8373_v57, 5 }
 0x3f1   : > { %6867 = vmatprep.subr.bf16.mxu0 %v7521_v52  ;;  %7006 = vmatpush3.bf16.msra.mxu1 %v7483_v54  ;;  %v8409_v53 = vsel %vm2646_vm6, %v4496_v51, %v4498_v17  ;;  %v4253_v18 = vrot.slane %v4251_v61, 1  ;;  %v4972_v62 = vrot.slane %v8373_v57, 6  ;;  %v8455_v33 = vsel %vm4964_vm15, %v4968_v60, %v4970_v24  ;;  %v7485_v60 = vld [vmem:[%s8920_s5 + $0x40] sm:$0xff]  }
 0x3f2   : > { %7007 = vmatprep.subr.bf16.mxu1 %v7521_v52  ;;  %v8404_v15 = vsel %vm2828_vm7, %v5412_v0, %v5414_v39  ;;  %v4817_v16 = vrot.slane %v4815_v37, 5  ;;  %v4820_v27 = vrot.slane %v4818_v9, 6  ;;  %v8437_v10 = vsel %vm4633_vm14, %v4639_v49, %v4641_v6 }
 0x3f3   : > { %v5249_v0 = vshrl.u32 %v8415_v3, 16  ;;  %v8458_v31 = vsel %vm4964_vm15, %v4970_v24, %v4972_v62  ;;  %v8462_v2 = vsel %vm4964_vm15, %v4972_v62, %v4974_v11  ;;  %v5260_v12 = vrot.slane %v8340_v8, 2  ;;  %v7488_v62 = vld [vmem:[%s8920_s5 + $0x100] sm:$0xff]   ;;  %v7487_v11 = vld [vmem:[%s8920_s5 + $0x50] sm:$0xff]  }
 0x3f4   : > { %6868 = vmatpush3.bf16.msra.mxu0 %v7482_v13  ;;  %v4821_v25 = vor.u32 %v4820_v27, %v4817_v16  ;;  %v5261_v51 = vrot.slane %v8331_v44, 3  ;;  %v5254_v1 = vrot.slane %v5252_v29, 3  ;;  %v5264_v4 = vrot.slane %v4815_v37, 2  ;;  %v7491_v29 = vld [vmem:[%s8920_s5 + $0x110] sm:$0xff]  }
 0x3f5   : > { %7008 = vmatpush3.bf16.msra.mxu1 %v7484_v46  ;;  %6889 = vmatprep.subr.bf16.mxu0 %v7521_v52  ;;  %v5251_v32 = vrot.slane %v5249_v0, 2  ;;  %v5265_v55 = vrot.slane %v4818_v9, 3  ;;  %v5269_v23 = vshrl.u32 %v8445_v42, 16  ;;  %v4249_v54 = vor.u32 %v8340_v8, %v4245_v22 }
 0x3f6   : > { %6850 = vmatmul.mubr.msk.bf16.gmra.mrb[108].mxu0 %vm4186_vm11, %v4246_v63  ;;  %7057 = vmatprep.subr.bf16.mxu1 %v7521_v52  ;;  %v5262_v36 = vor.u32 %v5261_v51, %v5260_v12  ;;  %v5272_v13 = vshll.u32 %v8445_v42, 16  ;;  %v4822_v30 = vsel %vm4778_vm13, %v8391_v34, %v4821_v25  ;;  %v4824_v34 = vshll.u32 %v4768_v48, 16  ;;  %v7492_v12 = vld [vmem:[%s8920_s5 + $0x118] sm:$0xff]  }
 0x3f7   : > { %6962 = vmatmul.mubr.msk.bf16.gmra.mrb[20].mxu1 %vm4186_vm11, %v4813_v38  ;;  %6853 = vmatprep.mubr.msk.bf16.mxu0 %vm7522_vm9, %v7521_v52  ;;  %v5255_v61 = vor.u32 %v5254_v1, %v5251_v32  ;;  %v5266_v46 = vor.u32 %v5265_v55, %v5264_v4  ;;  %v5271_v19 = vrot.slane %v5269_v23, 2  ;;  %v4254_v59 = vsel %vm1888_vm5, %v4249_v54, %v4253_v18  ;;  %v5097_v1 = vld [vmem:[#allocation3 + $0x28] sm:$0x1f]  ;;  %v4200_v23 = vld [vmem:[#allocation3 + $0x20] sm:$0x7] }
 0x3f8   : > { %6965 = vmatprep.mubr.msk.bf16.mxu1 %vm7522_vm9, %v7521_v52  ;;  %v8473_v44 = vsel %vm2063_vm4, %v5258_v56, %v5262_v36  ;;  %v5274_v37 = vrot.slane %v5272_v13, 3  ;;  %v4255_v27 = vshrl.u32 %v8371_v7, 16  ;;  %v4826_v63 = vrot.slane %v4824_v34, 6  ;;  %v4476_v54 = vld [vmem:[#allocation3] sm:$0xfe]  ;;  %v7493_v13 = vld [vmem:[%s8920_s5 + $0x60] sm:$0xff]  }
 0x3f9   : > { %v8478_v8 = vsel %vm2063_vm4, %v5255_v61, %v5258_v56  ;;  %v8481_v9 = vsel %vm2063_vm4, %v5262_v36, %v5266_v46  ;;  %v5110_v48 = vrot.slane %v8313_v35, 2  ;;  %v7490_v56 = vld [vmem:[%s8920_s5 + $0x58] sm:$0xff]   ;;  %v5114_v32 = vrot.slane %v8373_v57, 2  ;;  %v7498_v7 = vld [vmem:[%s8920_s5 + $0xa8] sm:$0xff]  }
 0x3fa   : > { %v8487_v22 = vor.u32 %v5274_v37, %v5271_v19  ;;  %v4257_v49 = vor.u32 %v4255_v27, %v4253_v18  ;;  %v4827_v38 = vsel %vm4778_vm13, %v4821_v25, %v4826_v63  ;;  %v5109_v18 = vrot.slane %v8415_v3, 2  ;;  %v7486_v25 = vld [vmem:[%s8920_s5 + $0x48] sm:$0xff]  }
 0x3fb   : > { %v5112_v3 = vrot.slane %v8305_v5, 2  ;;  %v5116_v4 = vrot.slane %v5097_v1, 2  ;;  %v4491_v36 = vrot.slane %v4476_v54, 1  ;;  %v7502_v57 = vld [vmem:[%s8920_s5 + $0xe8] sm:$0xff]   ;;  %vm5571_vm5 = vsmask.f32 6416 }
 0x3fc   : > { %v8491_v16 = vsel %vm2063_vm4, %v5266_v46, %v8487_v22  ;;  %v5111_v24 = vsel %vm1263_vm2, %v5109_v18, %v5110_v48  ;;  %vm5590_vm4 = vsmask.f32 7950  ;;  %vm8840_vm10 = vmor %vm4778_vm13, %vm5571_vm5 }
 0x3fd   : > { %v5113_v0 = vsel %vm1263_vm2, %v5110_v48, %v5112_v3  ;;  %v5115_v51 = vsel %vm1263_vm2, %v5112_v3, %v5114_v32  ;;  %v5117_v55 = vsel %vm1263_vm2, %v5114_v32, %v5116_v4  ;;  %v4493_v46 = vsel %vm2646_vm6, %v4491_v36, %v4492_v43  ;;  %vm5561_vm2 = vmand %vm5559_vm0, %vm5560_vm1 }
 0x3fe   : > { %6854 = vmatmul.mubr.msk.bf16.gmra.mrb[112].mxu0 %vm4186_vm11, %v4254_v59  ;;  %v7494_v59 = vld [vmem:[%s8920_s5 + $0x68] sm:$0xff]   ;;  %v5416_v43 = vrot.slane %v8445_v42, 3  ;;  %vm5599_vm6 = vcmask 1040384   ;;  %vm8834_vm8 = vmand %vm5589_vm3, %vm5590_vm4  ;;  %vm5658_vm0 = vsmask.f32 1280 }
 0x3ff   : > { %6966 = vmatmul.mubr.msk.bf16.gmra.mrb[24].mxu1 %vm4186_vm11, %v4822_v30  ;;  %6857 = vmatprep.mubr.msk.bf16.mxu0 %vm7522_vm9, %v7521_v52  ;;  %vm5642_vm4 = vsmask.f32 7946 }
 0x400   : > { %6969 = vmatprep.mubr.msk.bf16.mxu1 %vm7522_vm9, %v7521_v52 }
 0x406   : > { %6858 = vmatmul.mubr.msk.bf16.gmra.mrb[116].mxu0 %vm4186_vm11, %v4257_v49 }
 0x407   : > { %6970 = vmatmul.mubr.msk.bf16.gmra.mrb[28].mxu1 %vm4186_vm11, %v4827_v38  ;;  %6869 = vmatprep.mubr.msk.bf16.mxu0 %vm7522_vm9, %v7521_v52 }
 0x408   : > { %7009 = vmatprep.mubr.msk.bf16.mxu1 %vm7522_vm9, %v7521_v52 }
 0x40e   : > { %6870 = vmatmul.mubr.msk.bf16.vlgmr.msra.gmra.mrb[120].mxu0 %vm4186_vm11, %v8293_v40  ;;  %v7489_v40 = vld [vmem:[%s8920_s5 + $0x108] sm:$0xff]  }
 0x40f   : > { %7010 = vmatmul.mubr.msk.bf16.vlgmr.msra.gmra.mrb[32].mxu1 %vm4186_vm11, %v5111_v24  ;;  %6890 = vmatpush3.bf16.msra.mxu0 %v7485_v60 }
 0x410   : > { %6873 = vmatprep.mubr.msk.bf16.mxu0 %vm7522_vm9, %v7521_v52  ;;  %7013 = vmatprep.mubr.msk.bf16.mxu1 %vm7522_vm9, %v7521_v52 }
 0x411   : > { %6891 = vmatprep.subr.bf16.mxu0 %v7521_v52  ;;  %7058 = vmatpush3.bf16.msra.mxu1 %v7488_v62 }
 0x412   : > { %7059 = vmatprep.subr.bf16.mxu1 %v7521_v52 }
 0x413   : > { %6892 = vmatpush3.bf16.msra.mxu0 %v7486_v25 }
 0x414   : > { %6893 = vmatprep.subr.bf16.mxu0 %v7521_v52 }
 0x415   : > { %7060 = vmatpush3.bf16.msra.mxu1 %v7489_v40 }
 0x416   : > { %6874 = vmatmul.mubr.msk.bf16.gmra.mrb[124].mxu0 %vm4186_vm11, %v8290_v41  ;;  %7061 = vmatprep.subr.bf16.mxu1 %v7521_v52  ;;  %v7504_v41 = vld [vmem:[%s8920_s5 + $0xf8] sm:$0xff]  }
 0x417   : > { %7014 = vmatmul.mubr.msk.bf16.gmra.mrb[36].mxu1 %vm4186_vm11, %v5113_v0  ;;  %6877 = vmatprep.mubr.msk.bf16.mxu0 %vm7522_vm9, %v7521_v52 }
 0x418   : > { %7017 = vmatprep.mubr.msk.bf16.mxu1 %vm7522_vm9, %v7521_v52  ;;  %6894 = vmatpush3.bf16.msra.mxu0 %v7487_v11 }
 0x419   : > { %6895 = vmatprep.subr.bf16.mxu0 %v7521_v52  ;;  %7062 = vmatpush3.bf16.msra.mxu1 %v7491_v29 }
 0x41a   : > { %7063 = vmatprep.subr.bf16.mxu1 %v7521_v52 }
 0x41c   : > { %6896 = vmatpush3.bf16.msra.mxu0 %v7490_v56 }
 0x41d   : > { %7064 = vmatpush3.bf16.msra.mxu1 %v7492_v12  ;;  %6917 = vmatprep.subr.bf16.mxu0 %v7521_v52 }
 0x41e   : > { %6878 = vmatmul.mubr.msk.bf16.gmra.mrb[128].mxu0 %vm4186_vm11, %v8313_v35  ;;  %v7495_v35 = vld [vmem:[%s8920_s5 + $0x70] sm:$0xff]  }
 0x41f   : > { %7018 = vmatmul.mubr.msk.bf16.gmra.mrb[40].mxu1 %vm4186_vm11, %v5115_v51  ;;  %6881 = vmatprep.mubr.msk.bf16.mxu0 %vm7522_vm9, %v7521_v52 }
 0x420   : > { %7021 = vmatprep.mubr.msk.bf16.mxu1 %vm7522_vm9, %v7521_v52 }
 0x426   : > { %6882 = vmatmul.mubr.msk.bf16.gmra.mrb[132].mxu0 %vm4186_vm11, %v8305_v5  ;;  %v5397_v5 = vld [vmem:[#allocation3 + $0x8] sm:$0xf8] }
 0x427   : > { %7022 = vmatmul.mubr.msk.bf16.gmra.mrb[44].mxu1 %vm4186_vm11, %v5117_v55  ;;  %6885 = vmatprep.mubr.msk.bf16.mxu0 %vm7522_vm9, %v7521_v52  ;;  %v5409_v61 = vrot.slane %v5397_v5, 3 }
 0x428   : > { %7025 = vmatprep.mubr.msk.bf16.mxu1 %vm7522_vm9, %v7521_v52 }
 0x429   : > { %v5411_v19 = vsel %vm2828_vm7, %v5409_v61, %v5410_v28  ;;  %v7496_v28 = vld [vmem:[%s8920_s5 + $0x78] sm:$0xff]  }
 0x42e   : > { %6886 = vmatmul.mubr.msk.bf16.gmra.mrb[136].mxu0 %vm4186_vm11, %v4200_v23 }
 0x42f   : > { %7026 = vmatmul.mubr.msk.bf16.gmra.mrb[48].mxu1 %vm4186_vm11, %v5116_v4  ;;  %6897 = vmatprep.mubr.msk.bf16.mxu0 %vm7522_vm9, %v7521_v52 }
 0x430   : > { %7065 = vmatprep.mubr.msk.bf16.mxu1 %vm7522_vm9, %v7521_v52 }
 0x436   : > { %6898 = vmatmul.mubr.msk.bf16.vlgmr.msra.gmra.mrb[140].mxu0 %vm4186_vm11, %v4493_v46 }
 0x437   : > { %7066 = vmatmul.mubr.msk.bf16.vlgmr.msra.gmra.mrb[52].mxu1 %vm4186_vm11, %v5411_v19  ;;  %6918 = vmatpush3.bf16.msra.mxu0 %v7493_v13 }
 0x438   : > { %6901 = vmatprep.mubr.msk.bf16.mxu0 %vm7522_vm9, %v7521_v52  ;;  %7069 = vmatprep.mubr.msk.bf16.mxu1 %vm7522_vm9, %v7521_v52 }
 0x439   : > { %6919 = vmatprep.subr.bf16.mxu0 %v7521_v52 }
 0x43b   : > { %6920 = vmatpush3.bf16.msra.mxu0 %v7494_v59 }
 0x43c   : > { %6921 = vmatprep.subr.bf16.mxu0 %v7521_v52 }
 0x43e   : > { %6902 = vmatmul.mubr.msk.bf16.gmra.mrb[144].mxu0 %vm4186_vm11, %v8354_v20  ;;  %v5417_v20 = vsel %vm2828_vm7, %v5414_v39, %v5416_v43  ;;  %v7497_v39 = vld [vmem:[%s8920_s5 + $0xa0] sm:$0xff]   ;;  %vm5600_vm7 = vcmask 1044484  }
 0x43f   : > { %7070 = vmatmul.mubr.msk.bf16.gmra.mrb[56].mxu1 %vm4186_vm11, %v8359_v21  ;;  %6905 = vmatprep.mubr.msk.bf16.mxu0 %vm7522_vm9, %v7521_v52  ;;  %v4620_v21 = vld [vmem:[#allocation3] sm:$0xe0] }
 0x440   : > { %7073 = vmatprep.mubr.msk.bf16.mxu1 %vm7522_vm9, %v7521_v52  ;;  %6922 = vmatpush3.bf16.msra.mxu0 %v7495_v35 }
 0x441   : > { %6923 = vmatprep.subr.bf16.mxu0 %v7521_v52 }
 0x444   : > { %6924 = vmatpush3.bf16.msra.mxu0 %v7496_v28 }
 0x445   : > { %6973 = vmatprep.subr.bf16.mxu0 %v7521_v52 }
 0x446   : > { %6906 = vmatmul.mubr.msk.bf16.gmra.mrb[148].mxu0 %vm4186_vm11, %v8376_v58  ;;  %v4634_v58 = vrot.slane %v4620_v21, 5 }
 0x447   : > { %7074 = vmatmul.mubr.msk.bf16.gmra.mrb[60].mxu1 %vm4186_vm11, %v8404_v15  ;;  %6909 = vmatprep.mubr.msk.bf16.mxu0 %vm7522_vm9, %v7521_v52 }
 0x448   : > { %7077 = vmatprep.mubr.msk.bf16.mxu1 %vm7522_vm9, %v7521_v52  ;;  %v4636_v15 = vsel %vm4633_vm14, %v4634_v58, %v4635_v14  ;;  %v4948_v14 = vld [vmem:[#allocation3] sm:$0xc0] }
 0x44e   : > { %6910 = vmatmul.mubr.msk.bf16.gmra.mrb[152].mxu0 %vm4186_vm11, %v8409_v53  ;;  %v7500_v53 = vld [vmem:[%s8920_s5 + $0xb8] sm:$0xff]  }
 0x44f   : > { %7078 = vmatmul.mubr.msk.bf16.gmra.mrb[64].mxu1 %vm4186_vm11, %v5417_v20  ;;  %6913 = vmatprep.mubr.msk.bf16.mxu0 %vm7522_vm9, %v7521_v52 }
 0x450   : > { %7081 = vmatprep.mubr.msk.bf16.mxu1 %vm7522_vm9, %v7521_v52 }
 0x456   : > { %6914 = vmatmul.mubr.msk.bf16.gmra.mrb[156].mxu0 %vm4186_vm11, %v4498_v17  ;;  %v7499_v17 = vld [vmem:[%s8920_s5 + $0xb0] sm:$0xff]  }
 0x457   : > { %7082 = vmatmul.mubr.msk.bf16.gmra.mrb[68].mxu1 %vm4186_vm11, %v5416_v43  ;;  %6925 = vmatprep.mubr.msk.bf16.mxu0 %vm7522_vm9, %v7521_v52 }
 0x45e   : > { %6926 = vmatmul.mubr.msk.bf16.vlgmr.msra.gmra.mrb[160].mxu0 %vm4186_vm11, %v4636_v15 }
 0x45f   : > { %6974 = vmatpush3.bf16.msra.mxu0 %v7497_v39  ;;  %6929 = vmatprep.mubr.msk.bf16.mxu0 %vm7522_vm9, %v7521_v52 }
 0x460   : > { %6975 = vmatprep.subr.bf16.mxu0 %v7521_v52 }
 0x463   : > { %6976 = vmatpush3.bf16.msra.mxu0 %v7498_v7 }
 0x464   : > { %6977 = vmatprep.subr.bf16.mxu0 %v7521_v52 }
 0x466   : > { %6930 = vmatmul.mubr.msk.bf16.gmra.mrb[164].mxu0 %vm4186_vm11, %v8420_v26  ;;  %v4965_v26 = vrot.slane %v4948_v14, 6 }
 0x467   : > { %6933 = vmatprep.mubr.msk.bf16.mxu0 %vm7522_vm9, %v7521_v52  ;;  %6978 = vmatpush3.bf16.msra.mxu0 %v7499_v17 }
 0x468   : > { %6979 = vmatprep.subr.bf16.mxu0 %v7521_v52 }
 0x46b   : > { %6980 = vmatpush3.bf16.msra.mxu0 %v7500_v53 }
 0x46c   : > { %7029 = vmatprep.subr.bf16.mxu0 %v7521_v52 }
 0x46e   : > { %6934 = vmatmul.mubr.msk.bf16.gmra.mrb[168].mxu0 %vm4186_vm11, %v8432_v47  ;;  %v7501_v47 = vld [vmem:[%s8920_s5 + $0xe0] sm:$0xff]  }
 0x46f   : > { %6937 = vmatprep.mubr.msk.bf16.mxu0 %vm7522_vm9, %v7521_v52 }
 0x476   : > { %6938 = vmatmul.mubr.msk.bf16.gmra.mrb[172].mxu0 %vm4186_vm11, %v8437_v10  ;;  %v4967_v10 = vsel %vm4964_vm15, %v4965_v26, %v4966_v50  ;;  %vm5647_vm15 = vcmask 517120  }
 0x477   : > { %6941 = vmatprep.mubr.msk.bf16.mxu0 %vm7522_vm9, %v7521_v52  ;;  %vm5659_vm5 = vmand %vm5647_vm15, %vm5658_vm0 }
 0x47e   : > { %6942 = vmatmul.mubr.msk.bf16.gmra.mrb[176].mxu0 %vm4186_vm11, %v4641_v6  ;;  %v7503_v6 = vld [vmem:[%s8920_s5 + $0xf0] sm:$0xff]  }
 0x47f   : > { %6981 = vmatprep.mubr.msk.bf16.mxu0 %vm7522_vm9, %v7521_v52 }
 0x486   : > { %6982 = vmatmul.mubr.msk.bf16.vlgmr.msra.gmra.mrb[180].mxu0 %vm4186_vm11, %v4967_v10 }
 0x487   : > { %7030 = vmatpush3.bf16.msra.mxu0 %v7501_v47  ;;  %6985 = vmatprep.mubr.msk.bf16.mxu0 %vm7522_vm9, %v7521_v52 }
 0x488   : > { %7031 = vmatprep.subr.bf16.mxu0 %v7521_v52 }
 0x48b   : > { %7032 = vmatpush3.bf16.msra.mxu0 %v7502_v57 }
 0x48c   : > { %7033 = vmatprep.subr.bf16.mxu0 %v7521_v52 }
 0x48e   : > { %6986 = vmatmul.mubr.msk.bf16.gmra.mrb[184].mxu0 %vm4186_vm11, %v8450_v45 }
 0x48f   : > { %6989 = vmatprep.mubr.msk.bf16.mxu0 %vm7522_vm9, %v7521_v52  ;;  %7034 = vmatpush3.bf16.msra.mxu0 %v7503_v6 }
 0x490   : > { %7035 = vmatprep.subr.bf16.mxu0 %v7521_v52 }
 0x493   : > { %7036 = vmatpush3.bf16.msra.mxu0 %v7504_v41 }
 0x496   : > { %6990 = vmatmul.mubr.msk.bf16.gmra.mrb[188].mxu0 %vm4186_vm11, %v8455_v33 }
 0x497   : > { %6993 = vmatprep.mubr.msk.bf16.mxu0 %vm7522_vm9, %v7521_v52 }
 0x49e   : > { %6994 = vmatmul.mubr.msk.bf16.gmra.mrb[192].mxu0 %vm4186_vm11, %v8458_v31 }
 0x49f   : > { %6997 = vmatprep.mubr.msk.bf16.mxu0 %vm7522_vm9, %v7521_v52 }
 0x4a6   : > { %6998 = vmatmul.mubr.msk.bf16.gmra.mrb[196].mxu0 %vm4186_vm11, %v8462_v2 }
 0x4a7   : > { %7037 = vmatprep.mubr.msk.bf16.mxu0 %vm7522_vm9, %v7521_v52 }
 0x4ae   : > { %7038 = vmatmul.mubr.msk.bf16.vlgmr.msra.gmra.mrb[200].mxu0 %vm4186_vm11, %v8478_v8 }
 0x4af   : > { %7041 = vmatprep.mubr.msk.bf16.mxu0 %vm7522_vm9, %v7521_v52 }
 0x4b6   : > { %7042 = vmatmul.mubr.msk.bf16.gmra.mrb[204].mxu0 %vm4186_vm11, %v8473_v44 }
 0x4b7   : > { %7045 = vmatprep.mubr.msk.bf16.mxu0 %vm7522_vm9, %v7521_v52 }
 0x4b9   : > { %v4331_v50 = vpop.f32.mrb[100].mxu0 }
 0x4ba   : > { %v8719_v42 = vpop.f32.mrb[12].mxu1  ;;  %v6843_v45 = vpop.f32.mrb[101].mxu0 }
 0x4bb   : > { %v6955_v33 = vpop.f32.mrb[13].mxu1  ;;  %v4334_v31 = vpop.f32.mrb[102].mxu0 }
 0x4bc   : > { %v8721_v2 = vpop.f32.mrb[14].mxu1  ;;  %v6844_v30 = vpop.f32.mrb[103].mxu0 }
 0x4bd   : > { %v6956_v37 = vpop.f32.mrb[15].mxu1 }
 0x4be   : > { %7046 = vmatmul.mubr.msk.bf16.gmra.mrb[208].mxu0 %vm4186_vm11, %v8481_v9 }
 0x4bf   : > { %7049 = vmatprep.mubr.msk.bf16.mxu0 %vm7522_vm9, %v7521_v52 }
 0x4c1   : > { %v4339_v44 = vpop.f32.mrb[104].mxu0 }
 0x4c2   : > { %v8727_v8 = vpop.f32.mrb[16].mxu1  ;;  %v6847_v34 = vpop.f32.mrb[105].mxu0 }
 0x4c3   : > { %v6959_v27 = vpop.f32.mrb[17].mxu1  ;;  %v4342_v63 = vpop.f32.mrb[106].mxu0 }
 0x4c4   : > { %v8729_v49 = vpop.f32.mrb[18].mxu1  ;;  %v6848_v38 = vpop.f32.mrb[107].mxu0 }
 0x4c5   : > { %v6960_v48 = vpop.f32.mrb[19].mxu1 }
 0x4c6   : > { %7050 = vmatmul.mubr.msk.bf16.gmra.mrb[212].mxu0 %vm4186_vm11, %v8491_v16 }
 0x4c7   : > { %7053 = vmatprep.mubr.msk.bf16.mxu0 %vm7522_vm9, %v7521_v52  ;;  %vm5595_vm9 = vcmask 518144  }
 0x4c8   : > { %vm8855_vm12 = vmand %vm5595_vm9, %vm4778_vm13  ;;  %vm5618_vm13 = vsmask.f32 7440 }
 0x4c9   : > { %v4347_v9 = vpop.f32.mrb[108].mxu0 }
 0x4ca   : > { %v8735_v60 = vpop.f32.mrb[20].mxu1  ;;  %v6851_v18 = vpop.f32.mrb[109].mxu0 }
 0x4cb   : > { %v6963_v24 = vpop.f32.mrb[21].mxu1  ;;  %v4350_v62 = vpop.f32.mrb[110].mxu0 }
 0x4cc   : > { %v8737_v25 = vpop.f32.mrb[22].mxu1  ;;  %v6852_v3 = vpop.f32.mrb[111].mxu0 }
 0x4cd   : > { %v6964_v40 = vpop.f32.mrb[23].mxu1 }
 0x4ce   : > { %7054 = vmatmul.mubr.msk.bf16.gmra.mrb[216].mxu0 %vm4186_vm11, %v8487_v22  ;;  %vm5601_vm11 = vmor %vm5599_vm6, %vm5600_vm7  ;;  %vm5668_vm6 = vsmask.f32 256  ;;  %vm5669_vm7 = vsmask.f32 4368 }
 0x4d1   : > { %v4355_v11 = vpop.f32.mrb[112].mxu0 }
 0x4d2   : > { %v8741_v0 = vpop.f32.mrb[24].mxu1  ;;  %v6855_v16 = vpop.f32.mrb[113].mxu0 }
 0x4d3   : > { %v6967_v29 = vpop.f32.mrb[25].mxu1  ;;  %v4358_v56 = vpop.f32.mrb[114].mxu0 }
 0x4d4   : > { %v8743_v52 = vpop.f32.mrb[26].mxu1  ;;  %v6856_v32 = vpop.f32.mrb[115].mxu0 }
 0x4d5   : > { %v6968_v12 = vpop.f32.mrb[27].mxu1 }
 0x4d9   : > { %v4363_v51 = vpop.f32.mrb[116].mxu0 }
 0x4da   : > { %v8745_v1 = vpop.f32.mrb[28].mxu1  ;;  %v6859_v4 = vpop.f32.mrb[117].mxu0 }
 0x4db   : > { %v6971_v55 = vpop.f32.mrb[29].mxu1  ;;  %v4366_v23 = vpop.f32.mrb[118].mxu0 }
 0x4dc   : > { %v4936_v54 = vpop.f32.mrb[30].mxu1  ;;  %v6860_v5 = vpop.f32.mrb[119].mxu0 }
 0x4dd   : > { %v6972_v36 = vpop.f32.mrb[31].mxu1 }
 0x4e1   : > { %v4438_v22 = vpop.f32.mrb[120].mxu0 }
 0x4e2   : > { %v8747_v13 = vpop.f32.mrb[32].mxu1  ;;  %v4439_v61 = vadd.f32 %v4438_v22, %v4331_v50  ;;  %v6871_v46 = vpop.f32.mrb[121].mxu0 }
 0x4e3   : > { %v7011_v19 = vpop.f32.mrb[33].mxu1  ;;  %v4441_v59 = vpop.f32.mrb[122].mxu0 }
 0x4e4   : > { %v8749_v35 = vpop.f32.mrb[34].mxu1  ;;  %v4442_v28 = vadd.f32 %v4441_v59, %v4334_v31  ;;  %v6872_v43 = vpop.f32.mrb[123].mxu0 }
 0x4e5   : > { %v7012_v20 = vpop.f32.mrb[35].mxu1 }
 0x4e9   : > { %v4446_v21 = vpop.f32.mrb[124].mxu0 }
 0x4ea   : > { %v8751_v58 = vpop.f32.mrb[36].mxu1  ;;  %v4447_v39 = vadd.f32 %v4446_v21, %v4339_v44  ;;  %v6875_v15 = vpop.f32.mrb[125].mxu0 }
 0x4eb   : > { %v7015_v7 = vpop.f32.mrb[37].mxu1  ;;  %v4449_v17 = vpop.f32.mrb[126].mxu0 }
 0x4ec   : > { %v8753_v53 = vpop.f32.mrb[38].mxu1  ;;  %v4450_v14 = vadd.f32 %v4449_v17, %v4342_v63  ;;  %v6876_v26 = vpop.f32.mrb[127].mxu0 }
 0x4ed   : > { %v7016_v47 = vpop.f32.mrb[39].mxu1 }
 0x4f1   : > { %v4454_v10 = vpop.f32.mrb[128].mxu0 }
 0x4f2   : > { %v8755_v57 = vpop.f32.mrb[40].mxu1  ;;  %v4455_v6 = vadd.f32 %v4454_v10, %v4347_v9  ;;  %v6879_v41 = vpop.f32.mrb[129].mxu0 }
 0x4f3   : > { %v7019_v50 = vpop.f32.mrb[41].mxu1  ;;  %v4457_v45 = vpop.f32.mrb[130].mxu0 }
 0x4f4   : > { %v8757_v33 = vpop.f32.mrb[42].mxu1  ;;  %v4458_v31 = vadd.f32 %v4457_v45, %v4350_v62  ;;  %v6880_v30 = vpop.f32.mrb[131].mxu0 }
 0x4f5   : > { %v7020_v37 = vpop.f32.mrb[43].mxu1 }
 0x4f9   : > { %v4462_v44 = vpop.f32.mrb[132].mxu0 }
 0x4fa   : > { %v8759_v34 = vpop.f32.mrb[44].mxu1  ;;  %v4463_v27 = vadd.f32 %v4462_v44, %v4355_v11  ;;  %v6883_v38 = vpop.f32.mrb[133].mxu0 }
 0x4fb   : > { %v7023_v63 = vpop.f32.mrb[45].mxu1  ;;  %v4465_v48 = vpop.f32.mrb[134].mxu0 }
 0x4fc   : > { %v8761_v18 = vpop.f32.mrb[46].mxu1  ;;  %v4466_v24 = vadd.f32 %v4465_v48, %v4358_v56  ;;  %v6884_v3 = vpop.f32.mrb[135].mxu0 }
 0x4fd   : > { %v7024_v9 = vpop.f32.mrb[47].mxu1 }
 0x501   : > { %v4470_v40 = vpop.f32.mrb[136].mxu0 }
 0x502   : > { %v8763_v16 = vpop.f32.mrb[48].mxu1  ;;  %v4471_v29 = vadd.f32 %v4470_v40, %v4363_v51  ;;  %v6887_v32 = vpop.f32.mrb[137].mxu0 }
 0x503   : > { %v7027_v62 = vpop.f32.mrb[49].mxu1  ;;  %v4473_v12 = vpop.f32.mrb[138].mxu0 }
 0x504   : > { %v5226_v4 = vpop.f32.mrb[50].mxu1  ;;  %v6888_v55 = vpop.f32.mrb[139].mxu0 }
 0x505   : > { %v7028_v23 = vpop.f32.mrb[51].mxu1 }
 0x509   : > { %v4573_v54 = vpop.f32.mrb[140].mxu0 }
 0x50a   : > { %v8765_v11 = vpop.f32.mrb[52].mxu1  ;;  %v4611_v5 = vadd.f32 %v4573_v54, %v4439_v61  ;;  %v6899_v36 = vpop.f32.mrb[141].mxu0 }
 0x50b   : > { %v7067_v22 = vpop.f32.mrb[53].mxu1  ;;  %v4576_v46 = vpop.f32.mrb[142].mxu0 }
 0x50c   : > { %v8767_v56 = vpop.f32.mrb[54].mxu1  ;;  %v4612_v19 = vadd.f32 %v4576_v46, %v4442_v28  ;;  %v6900_v59 = vpop.f32.mrb[143].mxu0 }
 0x50d   : > { %v7068_v43 = vpop.f32.mrb[55].mxu1 }
 0x511   : > { %v4581_v20 = vpop.f32.mrb[144].mxu0 }
 0x512   : > { %v8769_v51 = vpop.f32.mrb[56].mxu1  ;;  %v4613_v21 = vadd.f32 %v4581_v20, %v4447_v39  ;;  %v6903_v15 = vpop.f32.mrb[145].mxu0 }
 0x513   : > { %v7071_v7 = vpop.f32.mrb[57].mxu1  ;;  %v4584_v17 = vpop.f32.mrb[146].mxu0 }
 0x514   : > { %v8771_v26 = vpop.f32.mrb[58].mxu1  ;;  %v4614_v47 = vadd.f32 %v4584_v17, %v4450_v14  ;;  %v6904_v10 = vpop.f32.mrb[147].mxu0 }
 0x515   : > { %v7072_v61 = vpop.f32.mrb[59].mxu1 }
 0x519   : > { %v4589_v41 = vpop.f32.mrb[148].mxu0 }
 0x51a   : > { %v8773_v50 = vpop.f32.mrb[60].mxu1  ;;  %v4615_v45 = vadd.f32 %v4589_v41, %v4455_v6  ;;  %v6907_v30 = vpop.f32.mrb[149].mxu0 }
 0x51b   : > { %v7075_v28 = vpop.f32.mrb[61].mxu1  ;;  %v4592_v37 = vpop.f32.mrb[150].mxu0 }
 0x51c   : > { %v8775_v44 = vpop.f32.mrb[62].mxu1  ;;  %v4616_v38 = vadd.f32 %v4592_v37, %v4458_v31  ;;  %v6908_v63 = vpop.f32.mrb[151].mxu0 }
 0x51d   : > { %v7076_v39 = vpop.f32.mrb[63].mxu1 }
 0x521   : > { %v4597_v48 = vpop.f32.mrb[152].mxu0 }
 0x522   : > { %v8777_v3 = vpop.f32.mrb[64].mxu1  ;;  %v4617_v9 = vadd.f32 %v4597_v48, %v4463_v27  ;;  %v6911_v40 = vpop.f32.mrb[153].mxu0 }
 0x523   : > { %v7079_v14 = vpop.f32.mrb[65].mxu1  ;;  %v4600_v32 = vpop.f32.mrb[154].mxu0 }
 0x524   : > { %v8779_v62 = vpop.f32.mrb[66].mxu1  ;;  %v4618_v12 = vadd.f32 %v4600_v32, %v4466_v24  ;;  %v6912_v4 = vpop.f32.mrb[155].mxu0 }
 0x525   : > { %v7080_v6 = vpop.f32.mrb[67].mxu1 }
 0x529   : > { %v4605_v55 = vpop.f32.mrb[156].mxu0 }
 0x52a   : > { %v8781_v23 = vpop.f32.mrb[68].mxu1  ;;  %v4619_v54 = vadd.f32 %v4605_v55, %v4471_v29  ;;  %v6915_v36 = vpop.f32.mrb[157].mxu0 }
 0x52b   : > { %v7083_v31 = vpop.f32.mrb[69].mxu1  ;;  %v4608_v22 = vpop.f32.mrb[158].mxu0 }
 0x52c   : > { %v5526_v46 = vpop.f32.mrb[70].mxu1  ;;  %v6916_v59 = vpop.f32.mrb[159].mxu0 }
 0x52d   : > { %v7084_v43 = vpop.f32.mrb[71].mxu1 }
 0x531   : > { %v4716_v20 = vpop.f32.mrb[160].mxu0 }
 0x532   : > { %v4754_v27 = vadd.f32 %v4716_v20, %v4611_v5  ;;  %v6927_v15 = vpop.f32.mrb[161].mxu0 }
 0x533   : > { %v4719_v7 = vpop.f32.mrb[162].mxu0 }
 0x534   : > { %v4755_v17 = vadd.f32 %v4719_v7, %v4612_v19  ;;  %v6928_v10 = vpop.f32.mrb[163].mxu0  ;;  %v4939_v24 = vadd.f32 %v8719_v42, %v4754_v27 }
 0x536   : > { %v4940_v61 = vadd.f32 %v8721_v2, %v4755_v17 }
 0x539   : > { %v4724_v41 = vpop.f32.mrb[164].mxu0 }
 0x53a   : > { %v4756_v30 = vadd.f32 %v4724_v41, %v4613_v21  ;;  %v6931_v28 = vpop.f32.mrb[165].mxu0 }
 0x53b   : > { %v4727_v29 = vpop.f32.mrb[166].mxu0 }
 0x53c   : > { %v4757_v37 = vadd.f32 %v4727_v29, %v4614_v47  ;;  %v6932_v63 = vpop.f32.mrb[167].mxu0  ;;  %v4941_v39 = vadd.f32 %v8727_v8, %v4756_v30 }
 0x53e   : > { %v4942_v48 = vadd.f32 %v8729_v49, %v4757_v37 }
 0x541   : > { %v4732_v40 = vpop.f32.mrb[168].mxu0 }
 0x542   : > { %v4758_v5 = vadd.f32 %v4732_v40, %v4615_v45  ;;  %v6935_v14 = vpop.f32.mrb[169].mxu0 }
 0x543   : > { %v4735_v32 = vpop.f32.mrb[170].mxu0 }
 0x544   : > { %v4759_v19 = vadd.f32 %v4735_v32, %v4616_v38  ;;  %v6936_v4 = vpop.f32.mrb[171].mxu0  ;;  %v4943_v42 = vadd.f32 %v8735_v60, %v4758_v5 }
 0x546   : > { %v4944_v2 = vadd.f32 %v8737_v25, %v4759_v19 }
 0x549   : > { %v4740_v6 = vpop.f32.mrb[172].mxu0 }
 0x54a   : > { %v4760_v21 = vadd.f32 %v4740_v6, %v4617_v9  ;;  %v6939_v55 = vpop.f32.mrb[173].mxu0 }
 0x54b   : > { %v4743_v36 = vpop.f32.mrb[174].mxu0 }
 0x54c   : > { %v4761_v47 = vadd.f32 %v4743_v36, %v4618_v12  ;;  %v6940_v31 = vpop.f32.mrb[175].mxu0  ;;  %v4945_v8 = vadd.f32 %v8741_v0, %v4760_v21 }
 0x54e   : > { %v4946_v49 = vadd.f32 %v8743_v52, %v4761_v47 }
 0x551   : > { %v4748_v22 = vpop.f32.mrb[176].mxu0 }
 0x552   : > { %v4762_v45 = vadd.f32 %v4748_v22, %v4619_v54  ;;  %v6943_v46 = vpop.f32.mrb[177].mxu0 }
 0x553   : > { %v4751_v59 = vpop.f32.mrb[178].mxu0 }
 0x554   : > { %v6944_v38 = vpop.f32.mrb[179].mxu0  ;;  %v4947_v43 = vadd.f32 %v8745_v1, %v4762_v45 }
 0x559   : > { %v5049_v60 = vpop.f32.mrb[180].mxu0 }
 0x55a   : > { %v5087_v20 = vadd.f32 %v5049_v60, %v4939_v24  ;;  %v6983_v25 = vpop.f32.mrb[181].mxu0 }
 0x55b   : > { %v5052_v27 = vpop.f32.mrb[182].mxu0 }
 0x55c   : > { %v5088_v9 = vadd.f32 %v5052_v27, %v4940_v61  ;;  %v6984_v15 = vpop.f32.mrb[183].mxu0  ;;  %v5229_v12 = vadd.f32 %v8747_v13, %v5087_v20 }
 0x55e   : > { %v5230_v7 = vadd.f32 %v8749_v35, %v5088_v9 }
 0x561   : > { %v5057_v0 = vpop.f32.mrb[184].mxu0 }
 0x562   : > { %v5089_v17 = vadd.f32 %v5057_v0, %v4941_v39  ;;  %v6987_v52 = vpop.f32.mrb[185].mxu0 }
 0x563   : > { %v5060_v10 = vpop.f32.mrb[186].mxu0 }
 0x564   : > { %v5090_v54 = vadd.f32 %v5060_v10, %v4942_v48  ;;  %v6988_v41 = vpop.f32.mrb[187].mxu0  ;;  %v5231_v30 = vadd.f32 %v8751_v58, %v5089_v17 }
 0x566   : > { %v5232_v1 = vadd.f32 %v8753_v53, %v5090_v54 }
 0x569   : > { %v5065_v28 = vpop.f32.mrb[188].mxu0 }
 0x56a   : > { %v5091_v24 = vadd.f32 %v5065_v28, %v4943_v42  ;;  %v6991_v29 = vpop.f32.mrb[189].mxu0 }
 0x56b   : > { %v5068_v37 = vpop.f32.mrb[190].mxu0 }
 0x56c   : > { %v5092_v61 = vadd.f32 %v5068_v37, %v4944_v2  ;;  %v6992_v63 = vpop.f32.mrb[191].mxu0  ;;  %v8797_v13 = vadd.f32 %v8755_v57, %v5091_v24 }
 0x56e   : > { %v8800_v35 = vadd.f32 %v8757_v33, %v5092_v61 }
 0x571   : > { %v5073_v39 = vpop.f32.mrb[192].mxu0 }
 0x572   : > { %v5093_v40 = vadd.f32 %v5073_v39, %v4945_v8  ;;  %v6995_v48 = vpop.f32.mrb[193].mxu0 }
 0x573   : > { %v5076_v5 = vpop.f32.mrb[194].mxu0 }
 0x574   : > { %v5094_v58 = vadd.f32 %v5076_v5, %v4946_v49  ;;  %v6996_v14 = vpop.f32.mrb[195].mxu0  ;;  %v8803_v53 = vadd.f32 %v8759_v34, %v5093_v40  ;;  %v5562_v49 = vld [vmem:[%s8821_s19] sm:$0xf] }
 0x576   : > { %v8806_v32 = vadd.f32 %v8761_v18, %v5094_v58  ;;  %v8816_v18 = vld [vmem:[%s8921_s6] ss:$0 sm:$0xff] }
 0x579   : > { %v5081_v19 = vpop.f32.mrb[196].mxu0 }
 0x57a   : > { %v5095_v4 = vadd.f32 %v5081_v19, %v4947_v43  ;;  %v6999_v57 = vpop.f32.mrb[197].mxu0  ;;  %v5612_v19 = vld [vmem:[%s8821_s19 + $0x8] sm:$0x7] }
 0x57b   : > { %v5084_v42 = vpop.f32.mrb[198].mxu0 }
 0x57c   : > { %v7000_v2 = vpop.f32.mrb[199].mxu0  ;;  %v8809_v33 = vadd.f32 %v8763_v16, %v5095_v4 }
 0x581   : > { %v5350_v6 = vpop.f32.mrb[200].mxu0 }
 0x582   : > { %v5388_v21 = vadd.f32 %v5350_v6, %v5229_v12  ;;  %v7039_v55 = vpop.f32.mrb[201].mxu0 }
 0x583   : > { %v5353_v36 = vpop.f32.mrb[202].mxu0 }
 0x584   : > { %v5529_v47 = vadd.f32 %v8765_v11, %v5388_v21  ;;  %v5389_v34 = vadd.f32 %v5353_v36, %v5230_v7  ;;  %v7040_v31 = vpop.f32.mrb[203].mxu0 }
 0x586   : > { %v5530_v16 = vadd.f32 %v8767_v56, %v5389_v34  ;;  %v5545_v11 = vadd.f32 %v8816_v18, %v5529_v47 }
 0x588   : > { %v5546_v8 = vadd.f32 %v8816_v18, %v5530_v16 }
 0x589   : > { %v5358_v22 = vpop.f32.mrb[204].mxu0 }
 0x58a   : > { %v5554_v45 = vpack.c.bf16 %v5546_v8, %v5545_v11  ;;  %v6360_v46 = vpack.c.bf16 %v5546_v8, %v5546_v8  ;;  %v5390_v59 = vadd.f32 %v5358_v22, %v5231_v30  ;;  %v7043_v38 = vpop.f32.mrb[205].mxu0 }
 0x58b   : > { %v5361_v43 = vpop.f32.mrb[206].mxu0 }
 0x58c   : > { %v5563_v60 = vsel %vm5561_vm2, %v5554_v45, %v5562_v49  ;;  %v5574_v20 = vshll.u32 %v6360_v46, 16  ;;  %v5577_v25 = vshrl.u32 %v6360_v46, 16  ;;  %v5531_v56 = vadd.f32 %v8769_v51, %v5390_v59  ;;  %v7044_v27 = vpop.f32.mrb[207].mxu0  ;;  %vm8873_vm2 = vmor %vm5560_vm1, %vm5618_vm13 }
 0x58d   : > { %5564 = vst [vmem:[%s8821_s19] sm:$0xf] %v5563_v60  ;;  %v5391_v9 = vadd.f32 %v5361_v43, %v5232_v1 }
 0x58e   : > { %v5576_v15 = vrot.slane %v5574_v20, 6  ;;  %v5579_v12 = vrot.slane %v5577_v25, 5  ;;  %v5547_v7 = vadd.f32 %v8816_v18, %v5531_v56 }
 0x58f   : > { %v5532_v0 = vadd.f32 %v8771_v26, %v5391_v9 }
 0x590   : > { %v5580_v17 = vor.u32 %v5579_v12, %v5576_v15  ;;  %v6361_v52 = vpack.c.bf16 %v5547_v7, %v5547_v7 }
 0x591   : > { %v5548_v10 = vadd.f32 %v8816_v18, %v5532_v0  ;;  %v5366_v51 = vpop.f32.mrb[208].mxu0 }
 0x592   : > { %v5583_v41 = vshll.u32 %v6361_v52, 16  ;;  %v5602_v30 = vrot.slane %v6361_v52, 7  ;;  %v5392_v26 = vadd.f32 %v5366_v51, %v8797_v13  ;;  %v7047_v1 = vpop.f32.mrb[209].mxu0  ;;  %v5581_v28 = vrot.slane %v5580_v17, 4 }
 0x593   : > { %v6362_v29 = vpack.c.bf16 %v5548_v10, %v5548_v10  ;;  %v5369_v37 = vpop.f32.mrb[210].mxu0 }
 0x594   : > { %v5592_v61 = vld [vmem:[%s8821_s19] sm:$0x8]  ;;  %v5585_v63 = vrot.slane %v5583_v41, 6  ;;  %v5603_v39 = vrot.slane %v5602_v30, 4  ;;  %5609 = vst.msk [vmem:[%s8821_s19 + $0x4] sm:$0x8] %vm5589_vm3, %v5602_v30  ;;  %v5533_v13 = vadd.f32 %v8773_v50, %v5392_v26  ;;  %v5393_v40 = vadd.f32 %v5369_v37, %v8800_v35 }
 0x595   : > { %v7048_v48 = vpop.f32.mrb[211].mxu0  ;;  %v5593_v5 = vsel %vm8834_vm8, %v5576_v15, %v5592_v61  ;;  %v5604_v14 = vrot.slane %v6362_v29, 7  ;;  %v5621_v4 = vshrl.u32 %v6362_v29, 16  ;;  %v5624_v57 = vshll.u32 %v6362_v29, 16 }
 0x596   : > { %5594 = vst [vmem:[%s8821_s19] sm:$0x8] %v5593_v5  ;;  %v5586_v50 = vsel %vm8840_vm10, %v5581_v28, %v5585_v63  ;;  %v5549_v35 = vadd.f32 %v8816_v18, %v5533_v13  ;;  %v5534_v42 = vadd.f32 %v8775_v44, %v5393_v40  ;;  %vm5641_vm3 = vcmask 519170   ;;  %vm5670_vm10 = vmor %vm5668_vm6, %vm5669_vm7  ;;  %v5709_v5 = vld [vmem:[%s8821_s19 + $0x18] sm:$0x1] }
 0x597   : > { %5596 = vst.msk [vmem:[%s8821_s19 + $0x4] sm:$0x7] %vm5595_vm9, %v5586_v50  ;;  %v5605_v2 = vsel %vm5601_vm11, %v5603_v39, %v5604_v14  ;;  %v5623_v6 = vrot.slane %v5621_v4, 4  ;;  %v5626_v21 = vrot.slane %v5624_v57, 5  ;;  %vm5643_vm1 = vmand %vm5641_vm3, %vm5642_vm4  ;;  %vm5685_vm8 = vcmask 519169  }
 0x598   : > { %v5613_v55 = vsel %vm8855_vm12, %v5605_v2, %v5612_v19  ;;  %v6363_v36 = vpack.c.bf16 %v5549_v35, %v5549_v35  ;;  %v5550_v47 = vadd.f32 %v8816_v18, %v5534_v42  ;;  %vm5686_vm9 = vsmask.f32 7942 }
 0x599   : > { %5614 = vst [vmem:[%s8821_s19 + $0x8] sm:$0x7] %v5613_v55  ;;  %v5627_v34 = vor.u32 %v5626_v21, %v5623_v6  ;;  %v5374_v31 = vpop.f32.mrb[212].mxu0  ;;  %vm5691_vm11 = vcmask 516096   ;;  %vm5696_vm12 = vcmask 1046532   ;;  %vm5687_vm13 = vmand %vm5685_vm8, %vm5686_vm9 }
 0x59a   : > { %v5630_v16 = vshll.u32 %v6363_v36, 16  ;;  %v5634_v44 = vshrl.u32 %v6363_v36, 16  ;;  %v6364_v11 = vpack.c.bf16 %v5550_v47, %v5550_v47  ;;  %v5394_v8 = vadd.f32 %v5374_v31, %v8803_v53  ;;  %v7051_v49 = vpop.f32.mrb[213].mxu0  ;;  %v5660_v53 = vld [vmem:[%s8821_s19 + $0x10] sm:$0x3]  ;;  %vm5708_vm0 = vmand %vm5691_vm11, %vm5668_vm6 }
 0x59b   : > { %v5628_v22 = vrot.slane %v5627_v34, 4  ;;  %v5377_v46 = vpop.f32.mrb[214].mxu0 }
 0x59c   : > { %v5632_v59 = vrot.slane %v5630_v16, 5  ;;  %v5636_v38 = vrot.slane %v5634_v44, 4  ;;  %v5651_v43 = vrot.slane %v6364_v11, 6  ;;  %v5535_v60 = vadd.f32 %v8777_v3, %v5394_v8  ;;  %v7052_v20 = vpop.f32.mrb[215].mxu0 }
 0x59d   : > { %v5395_v25 = vadd.f32 %v5377_v46, %v8806_v32 }
 0x59e   : > { %v5633_v56 = vsel %vm8873_vm2, %v5628_v22, %v5632_v59  ;;  %v5637_v27 = vor.u32 %v5636_v38, %v5632_v59  ;;  %v5652_v9 = vrot.slane %v5651_v43, 4  ;;  %5656 = vst.msk [vmem:[%s8821_s19 + $0xc] sm:$0xc] %vm5641_vm3, %v5651_v43  ;;  %v5551_v15 = vadd.f32 %v8816_v18, %v5535_v60 }
 0x59f   : > { %v5536_v3 = vadd.f32 %v8779_v62, %v5395_v25  ;;  %vm5712_vm2 = vsmask.f32 7938 }
 0x5a0   : > { %v5638_v12 = vrot.slane %v5637_v27, 4  ;;  %v5644_v7 = vld [vmem:[%s8821_s19 + $0x8] sm:$0xc]  ;;  %v5661_v0 = vsel %vm5659_vm5, %v5652_v9, %v5660_v53  ;;  %v6365_v17 = vpack.c.bf16 %v5551_v15, %v5551_v15  ;;  %vm5713_vm3 = vmand %vm5691_vm11, %vm5712_vm2 }
 0x5a1   : > { %v5645_v52 = vsel %vm5643_vm1, %v5633_v56, %v5644_v7  ;;  %5662 = vst [vmem:[%s8821_s19 + $0x10] sm:$0x3] %v5661_v0  ;;  %v5552_v32 = vadd.f32 %v8816_v18, %v5536_v3  ;;  %v5382_v10 = vpop.f32.mrb[216].mxu0 }
 0x5a2   : > { %5648 = vst.msk [vmem:[%s8821_s19 + $0xc] sm:$0x3] %vm5647_vm15, %v5638_v12  ;;  %5646 = vst [vmem:[%s8821_s19 + $0x8] sm:$0xc] %v5645_v52  ;;  %v5672_v51 = vshrl.u32 %v6365_v17, 16  ;;  %v5396_v54 = vadd.f32 %v5382_v10, %v8809_v33  ;;  %v7055_v41 = vpop.f32.mrb[217].mxu0 }
 0x5a3   : > { %v6366_v62 = vpack.c.bf16 %v5552_v32, %v5552_v32  ;;  %v5385_v30 = vpop.f32.mrb[218].mxu0  ;;  %v5675_v1 = vshll.u32 %v6365_v17, 16  ;;  %vm5697_vm15 = vmor %vm4633_vm14, %vm5696_vm12 }
 0x5a4   : > { %v5674_v26 = vrot.slane %v5672_v51, 7  ;;  %v5537_v28 = vadd.f32 %v8781_v23, %v5396_v54  ;;  %v7056_v24 = vpop.f32.mrb[219].mxu0 }
 0x5a5   : > { %v5680_v37 = vshll.u32 %v6366_v62, 16  ;;  %v6307_v40 = vrot.slane %v6366_v62, 9 }
 0x5a6   : > { %v5677_v29 = vor.u32 %v5675_v1, %v5674_v26  ;;  %v5678_v33 = vrot.slane %v5674_v26, 4  ;;  %v5553_v61 = vadd.f32 %v8816_v18, %v5537_v28 }
 0x5a8   : > { %v5688_v63 = vld [vmem:[%s8821_s19 + $0x10] sm:$0xe]  ;;  %v5682_v39 = vsel %vm5670_vm10, %v5678_v33, %v5680_v37  ;;  %v6367_v13 = vpack.c.bf16 %v5553_v61, %v5553_v61 }
 0x5a9   : > { %v5689_v23 = vsel %vm5687_vm13, %v5677_v29, %v5688_v63  ;;  %5692 = vst.msk [vmem:[%s8821_s19 + $0x14] sm:$0x1] %vm5691_vm11, %v5682_v39 }
 0x5aa   : > { %5690 = vst [vmem:[%s8821_s19 + $0x10] sm:$0xe] %v5689_v23  ;;  %v5700_v48 = vrot.slane %v6367_v13, 5 }
 0x5ac   : > { %v5701_v58 = vsel %vm5697_vm15, %v6307_v40, %v5700_v48  ;;  %v5702_v18 = vrot.slane %v5700_v48, 4 }
 0x5ad   : > { %5706 = vst.msk [vmem:[%s8821_s19 + $0x14] sm:$0xe] %vm5685_vm8, %v5701_v58 }
 0x5ae   : > { %v5710_v14 = vsel %vm5708_vm0, %v5702_v18, %v5709_v5 }
 0x5af   : > { %5711 = vst [vmem:[%s8821_s19 + $0x18] sm:$0x1] %v5710_v14 }
 0x5b6   : > { %v5714_v19 = vld [vmem:[%s8821_s19 + $0x18] sm:$0x1] }
 0x5b7   : > { %v5715_v4 = vsel %vm5713_vm3, 0, %v5714_v19 }
 0x5b8   : > { %5716 = vst [vmem:[%s8821_s19 + $0x18] sm:$0x1] %v5715_v4 }
 0x5b9 PF: > { %s17_s24 = sadd.s32 1, %s7518_s24  }
 0x5ba   : > { %p14_p4 = scmp.ge.s32.totalorder %s17_s24, 4  }
 0x5bc   :  { %16 = sbr.rel (!%p14_p4) target bundleno = 1 (0x1), region = 101 }

</bundles_post_ra>
